<compile_context>
chip_gen: v5e
topology: v5e:2x2
jax: 0.10.0
libtpu: 0.0.40
codegen_flags: <defaults>
</compile_context>

<pallas_src>
import functools

import jax
import jax.numpy as jnp
from jax.experimental import pallas as pl
from jax.experimental.pallas import tpu as pltpu


# -----------------------------------------------------------------------------
# tiling helpers
# -----------------------------------------------------------------------------
def _row_tile(n, target):
    """Largest row tile <= target that divides n (multiple of 8 when sub-tiling)."""
    if n <= target:
        return n
    t = (target // 8) * 8
    while t >= 8:
        if n % t == 0:
            return t
        t -= 8
    return n


def _batch_group(b, c, target_rows=256):
    """Batches per CAFI grid step so the temporal matmul sees ~target_rows M rows."""
    gb = max(1, min(b, max(1, target_rows // max(c, 1))))
    while b % gb != 0:
        gb -= 1
    return gb


# -----------------------------------------------------------------------------
# RevIN (transpose fused in-kernel, lane-dense stats, grid over batch)
# -----------------------------------------------------------------------------
def _revin_norm_kernel(x_ref, g_ref, b_ref, y_ref, mean_ref, std_ref):
    xt = jnp.transpose(x_ref[...], (1, 0))                 # (C, L), L on lanes
    mean = jnp.mean(xt, axis=-1, keepdims=True)            # (C, 1)
    var = jnp.mean((xt - mean) ** 2, axis=-1, keepdims=True)
    std = jnp.sqrt(var + 1e-5)
    y_ref[...] = (xt - mean) / std * g_ref[...] + b_ref[...]
    mean_ref[...] = mean
    std_ref[...] = std


def revin_norm(x, gamma, beta):
    """(B, L, C) -> normalized (B, C, L), mean (B, C, 1), std (B, C, 1)."""
    B, L, C = x.shape
    return pl.pallas_call(
        _revin_norm_kernel,
        out_shape=(
            jax.ShapeDtypeStruct((B, C, L), jnp.float32),
            jax.ShapeDtypeStruct((B, C, 1), jnp.float32),
            jax.ShapeDtypeStruct((B, C, 1), jnp.float32),
        ),
        grid=(B,),
        in_specs=[
            pl.BlockSpec((None, L, C), lambda b: (b, 0, 0)),
            pl.BlockSpec((C, 1), lambda b: (0, 0)),
            pl.BlockSpec((C, 1), lambda b: (0, 0)),
        ],
        out_specs=(
            pl.BlockSpec((None, C, L), lambda b: (b, 0, 0)),
            pl.BlockSpec((None, C, 1), lambda b: (b, 0, 0)),
            pl.BlockSpec((None, C, 1), lambda b: (b, 0, 0)),
        ),
        compiler_params=pltpu.CompilerParams(dimension_semantics=("parallel",)),
    )(x, gamma, beta)


def _revin_denorm_kernel(x_ref, mean_ref, std_ref, g_ref, b_ref, y_ref):
    # eps*eps matches the official RevIN denorm (affine_weight + eps*eps).
    x = (x_ref[...] - b_ref[...]) / (g_ref[...] + 1e-10)    # (C, P), P on lanes
    x = x * std_ref[...] + mean_ref[...]
    y_ref[...] = jnp.transpose(x, (1, 0))                   # (P, C)


def revin_denorm(x_bcp, mean, std, gamma, beta):
    """(B, C, P) -> denormalized (B, P, C)."""
    B, C, P = x_bcp.shape
    return pl.pallas_call(
        _revin_denorm_kernel,
        out_shape=jax.ShapeDtypeStruct((B, P, C), jnp.float32),
        grid=(B,),
        in_specs=[
            pl.BlockSpec((None, C, P), lambda b: (b, 0, 0)),
            pl.BlockSpec((None, C, 1), lambda b: (b, 0, 0)),
            pl.BlockSpec((None, C, 1), lambda b: (b, 0, 0)),
            pl.BlockSpec((C, 1), lambda b: (0, 0)),
            pl.BlockSpec((C, 1), lambda b: (0, 0)),
        ],
        out_specs=pl.BlockSpec((None, P, C), lambda b: (b, 0, 0)),
        compiler_params=pltpu.CompilerParams(dimension_semantics=("parallel",)),
    )(x_bcp, mean, std, gamma, beta)


# -----------------------------------------------------------------------------
# MDMF: folded multi-scale mixing (bf16 MXU) + time-LayerNorm, row-tiled grid
# -----------------------------------------------------------------------------
def _mdmf_kernel(x_ref, w_ref, b_ref, g_ref, bb_ref, o_ref, *, layernorm):
    y = jnp.dot(x_ref[...].astype(jnp.bfloat16), w_ref[...],
                preferred_element_type=jnp.float32) + b_ref[...]
    if layernorm:
        mean = jnp.mean(y, axis=-1, keepdims=True)
        var = jnp.mean((y - mean) ** 2, axis=-1, keepdims=True)
        y = (y - mean) * jax.lax.rsqrt(var + 1e-5) * g_ref[...] + bb_ref[...]
    o_ref[...] = y.astype(o_ref.dtype)


def pallas_mdmf(x2d, w_eff_bf16, b_eff, ln_g, ln_b, layernorm):
    N, L = x2d.shape
    TM = _row_tile(N, 512)
    return pl.pallas_call(
        functools.partial(_mdmf_kernel, layernorm=layernorm),
        out_shape=jax.ShapeDtypeStruct((N, L), jnp.float32),
        grid=(N // TM,),
        in_specs=[
            pl.BlockSpec((TM, L), lambda i: (i, 0)),
            pl.BlockSpec((L, L), lambda i: (0, 0)),      # bf16, resident
            pl.BlockSpec((1, L), lambda i: (0, 0)),
            pl.BlockSpec((1, L), lambda i: (0, 0)),
            pl.BlockSpec((1, L), lambda i: (0, 0)),
        ],
        out_specs=pl.BlockSpec((TM, L), lambda i: (i, 0)),
        compiler_params=pltpu.CompilerParams(dimension_semantics=("parallel",)),
    )(x2d, w_eff_bf16, b_eff.reshape(1, L), ln_g.reshape(1, L), ln_b.reshape(1, L))


def mdmf_forward(x_bcl, p, scales, layernorm=True):
    # TODO(synk): MDMF's frequency-domain (FFT) enhancement is not reproducible from the
    # provided code; only the multi-scale decomposable mixing path is implemented.
    B, C, L = x_bcl.shape
    # Fold identity + every (avg-pool -> Linear) branch into one (L, L) operator:
    #   out = x @ W_id + sum_s (x @ A_s) @ W_s = x @ (W_id + sum_s A_s @ W_s)
    w_eff = p["mdm_id_w"]
    b_eff = p["mdm_id_b"]
    for s, (w, b) in zip(scales, p["mdm_scale"]):
        pool = (jnp.arange(L)[:, None] // s == jnp.arange(L // s)[None, :]).astype(jnp.float32) / s
        w_eff = w_eff + pool @ w
        b_eff = b_eff + b
    te = pallas_mdmf(x_bcl.reshape(B * C, L), w_eff.astype(jnp.bfloat16), b_eff,
                     p["mdm_ln_g"], p["mdm_ln_b"], layernorm)
    return te.reshape(B, C, L)


# -----------------------------------------------------------------------------
# CAFI: whole stack in one pallas_call; weights resident; state carried in o_ref
# -----------------------------------------------------------------------------
def _cafi_kernel(x_ref, wt1_ref, bt1_ref, wt2_ref, bt2_ref,
                 wu_ref, bu_ref, wv_ref, bv_ref, g_ref, b_ref,
                 o_ref, *, layernorm, rank):
    # TODO(synk): exact CAFI internals unknown; temporal MLP + low-rank channel interaction
    # with residuals is used as the stand-in (dropout = identity in eval mode).
    blk = pl.program_id(1)

    @pl.when(blk == 0)
    def _():
        o_ref[...] = x_ref[...]

    y3 = o_ref[...]                                          # (GB, C, L) f32, resident state
    gb, cc, ll = y3.shape
    x2 = y3.reshape(gb * cc, ll)                             # M = GB*C rows for the MXU

    # Temporal MLP (bf16 weights, f32 accumulate) + residual.
    h = jnp.dot(x2.astype(jnp.bfloat16), wt1_ref[blk],
                preferred_element_type=jnp.float32) + bt1_ref[blk]
    h = jax.nn.gelu(h)
    h = jnp.dot(h.astype(jnp.bfloat16), wt2_ref[blk],
                preferred_element_type=jnp.float32) + bt2_ref[blk]
    y3 = (x2 + h).reshape(gb, cc, ll)

    # Rank-`rank` cross-channel interaction on VPU/XLU (no K=2 MXU passes), per batch.
    wu = wu_ref[blk]                                         # (C, R)
    bu = bu_ref[blk]                                         # (R, 1)
    wv = wv_ref[blk]                                         # (C, R)   (stored as Wv^T)
    z = bv_ref[blk]                                          # (C, 1)
    for r in range(rank):                                    # static unroll (rank is tiny)
        u_r = jnp.sum(wu[:, r:r + 1] * y3, axis=1, keepdims=True) + bu[r:r + 1, :]
        u_r = jax.nn.gelu(u_r)                               # (GB, 1, L)
        z = z + wv[:, r:r + 1] * u_r                         # -> (GB, C, L)
    y3 = y3 + z

    if layernorm:
        mean = jnp.mean(y3, axis=-1, keepdims=True)
        var = jnp.mean((y3 - mean) ** 2, axis=-1, keepdims=True)
        y3 = (y3 - mean) * jax.lax.rsqrt(var + 1e-5) * g_ref[blk] + b_ref[blk]

    o_ref[...] = y3


def cafi_stack_forward(x_bcl, p, layernorm=True):
    B, C, L = x_bcl.shape
    n_block = p["cafi_wt1"].shape[0]
    rank = p["cafi_wu"].shape[-1]
    GB = _batch_group(B, C)
    full = lambda g, k: (0, 0, 0)   # weight stacks: constant index map -> DMA'd once, resident
    return pl.pallas_call(
        functools.partial(_cafi_kernel, layernorm=layernorm, rank=rank),
        out_shape=jax.ShapeDtypeStruct((B, C, L), jnp.float32),
        grid=(B // GB, n_block),
        in_specs=[
            pl.BlockSpec((GB, C, L), lambda g, k: (g, 0, 0)),
            pl.BlockSpec((n_block, L, L), full),
            pl.BlockSpec((n_block, 1, L), full),
            pl.BlockSpec((n_block, L, L), full),
            pl.BlockSpec((n_block, 1, L), full),
            pl.BlockSpec((n_block, C, rank), full),
            pl.BlockSpec((n_block, rank, 1), full),
            pl.BlockSpec((n_block, C, rank), full),
            pl.BlockSpec((n_block, C, 1), full),
            pl.BlockSpec((n_block, 1, L), full),
            pl.BlockSpec((n_block, 1, L), full),
        ],
        out_specs=pl.BlockSpec((GB, C, L), lambda g, k: (g, 0, 0)),
        compiler_params=pltpu.CompilerParams(
            dimension_semantics=("parallel", "arbitrary")),
    )(x_bcl, p["cafi_wt1"], p["cafi_bt1"], p["cafi_wt2"], p["cafi_bt2"],
      p["cafi_wu"], p["cafi_bu"], p["cafi_wv"], p["cafi_bv"],
      p["cafi_ln_g"], p["cafi_ln_b"])


# -----------------------------------------------------------------------------
# AMSE MoE: active experts only, bf16 weights, accumulation directly in o_ref
# -----------------------------------------------------------------------------
def _moe_kernel(ids_ref, flag_ref, x_ref, g_ref, w1_ref, b1_ref, w2_ref, b2_ref, o_ref):
    e = pl.program_id(1)

    @pl.when(e == 0)
    def _():
        o_ref[...] = jnp.zeros_like(o_ref)

    @pl.when(flag_ref[e] == 1)          # padded slots: compute skipped; their weight block
    def _():                            # index repeats the previous id, so no dead DMA either
        xb = x_ref[...].astype(jnp.bfloat16)
        h = jnp.dot(xb, w1_ref[...], preferred_element_type=jnp.float32) + b1_ref[...]
        h = jax.nn.gelu(h)              # GELU kept in f32
        y = jnp.dot(h.astype(jnp.bfloat16), w2_ref[...],
                    preferred_element_type=jnp.float32) + b2_ref[...]
        gate = g_ref[ids_ref[e]]        # (TM, 1) per-row gate from the resident gate block
        o_ref[...] += gate * y


def pallas_moe(x2d, gates_col, active_ids, active_flag, w1, b1, w2, b2):
    """x2d: (N, L); gates_col: (E, N, 1); w1: (E, L, F) bf16; w2: (E, F, P) bf16 -> (N, P)."""
    N, L = x2d.shape
    E, _, F = w1.shape
    P = w2.shape[-1]
    A = active_ids.shape[0]
    TM = _row_tile(N, 1024)

    grid_spec = pltpu.PrefetchScalarGridSpec(
        num_scalar_prefetch=2,
        grid=(N // TM, A),
        in_specs=[
            pl.BlockSpec((TM, L), lambda n, e, ids, flg: (n, 0)),
            pl.BlockSpec((E, TM, 1), lambda n, e, ids, flg: (0, n, 0)),
            pl.BlockSpec((None, L, F), lambda n, e, ids, flg: (ids[e], 0, 0)),
            pl.BlockSpec((None, 1, F), lambda n, e, ids, flg: (ids[e], 0, 0)),
            pl.BlockSpec((None, F, P), lambda n, e, ids, flg: (ids[e], 0, 0)),
            pl.BlockSpec((None, 1, P), lambda n, e, ids, flg: (ids[e], 0, 0)),
        ],
        out_specs=pl.BlockSpec((TM, P), lambda n, e, ids, flg: (n, 0)),
    )
    return pl.pallas_call(
        _moe_kernel,
        out_shape=jax.ShapeDtypeStruct((N, P), jnp.float32),
        grid_spec=grid_spec,
        compiler_params=pltpu.CompilerParams(
            dimension_semantics=("parallel", "arbitrary")),
        cost_estimate=pl.CostEstimate(
            flops=2 * N * (L * F + F * P) * A,
            transcendentals=N * F * A,
            bytes_accessed=A * (L * F + F * P) * 2 + N * (L + P) * 4 + E * N * 4),
    )(active_ids, active_flag, x2d, gates_col, w1, b1, w2, b2)


# -----------------------------------------------------------------------------
# Parameter init (deterministic, in-script)
# -----------------------------------------------------------------------------
def _glorot(key, shape):
    fan_in, fan_out = shape[-2], shape[-1]
    lim = (6.0 / (fan_in + fan_out)) ** 0.5
    return jax.random.uniform(key, shape, jnp.float32, -lim, lim)


def init_params(key, L, C, pred_len, n_block, k, c, rank, num_experts, ff_dim):
    keys = iter(jax.random.split(key, 256))

    def lin(kin, kout):
        return _glorot(next(keys), (kin, kout)), jnp.zeros((kout,), jnp.float32)

    p = {}
    # RevIN affine (per feature)
    p["rev_gamma"] = jnp.ones((C, 1), jnp.float32)
    p["rev_beta"] = jnp.zeros((C, 1), jnp.float32)

    # MDMF: multi-scale decomposable mixing over the time axis
    scales = [c ** i for i in range(k, 0, -1)]
    for s in scales:
        if L % s != 0:
            raise ValueError(f"seq_len {L} must be divisible by pooling scale {s}")
    p["mdm_id_w"], p["mdm_id_b"] = lin(L, L)
    p["mdm_scale"] = [lin(L // s, L) for s in scales]
    p["mdm_ln_g"] = jnp.ones((L,), jnp.float32)
    p["mdm_ln_b"] = jnp.zeros((L,), jnp.float32)

    # CAFI blocks, stacked along a leading block dim so the whole stack is one kernel.
    wt1, bt1, wt2, bt2, wu, bu, wv, bv, lng, lnb = ([] for _ in range(10))
    for _ in range(n_block):
        w, b = lin(L, L); wt1.append(w); bt1.append(b.reshape(1, L))
        w, b = lin(L, L); wt2.append(w); bt2.append(b.reshape(1, L))
        w, b = lin(C, rank); wu.append(w); bu.append(b.reshape(rank, 1))        # Wu: (C, R)
        w, b = lin(rank, C); wv.append(w.T); bv.append(b.reshape(C, 1))         # store Wv^T: (C, R)
        lng.append(jnp.ones((1, L), jnp.float32)); lnb.append(jnp.zeros((1, L), jnp.float32))
    # Temporal-MLP weights in bf16 (MXU-native, halves weight DMA/VMEM); LN absorbs rounding.
    p["cafi_wt1"] = jnp.stack(wt1).astype(jnp.bfloat16); p["cafi_bt1"] = jnp.stack(bt1)
    p["cafi_wt2"] = jnp.stack(wt2).astype(jnp.bfloat16); p["cafi_bt2"] = jnp.stack(bt2)
    p["cafi_wu"] = jnp.stack(wu); p["cafi_bu"] = jnp.stack(bu)
    p["cafi_wv"] = jnp.stack(wv); p["cafi_bv"] = jnp.stack(bv)
    p["cafi_ln_g"] = jnp.stack(lng); p["cafi_ln_b"] = jnp.stack(lnb)

    # AMSE: gating + experts (L -> ff_dim -> pred_len); expert weights in bf16.
    p["gate_w"], p["gate_b"] = lin(C, num_experts)
    p["moe_w1"] = jnp.stack(
        [_glorot(next(keys), (L, ff_dim)) for _ in range(num_experts)]).astype(jnp.bfloat16)
    p["moe_b1"] = jnp.zeros((num_experts, 1, ff_dim), jnp.float32)
    p["moe_w2"] = jnp.stack(
        [_glorot(next(keys), (ff_dim, pred_len)) for _ in range(num_experts)]).astype(jnp.bfloat16)
    p["moe_b2"] = jnp.zeros((num_experts, 1, pred_len), jnp.float32)
    return p, scales


# -----------------------------------------------------------------------------
# Module forward passes (glue is plain JAX, hot paths are Pallas)
# -----------------------------------------------------------------------------
def amse_forward(x_bcl, time_embedding, p, num_experts, top_k, entropy_coef):
    B, C, L = x_bcl.shape
    P = p["moe_w2"].shape[-1]

    # Gating from the time embedding (tiny matmul -> plain XLA, fuses with softmax/top_k).
    g_in = jnp.mean(time_embedding, axis=-1)                       # (B, C)
    logits = g_in @ p["gate_w"] + p["gate_b"]                      # (B, E)
    probs = jax.nn.softmax(logits, axis=-1)
    topv, topi = jax.lax.top_k(probs, top_k)
    mask = jnp.sum(jax.nn.one_hot(topi, num_experts, dtype=jnp.float32), axis=1)  # (B, E)
    gates = probs * mask
    gates = gates / (jnp.sum(gates, axis=-1, keepdims=True) + 1e-9)

    # Active-expert set: at most B*top_k experts can carry non-zero gate.  Padded slots
    # repeat the last valid id (same block index -> no dead weight DMA in the kernel).
    n_active = min(num_experts, B * top_k)
    gate_sum = jnp.sum(gates, axis=0)                              # (E,)
    top_sums, active_ids = jax.lax.top_k(gate_sum, n_active)
    active_flag = (top_sums > 0).astype(jnp.int32)
    n_valid = jnp.maximum(jnp.sum(active_flag), 1)
    last_valid = active_ids[n_valid - 1]
    active_ids = jnp.where(active_flag == 1, active_ids, last_valid).astype(jnp.int32)

    N = B * C
    gates_col = jnp.transpose(jnp.repeat(gates, C, axis=0))[:, :, None]   # (E, N, 1), tiny
    out = pallas_moe(x_bcl.reshape(N, L), gates_col, active_ids, active_flag,
                     p["moe_w1"], p["moe_b1"], p["moe_w2"], p["moe_b2"])
    out = out.reshape(B, C, P)

    # TODO(synk): exact AMSE selector/entropy loss formulas unknown; standard
    # load-balancing + entropy regularizer used.
    probs_mean = jnp.mean(probs, axis=0)
    route_frac = jnp.mean(mask, axis=0) / top_k
    selector_loss = num_experts * jnp.sum(probs_mean * route_frac)
    entropy = -jnp.sum(probs * jnp.log(probs + 1e-9), axis=-1)
    entropy_loss = entropy_coef * jnp.mean(entropy)
    return out, selector_loss, entropy_loss


def amd_forward(x, params, scales, *, num_experts, top_k, entropy_coef,
                target_slice=None, norm=True, layernorm=True):
    """x: (B, L, C) -> ((B, pred_len, C[target]), selector_loss, entropy_loss)."""
    if norm:
        x_bcl, mean, std = revin_norm(x, params["rev_gamma"], params["rev_beta"])
    else:
        x_bcl = jnp.transpose(x, (0, 2, 1))                        # (B, C, L)
    time_embedding = mdmf_forward(x_bcl, params, scales, layernorm=layernorm)
    x_bcl = cafi_stack_forward(x_bcl, params, layernorm=layernorm)
    out_bcp, selector_loss, entropy_loss = amse_forward(
        x_bcl, time_embedding, params, num_experts, top_k, entropy_coef)
    if norm:
        out = revin_denorm(out_bcp, mean, std, params["rev_gamma"], params["rev_beta"])
    else:
        out = jnp.transpose(out_bcp, (0, 2, 1))                    # (B, pred_len, C)
    if target_slice:
        out = out[:, :, target_slice]
    return out, selector_loss, entropy_loss


# -----------------------------------------------------------------------------
if __name__ == "__main__":
    # small, module-consistent shapes
    B, L, C = 2, 16, 8           # input_shape = (seq_len=16, feature_num=8)
    pred_len = 8
    n_block = 2
    k, c_scale = 2, 2
    num_experts, top_k, entropy_coef, ff_dim = 8, 2, 0.1, 2048
    target_slice = None

    root = jax.random.PRNGKey(0)
    k_in, k_par = jax.random.split(root)
    x = jax.random.normal(k_in, (B, L, C), jnp.float32)

    params, scales = init_params(k_par, L, C, pred_len, n_block, k, c_scale,
                                 rank=2, num_experts=num_experts, ff_dim=ff_dim)

    fwd = jax.jit(functools.partial(
        amd_forward, scales=scales, num_experts=num_experts, top_k=top_k,
        entropy_coef=entropy_coef, target_slice=target_slice, norm=True, layernorm=True))

    y, sel_loss, ent_loss = fwd(x, params)
    jax.block_until_ready((y, sel_loss, ent_loss))
    assert y.shape == (B, pred_len, C), y.shape
    assert bool(jnp.all(jnp.isfinite(y)))
    print("KERNEL_OK")
</pallas_src>

<mosaic_0001>
module attributes {stable_mosaic.version = 11 : i64} {
  func.func @_revin_norm_kernel(%arg0: i32, %arg1: memref<1x16x8xf32, #tpu.memory_space<vmem>>, %arg2: memref<8x1xf32, #tpu.memory_space<vmem>>, %arg3: memref<8x1xf32, #tpu.memory_space<vmem>>, %arg4: memref<1x8x16xf32, #tpu.memory_space<vmem>>, %arg5: memref<1x8x1xf32, #tpu.memory_space<vmem>>, %arg6: memref<1x8x1xf32, #tpu.memory_space<vmem>>) attributes {dimension_semantics = [#tpu.dimension_semantics<parallel>], iteration_bounds = array<i64: 2>, scalar_prefetch = 0 : i64, scratch_operands = 0 : i64, tpu.core_type = #tpu.core_type<tc>, window_params = [{transform_indices = @transform_0, window_bounds = array<i64: 1, 16, 8>}, {pipeline_mode = #tpu.pipeline_mode<synchronous>, transform_indices = @transform_1, window_bounds = array<i64: 8, 1>}, {pipeline_mode = #tpu.pipeline_mode<synchronous>, transform_indices = @transform_2, window_bounds = array<i64: 8, 1>}, {transform_indices = @transform_3, window_bounds = array<i64: 1, 8, 16>}, {transform_indices = @transform_4, window_bounds = array<i64: 1, 8, 1>}, {transform_indices = @transform_5, window_bounds = array<i64: 1, 8, 1>}]} {
    %c0 = arith.constant 0 : index
    %c0_0 = arith.constant 0 : index
    %c0_1 = arith.constant 0 : index
    %0 = vector.load %arg1[%c0, %c0_0, %c0_1] : memref<1x16x8xf32, #tpu.memory_space<vmem>>, vector<1x16x8xf32>
    %1 = vector.shape_cast %0 : vector<1x16x8xf32> to vector<16x8xf32>
    %2 = tpu.transpose %1, [1, 0] : vector<16x8xf32> -> vector<8x16xf32>
    %cst = arith.constant dense<0.000000e+00> : vector<8xf32>
    %3 = vector.multi_reduction <add>, %2, %cst [1] : vector<8x16xf32> to vector<8xf32>
    %4 = vector.shape_cast %3 : vector<8xf32> to vector<8x1xf32>
    %cst_2 = arith.constant 1.600000e+01 : f32
    %5 = vector.broadcast %cst_2 : f32 to vector<8x1xf32>
    %6 = arith.divf %4, %5 : vector<8x1xf32>
    %7 = vector.broadcast %6 : vector<8x1xf32> to vector<8x16xf32>
    %8 = arith.subf %2, %7 : vector<8x16xf32>
    %9 = arith.mulf %8, %8 : vector<8x16xf32>
    %cst_3 = arith.constant dense<0.000000e+00> : vector<8xf32>
    %10 = vector.multi_reduction <add>, %9, %cst_3 [1] : vector<8x16xf32> to vector<8xf32>
    %11 = vector.shape_cast %10 : vector<8xf32> to vector<8x1xf32>
    %cst_4 = arith.constant 1.600000e+01 : f32
    %12 = vector.broadcast %cst_4 : f32 to vector<8x1xf32>
    %13 = arith.divf %11, %12 : vector<8x1xf32>
    %cst_5 = arith.constant 9.99999974E-6 : f32
    %14 = vector.broadcast %cst_5 : f32 to vector<8x1xf32>
    %15 = arith.addf %13, %14 : vector<8x1xf32>
    %16 = math.sqrt %15 : vector<8x1xf32>
    %17 = vector.broadcast %6 : vector<8x1xf32> to vector<8x16xf32>
    %18 = arith.subf %2, %17 : vector<8x16xf32>
    %19 = vector.broadcast %16 : vector<8x1xf32> to vector<8x16xf32>
    %20 = arith.divf %18, %19 : vector<8x16xf32>
    %c0_6 = arith.constant 0 : index
    %c0_7 = arith.constant 0 : index
    %21 = vector.load %arg2[%c0_6, %c0_7] : memref<8x1xf32, #tpu.memory_space<vmem>>, vector<8x1xf32>
    %22 = vector.broadcast %21 : vector<8x1xf32> to vector<8x16xf32>
    %23 = arith.mulf %20, %22 : vector<8x16xf32>
    %c0_8 = arith.constant 0 : index
    %c0_9 = arith.constant 0 : index
    %24 = vector.load %arg3[%c0_8, %c0_9] : memref<8x1xf32, #tpu.memory_space<vmem>>, vector<8x1xf32>
    %25 = vector.broadcast %24 : vector<8x1xf32> to vector<8x16xf32>
    %26 = arith.addf %23, %25 : vector<8x16xf32>
    %c0_10 = arith.constant 0 : index
    %c0_11 = arith.constant 0 : index
    %c0_12 = arith.constant 0 : index
    %27 = vector.load %arg4[%c0_10, %c0_11, %c0_12] : memref<1x8x16xf32, #tpu.memory_space<vmem>>, vector<1x8x16xf32>
    %28 = vector.shape_cast %27 : vector<1x8x16xf32> to vector<8x16xf32>
    %29 = vector.shape_cast %26 : vector<8x16xf32> to vector<1x8x16xf32>
    tpu.vector_store %arg4[%c0_10, %c0_11, %c0_12], %29 {strides = array<i32>} : memref<1x8x16xf32, #tpu.memory_space<vmem>>, vector<1x8x16xf32>,
    %c0_13 = arith.constant 0 : index
    %c0_14 = arith.constant 0 : index
    %c0_15 = arith.constant 0 : index
    %30 = vector.load %arg5[%c0_13, %c0_14, %c0_15] : memref<1x8x1xf32, #tpu.memory_space<vmem>>, vector<1x8x1xf32>
    %31 = vector.shape_cast %30 : vector<1x8x1xf32> to vector<8x1xf32>
    %32 = vector.shape_cast %6 : vector<8x1xf32> to vector<1x8x1xf32>
    tpu.vector_store %arg5[%c0_13, %c0_14, %c0_15], %32 {strides = array<i32>} : memref<1x8x1xf32, #tpu.memory_space<vmem>>, vector<1x8x1xf32>,
    %c0_16 = arith.constant 0 : index
    %c0_17 = arith.constant 0 : index
    %c0_18 = arith.constant 0 : index
    %33 = vector.load %arg6[%c0_16, %c0_17, %c0_18] : memref<1x8x1xf32, #tpu.memory_space<vmem>>, vector<1x8x1xf32>
    %34 = vector.shape_cast %33 : vector<1x8x1xf32> to vector<8x1xf32>
    %35 = vector.shape_cast %16 : vector<8x1xf32> to vector<1x8x1xf32>
    tpu.vector_store %arg6[%c0_16, %c0_17, %c0_18], %35 {strides = array<i32>} : memref<1x8x1xf32, #tpu.memory_space<vmem>>, vector<1x8x1xf32>,
    return
  }
  func.func @transform_0(%arg0: i32) -> (i32, i32, i32) {
    %c0_i32 = arith.constant 0 : i32
    %c0_i32_0 = arith.constant 0 : i32
    %c0_i32_1 = arith.constant 0 : i32
    return %arg0, %c0_i32, %c0_i32_0 : i32, i32, i32
  }
  func.func @transform_1(%arg0: i32) -> (i32, i32) {
    %c0_i32 = arith.constant 0 : i32
    %c0_i32_0 = arith.constant 0 : i32
    %c0_i32_1 = arith.constant 0 : i32
    return %c0_i32, %c0_i32_0 : i32, i32
  }
  func.func @transform_2(%arg0: i32) -> (i32, i32) {
    %c0_i32 = arith.constant 0 : i32
    %c0_i32_0 = arith.constant 0 : i32
    %c0_i32_1 = arith.constant 0 : i32
    return %c0_i32, %c0_i32_0 : i32, i32
  }
  func.func @transform_3(%arg0: i32) -> (i32, i32, i32) {
    %c0_i32 = arith.constant 0 : i32
    %c0_i32_0 = arith.constant 0 : i32
    %c0_i32_1 = arith.constant 0 : i32
    return %arg0, %c0_i32, %c0_i32_0 : i32, i32, i32
  }
  func.func @transform_4(%arg0: i32) -> (i32, i32, i32) {
    %c0_i32 = arith.constant 0 : i32
    %c0_i32_0 = arith.constant 0 : i32
    %c0_i32_1 = arith.constant 0 : i32
    return %arg0, %c0_i32, %c0_i32_0 : i32, i32, i32
  }
  func.func @transform_5(%arg0: i32) -> (i32, i32, i32) {
    %c0_i32 = arith.constant 0 : i32
    %c0_i32_0 = arith.constant 0 : i32
    %c0_i32_1 = arith.constant 0 : i32
    return %arg0, %c0_i32, %c0_i32_0 : i32, i32, i32
  }
}

module attributes {stable_mosaic.version = 11 : i64} {
  func.func @_mdmf_kernel(%arg0: i32, %arg1: memref<16x16xf32, #tpu.memory_space<vmem>>, %arg2: memref<16x16xbf16, #tpu.memory_space<vmem>>, %arg3: memref<1x16xf32, #tpu.memory_space<vmem>>, %arg4: memref<1x16xf32, #tpu.memory_space<vmem>>, %arg5: memref<1x16xf32, #tpu.memory_space<vmem>>, %arg6: memref<16x16xf32, #tpu.memory_space<vmem>>) attributes {dimension_semantics = [#tpu.dimension_semantics<parallel>], iteration_bounds = array<i64: 1>, scalar_prefetch = 0 : i64, scratch_operands = 0 : i64, tpu.core_type = #tpu.core_type<tc>, window_params = [{transform_indices = @transform_0, window_bounds = array<i64: 16, 16>}, {pipeline_mode = #tpu.pipeline_mode<synchronous>, transform_indices = @transform_1, window_bounds = array<i64: 16, 16>}, {pipeline_mode = #tpu.pipeline_mode<synchronous>, transform_indices = @transform_2, window_bounds = array<i64: 1, 16>}, {pipeline_mode = #tpu.pipeline_mode<synchronous>, transform_indices = @transform_3, window_bounds = array<i64: 1, 16>}, {pipeline_mode = #tpu.pipeline_mode<synchronous>, transform_indices = @transform_4, window_bounds = array<i64: 1, 16>}, {transform_indices = @transform_5, window_bounds = array<i64: 16, 16>}]} {
    %c0 = arith.constant 0 : index
    %c0_0 = arith.constant 0 : index
    %0 = vector.load %arg1[%c0, %c0_0] : memref<16x16xf32, #tpu.memory_space<vmem>>, vector<16x16xf32>
    %1 = arith.truncf %0 : vector<16x16xf32> to vector<16x16xbf16>
    %c0_1 = arith.constant 0 : index
    %c0_2 = arith.constant 0 : index
    %2 = vector.load %arg2[%c0_1, %c0_2] : memref<16x16xbf16, #tpu.memory_space<vmem>>, vector<16x16xbf16>
    %cst = arith.constant dense<0.000000e+00> : vector<16x16xf32>
    %3 = tpu.matmul %1, %2, %cst {dimension_numbers = #tpu.dot_dimension_numbers<[1], [0], [0], [1], [0, 0, 1, 1], [], []>} : vector<16x16xbf16>, vector<16x16xbf16>, vector<16x16xf32> -> vector<16x16xf32>
    %c0_3 = arith.constant 0 : index
    %c0_4 = arith.constant 0 : index
    %4 = vector.load %arg3[%c0_3, %c0_4] : memref<1x16xf32, #tpu.memory_space<vmem>>, vector<1x16xf32>
    %5 = vector.broadcast %4 : vector<1x16xf32> to vector<16x16xf32>
    %6 = arith.addf %3, %5 : vector<16x16xf32>
    %cst_5 = arith.constant dense<0.000000e+00> : vector<16xf32>
    %7 = vector.multi_reduction <add>, %6, %cst_5 [1] : vector<16x16xf32> to vector<16xf32>
    %8 = vector.shape_cast %7 : vector<16xf32> to vector<16x1xf32>
    %cst_6 = arith.constant 1.600000e+01 : f32
    %9 = vector.broadcast %cst_6 : f32 to vector<16x1xf32>
    %10 = arith.divf %8, %9 : vector<16x1xf32>
    %11 = vector.broadcast %10 : vector<16x1xf32> to vector<16x16xf32>
    %12 = arith.subf %6, %11 : vector<16x16xf32>
    %13 = arith.mulf %12, %12 : vector<16x16xf32>
    %cst_7 = arith.constant dense<0.000000e+00> : vector<16xf32>
    %14 = vector.multi_reduction <add>, %13, %cst_7 [1] : vector<16x16xf32> to vector<16xf32>
    %15 = vector.shape_cast %14 : vector<16xf32> to vector<16x1xf32>
    %cst_8 = arith.constant 1.600000e+01 : f32
    %16 = vector.broadcast %cst_8 : f32 to vector<16x1xf32>
    %17 = arith.divf %15, %16 : vector<16x1xf32>
    %18 = vector.broadcast %10 : vector<16x1xf32> to vector<16x16xf32>
    %19 = arith.subf %6, %18 : vector<16x16xf32>
    %cst_9 = arith.constant 9.99999974E-6 : f32
    %20 = vector.broadcast %cst_9 : f32 to vector<16x1xf32>
    %21 = arith.addf %17, %20 : vector<16x1xf32>
    %22 = math.rsqrt %21 : vector<16x1xf32>
    %23 = vector.broadcast %22 : vector<16x1xf32> to vector<16x16xf32>
    %24 = arith.mulf %19, %23 : vector<16x16xf32>
    %c0_10 = arith.constant 0 : index
    %c0_11 = arith.constant 0 : index
    %25 = vector.load %arg4[%c0_10, %c0_11] : memref<1x16xf32, #tpu.memory_space<vmem>>, vector<1x16xf32>
    %26 = vector.broadcast %25 : vector<1x16xf32> to vector<16x16xf32>
    %27 = arith.mulf %24, %26 : vector<16x16xf32>
    %c0_12 = arith.constant 0 : index
    %c0_13 = arith.constant 0 : index
    %28 = vector.load %arg5[%c0_12, %c0_13] : memref<1x16xf32, #tpu.memory_space<vmem>>, vector<1x16xf32>
    %29 = vector.broadcast %28 : vector<1x16xf32> to vector<16x16xf32>
    %30 = arith.addf %27, %29 : vector<16x16xf32>
    %c0_14 = arith.constant 0 : index
    %c0_15 = arith.constant 0 : index
    %31 = vector.load %arg6[%c0_14, %c0_15] : memref<16x16xf32, #tpu.memory_space<vmem>>, vector<16x16xf32>
    tpu.vector_store %arg6[%c0_14, %c0_15], %30 {strides = array<i32>} : memref<16x16xf32, #tpu.memory_space<vmem>>, vector<16x16xf32>,
    return
  }
  func.func @transform_0(%arg0: i32) -> (i32, i32) {
    %c0_i32 = arith.constant 0 : i32
    %c0_i32_0 = arith.constant 0 : i32
    return %arg0, %c0_i32 : i32, i32
  }
  func.func @transform_1(%arg0: i32) -> (i32, i32) {
    %c0_i32 = arith.constant 0 : i32
    %c0_i32_0 = arith.constant 0 : i32
    %c0_i32_1 = arith.constant 0 : i32
    return %c0_i32, %c0_i32_0 : i32, i32
  }
  func.func @transform_2(%arg0: i32) -> (i32, i32) {
    %c0_i32 = arith.constant 0 : i32
    %c0_i32_0 = arith.constant 0 : i32
    %c0_i32_1 = arith.constant 0 : i32
    return %c0_i32, %c0_i32_0 : i32, i32
  }
  func.func @transform_3(%arg0: i32) -> (i32, i32) {
    %c0_i32 = arith.constant 0 : i32
    %c0_i32_0 = arith.constant 0 : i32
    %c0_i32_1 = arith.constant 0 : i32
    return %c0_i32, %c0_i32_0 : i32, i32
  }
  func.func @transform_4(%arg0: i32) -> (i32, i32) {
    %c0_i32 = arith.constant 0 : i32
    %c0_i32_0 = arith.constant 0 : i32
    %c0_i32_1 = arith.constant 0 : i32
    return %c0_i32, %c0_i32_0 : i32, i32
  }
  func.func @transform_5(%arg0: i32) -> (i32, i32) {
    %c0_i32 = arith.constant 0 : i32
    %c0_i32_0 = arith.constant 0 : i32
    return %arg0, %c0_i32 : i32, i32
  }
}

module attributes {stable_mosaic.version = 11 : i64} {
  func.func @_cafi_kernel(%arg0: i32, %arg1: i32, %arg2: memref<2x8x16xf32, #tpu.memory_space<vmem>>, %arg3: memref<2x16x16xbf16, #tpu.memory_space<vmem>>, %arg4: memref<2x1x16xf32, #tpu.memory_space<vmem>>, %arg5: memref<2x16x16xbf16, #tpu.memory_space<vmem>>, %arg6: memref<2x1x16xf32, #tpu.memory_space<vmem>>, %arg7: memref<2x8x2xf32, #tpu.memory_space<vmem>>, %arg8: memref<2x2x1xf32, #tpu.memory_space<vmem>>, %arg9: memref<2x8x2xf32, #tpu.memory_space<vmem>>, %arg10: memref<2x8x1xf32, #tpu.memory_space<vmem>>, %arg11: memref<2x1x16xf32, #tpu.memory_space<vmem>>, %arg12: memref<2x1x16xf32, #tpu.memory_space<vmem>>, %arg13: memref<2x8x16xf32, #tpu.memory_space<vmem>>) attributes {dimension_semantics = [#tpu.dimension_semantics<parallel>, #tpu.dimension_semantics<arbitrary>], iteration_bounds = array<i64: 1, 2>, scalar_prefetch = 0 : i64, scratch_operands = 0 : i64, tpu.core_type = #tpu.core_type<tc>, window_params = [{transform_indices = @transform_0, window_bounds = array<i64: 2, 8, 16>}, {pipeline_mode = #tpu.pipeline_mode<synchronous>, transform_indices = @transform_1, window_bounds = array<i64: 2, 16, 16>}, {pipeline_mode = #tpu.pipeline_mode<synchronous>, transform_indices = @transform_2, window_bounds = array<i64: 2, 1, 16>}, {pipeline_mode = #tpu.pipeline_mode<synchronous>, transform_indices = @transform_3, window_bounds = array<i64: 2, 16, 16>}, {pipeline_mode = #tpu.pipeline_mode<synchronous>, transform_indices = @transform_4, window_bounds = array<i64: 2, 1, 16>}, {pipeline_mode = #tpu.pipeline_mode<synchronous>, transform_indices = @transform_5, window_bounds = array<i64: 2, 8, 2>}, {pipeline_mode = #tpu.pipeline_mode<synchronous>, transform_indices = @transform_6, window_bounds = array<i64: 2, 2, 1>}, {pipeline_mode = #tpu.pipeline_mode<synchronous>, transform_indices = @transform_7, window_bounds = array<i64: 2, 8, 2>}, {pipeline_mode = #tpu.pipeline_mode<synchronous>, transform_indices = @transform_8, window_bounds = array<i64: 2, 8, 1>}, {pipeline_mode = #tpu.pipeline_mode<synchronous>, transform_indices = @transform_9, window_bounds = array<i64: 2, 1, 16>}, {pipeline_mode = #tpu.pipeline_mode<synchronous>, transform_indices = @transform_10, window_bounds = array<i64: 2, 1, 16>}, {transform_indices = @transform_11, window_bounds = array<i64: 2, 8, 16>}]} {
    %c0_i32 = arith.constant 0 : i32
    %0 = arith.cmpi eq, %arg1, %c0_i32 : i32
    %1 = arith.extui %0 : i1 to i32
    %c0_i32_0 = arith.constant 0 : i32
    %2 = arith.cmpi ne, %1, %c0_i32_0 : i32
    scf.if %2 {
      %c0_46 = arith.constant 0 : index
      %c0_47 = arith.constant 0 : index
      %c0_48 = arith.constant 0 : index
      %144 = vector.load %arg2[%c0_46, %c0_47, %c0_48] : memref<2x8x16xf32, #tpu.memory_space<vmem>>, vector<2x8x16xf32>
      %c0_49 = arith.constant 0 : index
      %c0_50 = arith.constant 0 : index
      %c0_51 = arith.constant 0 : index
      %145 = vector.load %arg13[%c0_49, %c0_50, %c0_51] : memref<2x8x16xf32, #tpu.memory_space<vmem>>, vector<2x8x16xf32>
      tpu.vector_store %arg13[%c0_49, %c0_50, %c0_51], %144 {strides = array<i32>} : memref<2x8x16xf32, #tpu.memory_space<vmem>>, vector<2x8x16xf32>,
    } else {
    }
    %c0 = arith.constant 0 : index
    %c0_1 = arith.constant 0 : index
    %c0_2 = arith.constant 0 : index
    %3 = vector.load %arg13[%c0, %c0_1, %c0_2] : memref<2x8x16xf32, #tpu.memory_space<vmem>>, vector<2x8x16xf32>
    %4 = vector.shape_cast %3 : vector<2x8x16xf32> to vector<16x16xf32>
    %5 = arith.truncf %4 : vector<16x16xf32> to vector<16x16xbf16>
    %6 = arith.index_cast %arg1 : i32 to index
    %c0_3 = arith.constant 0 : index
    %c0_4 = arith.constant 0 : index
    %7 = vector.load %arg3[%6, %c0_3, %c0_4] : memref<2x16x16xbf16, #tpu.memory_space<vmem>>, vector<1x16x16xbf16>
    %8 = vector.shape_cast %7 : vector<1x16x16xbf16> to vector<16x16xbf16>
    %cst = arith.constant dense<0.000000e+00> : vector<16x16xf32>
    %9 = tpu.matmul %5, %8, %cst {dimension_numbers = #tpu.dot_dimension_numbers<[1], [0], [0], [1], [0, 0, 1, 1], [], []>} : vector<16x16xbf16>, vector<16x16xbf16>, vector<16x16xf32> -> vector<16x16xf32>
    %10 = arith.index_cast %arg1 : i32 to index
    %c0_5 = arith.constant 0 : index
    %c0_6 = arith.constant 0 : index
    %11 = vector.load %arg4[%10, %c0_5, %c0_6] : memref<2x1x16xf32, #tpu.memory_space<vmem>>, vector<1x1x16xf32>
    %12 = vector.shape_cast %11 : vector<1x1x16xf32> to vector<1x16xf32>
    %13 = vector.broadcast %12 : vector<1x16xf32> to vector<16x16xf32>
    %14 = arith.addf %9, %13 : vector<16x16xf32>
    %15 = arith.mulf %14, %14 : vector<16x16xf32>
    %16 = arith.mulf %14, %15 : vector<16x16xf32>
    %cst_7 = arith.constant 4.471500e-02 : f32
    %17 = vector.broadcast %cst_7 : f32 to vector<16x16xf32>
    %18 = arith.mulf %17, %16 : vector<16x16xf32>
    %19 = arith.addf %14, %18 : vector<16x16xf32>
    %cst_8 = arith.constant 0.797884583 : f32
    %20 = vector.broadcast %cst_8 : f32 to vector<16x16xf32>
    %21 = arith.mulf %20, %19 : vector<16x16xf32>
    %22 = math.tanh %21 : vector<16x16xf32>
    %cst_9 = arith.constant 1.000000e+00 : f32
    %23 = vector.broadcast %cst_9 : f32 to vector<16x16xf32>
    %24 = arith.addf %23, %22 : vector<16x16xf32>
    %cst_10 = arith.constant 5.000000e-01 : f32
    %25 = vector.broadcast %cst_10 : f32 to vector<16x16xf32>
    %26 = arith.mulf %25, %24 : vector<16x16xf32>
    %27 = arith.mulf %14, %26 : vector<16x16xf32>
    %28 = arith.truncf %27 : vector<16x16xf32> to vector<16x16xbf16>
    %29 = arith.index_cast %arg1 : i32 to index
    %c0_11 = arith.constant 0 : index
    %c0_12 = arith.constant 0 : index
    %30 = vector.load %arg5[%29, %c0_11, %c0_12] : memref<2x16x16xbf16, #tpu.memory_space<vmem>>, vector<1x16x16xbf16>
    %31 = vector.shape_cast %30 : vector<1x16x16xbf16> to vector<16x16xbf16>
    %cst_13 = arith.constant dense<0.000000e+00> : vector<16x16xf32>
    %32 = tpu.matmul %28, %31, %cst_13 {dimension_numbers = #tpu.dot_dimension_numbers<[1], [0], [0], [1], [0, 0, 1, 1], [], []>} : vector<16x16xbf16>, vector<16x16xbf16>, vector<16x16xf32> -> vector<16x16xf32>
    %33 = arith.index_cast %arg1 : i32 to index
    %c0_14 = arith.constant 0 : index
    %c0_15 = arith.constant 0 : index
    %34 = vector.load %arg6[%33, %c0_14, %c0_15] : memref<2x1x16xf32, #tpu.memory_space<vmem>>, vector<1x1x16xf32>
    %35 = vector.shape_cast %34 : vector<1x1x16xf32> to vector<1x16xf32>
    %36 = vector.broadcast %35 : vector<1x16xf32> to vector<16x16xf32>
    %37 = arith.addf %32, %36 : vector<16x16xf32>
    %38 = arith.addf %4, %37 : vector<16x16xf32>
    %39 = vector.shape_cast %38 : vector<16x16xf32> to vector<2x8x16xf32>
    %40 = arith.index_cast %arg1 : i32 to index
    %c0_16 = arith.constant 0 : index
    %c0_17 = arith.constant 0 : index
    %41 = vector.load %arg7[%40, %c0_16, %c0_17] : memref<2x8x2xf32, #tpu.memory_space<vmem>>, vector<1x8x2xf32>
    %42 = vector.shape_cast %41 : vector<1x8x2xf32> to vector<8x2xf32>
    %43 = arith.index_cast %arg1 : i32 to index
    %c0_18 = arith.constant 0 : index
    %c0_19 = arith.constant 0 : index
    %44 = vector.load %arg8[%43, %c0_18, %c0_19] : memref<2x2x1xf32, #tpu.memory_space<vmem>>, vector<1x2x1xf32>
    %45 = vector.shape_cast %44 : vector<1x2x1xf32> to vector<2x1xf32>
    %46 = arith.index_cast %arg1 : i32 to index
    %c0_20 = arith.constant 0 : index
    %c0_21 = arith.constant 0 : index
    %47 = vector.load %arg9[%46, %c0_20, %c0_21] : memref<2x8x2xf32, #tpu.memory_space<vmem>>, vector<1x8x2xf32>
    %48 = vector.shape_cast %47 : vector<1x8x2xf32> to vector<8x2xf32>
    %49 = arith.index_cast %arg1 : i32 to index
    %c0_22 = arith.constant 0 : index
    %c0_23 = arith.constant 0 : index
    %50 = vector.load %arg10[%49, %c0_22, %c0_23] : memref<2x8x1xf32, #tpu.memory_space<vmem>>, vector<1x8x1xf32>
    %51 = vector.shape_cast %50 : vector<1x8x1xf32> to vector<8x1xf32>
    %52 = vector.extract_strided_slice %42 {offsets = [0, 0], sizes = [8, 1], strides = [1, 1]} : vector<8x2xf32> to vector<8x1xf32>
    %53 = vector.shape_cast %52 : vector<8x1xf32> to vector<1x8x1xf32>
    %54 = vector.broadcast %53 : vector<1x8x1xf32> to vector<2x8x16xf32>
    %55 = arith.mulf %54, %39 : vector<2x8x16xf32>
    %cst_24 = arith.constant dense<0.000000e+00> : vector<2x16xf32>
    %56 = vector.multi_reduction <add>, %55, %cst_24 [1] : vector<2x8x16xf32> to vector<2x16xf32>
    %57 = vector.shape_cast %56 : vector<2x16xf32> to vector<2x1x16xf32>
    %58 = vector.extract_strided_slice %45 {offsets = [0, 0], sizes = [1, 1], strides = [1, 1]} : vector<2x1xf32> to vector<1x1xf32>
    %59 = vector.shape_cast %58 : vector<1x1xf32> to vector<1x1x1xf32>
    %60 = vector.broadcast %59 : vector<1x1x1xf32> to vector<2x1x16xf32>
    %61 = arith.addf %57, %60 : vector<2x1x16xf32>
    %62 = arith.mulf %61, %61 : vector<2x1x16xf32>
    %63 = arith.mulf %61, %62 : vector<2x1x16xf32>
    %cst_25 = arith.constant 4.471500e-02 : f32
    %64 = vector.broadcast %cst_25 : f32 to vector<2x1x16xf32>
    %65 = arith.mulf %64, %63 : vector<2x1x16xf32>
    %66 = arith.addf %61, %65 : vector<2x1x16xf32>
    %cst_26 = arith.constant 0.797884583 : f32
    %67 = vector.broadcast %cst_26 : f32 to vector<2x1x16xf32>
    %68 = arith.mulf %67, %66 : vector<2x1x16xf32>
    %69 = math.tanh %68 : vector<2x1x16xf32>
    %cst_27 = arith.constant 1.000000e+00 : f32
    %70 = vector.broadcast %cst_27 : f32 to vector<2x1x16xf32>
    %71 = arith.addf %70, %69 : vector<2x1x16xf32>
    %cst_28 = arith.constant 5.000000e-01 : f32
    %72 = vector.broadcast %cst_28 : f32 to vector<2x1x16xf32>
    %73 = arith.mulf %72, %71 : vector<2x1x16xf32>
    %74 = arith.mulf %61, %73 : vector<2x1x16xf32>
    %75 = vector.extract_strided_slice %48 {offsets = [0, 0], sizes = [8, 1], strides = [1, 1]} : vector<8x2xf32> to vector<8x1xf32>
    %76 = vector.shape_cast %75 : vector<8x1xf32> to vector<1x8x1xf32>
    %77 = vector.broadcast %76 : vector<1x8x1xf32> to vector<2x8x16xf32>
    %78 = vector.broadcast %74 : vector<2x1x16xf32> to vector<2x8x16xf32>
    %79 = arith.mulf %77, %78 : vector<2x8x16xf32>
    %80 = vector.shape_cast %51 : vector<8x1xf32> to vector<1x8x1xf32>
    %81 = vector.broadcast %80 : vector<1x8x1xf32> to vector<2x8x16xf32>
    %82 = arith.addf %81, %79 : vector<2x8x16xf32>
    %83 = vector.extract_strided_slice %42 {offsets = [0, 1], sizes = [8, 1], strides = [1, 1]} : vector<8x2xf32> to vector<8x1xf32>
    %84 = vector.shape_cast %83 : vector<8x1xf32> to vector<1x8x1xf32>
    %85 = vector.broadcast %84 : vector<1x8x1xf32> to vector<2x8x16xf32>
    %86 = arith.mulf %85, %39 : vector<2x8x16xf32>
    %cst_29 = arith.constant dense<0.000000e+00> : vector<2x16xf32>
    %87 = vector.multi_reduction <add>, %86, %cst_29 [1] : vector<2x8x16xf32> to vector<2x16xf32>
    %88 = vector.shape_cast %87 : vector<2x16xf32> to vector<2x1x16xf32>
    %89 = vector.extract_strided_slice %45 {offsets = [1, 0], sizes = [1, 1], strides = [1, 1]} : vector<2x1xf32> to vector<1x1xf32>
    %90 = vector.shape_cast %89 : vector<1x1xf32> to vector<1x1x1xf32>
    %91 = vector.broadcast %90 : vector<1x1x1xf32> to vector<2x1x16xf32>
    %92 = arith.addf %88, %91 : vector<2x1x16xf32>
    %93 = arith.mulf %92, %92 : vector<2x1x16xf32>
    %94 = arith.mulf %92, %93 : vector<2x1x16xf32>
    %cst_30 = arith.constant 4.471500e-02 : f32
    %95 = vector.broadcast %cst_30 : f32 to vector<2x1x16xf32>
    %96 = arith.mulf %95, %94 : vector<2x1x16xf32>
    %97 = arith.addf %92, %96 : vector<2x1x16xf32>
    %cst_31 = arith.constant 0.797884583 : f32
    %98 = vector.broadcast %cst_31 : f32 to vector<2x1x16xf32>
    %99 = arith.mulf %98, %97 : vector<2x1x16xf32>
    %100 = math.tanh %99 : vector<2x1x16xf32>
    %cst_32 = arith.constant 1.000000e+00 : f32
    %101 = vector.broadcast %cst_32 : f32 to vector<2x1x16xf32>
    %102 = arith.addf %101, %100 : vector<2x1x16xf32>
    %cst_33 = arith.constant 5.000000e-01 : f32
    %103 = vector.broadcast %cst_33 : f32 to vector<2x1x16xf32>
    %104 = arith.mulf %103, %102 : vector<2x1x16xf32>
    %105 = arith.mulf %92, %104 : vector<2x1x16xf32>
    %106 = vector.extract_strided_slice %48 {offsets = [0, 1], sizes = [8, 1], strides = [1, 1]} : vector<8x2xf32> to vector<8x1xf32>
    %107 = vector.shape_cast %106 : vector<8x1xf32> to vector<1x8x1xf32>
    %108 = vector.broadcast %107 : vector<1x8x1xf32> to vector<2x8x16xf32>
    %109 = vector.broadcast %105 : vector<2x1x16xf32> to vector<2x8x16xf32>
    %110 = arith.mulf %108, %109 : vector<2x8x16xf32>
    %111 = arith.addf %82, %110 : vector<2x8x16xf32>
    %112 = arith.addf %39, %111 : vector<2x8x16xf32>
    %cst_34 = arith.constant dense<0.000000e+00> : vector<2x8xf32>
    %113 = vector.multi_reduction <add>, %112, %cst_34 [2] : vector<2x8x16xf32> to vector<2x8xf32>
    %114 = vector.shape_cast %113 : vector<2x8xf32> to vector<2x8x1xf32>
    %cst_35 = arith.constant 1.600000e+01 : f32
    %115 = vector.broadcast %cst_35 : f32 to vector<2x8x1xf32>
    %116 = arith.divf %114, %115 : vector<2x8x1xf32>
    %117 = vector.broadcast %116 : vector<2x8x1xf32> to vector<2x8x16xf32>
    %118 = arith.subf %112, %117 : vector<2x8x16xf32>
    %119 = arith.mulf %118, %118 : vector<2x8x16xf32>
    %cst_36 = arith.constant dense<0.000000e+00> : vector<2x8xf32>
    %120 = vector.multi_reduction <add>, %119, %cst_36 [2] : vector<2x8x16xf32> to vector<2x8xf32>
    %121 = vector.shape_cast %120 : vector<2x8xf32> to vector<2x8x1xf32>
    %cst_37 = arith.constant 1.600000e+01 : f32
    %122 = vector.broadcast %cst_37 : f32 to vector<2x8x1xf32>
    %123 = arith.divf %121, %122 : vector<2x8x1xf32>
    %124 = vector.broadcast %116 : vector<2x8x1xf32> to vector<2x8x16xf32>
    %125 = arith.subf %112, %124 : vector<2x8x16xf32>
    %cst_38 = arith.constant 9.99999974E-6 : f32
    %126 = vector.broadcast %cst_38 : f32 to vector<2x8x1xf32>
    %127 = arith.addf %123, %126 : vector<2x8x1xf32>
    %128 = math.rsqrt %127 : vector<2x8x1xf32>
    %129 = vector.broadcast %128 : vector<2x8x1xf32> to vector<2x8x16xf32>
    %130 = arith.mulf %125, %129 : vector<2x8x16xf32>
    %131 = arith.index_cast %arg1 : i32 to index
    %c0_39 = arith.constant 0 : index
    %c0_40 = arith.constant 0 : index
    %132 = vector.load %arg11[%131, %c0_39, %c0_40] : memref<2x1x16xf32, #tpu.memory_space<vmem>>, vector<1x1x16xf32>
    %133 = vector.shape_cast %132 : vector<1x1x16xf32> to vector<1x16xf32>
    %134 = vector.shape_cast %133 : vector<1x16xf32> to vector<1x1x16xf32>
    %135 = vector.broadcast %134 : vector<1x1x16xf32> to vector<2x8x16xf32>
    %136 = arith.mulf %130, %135 : vector<2x8x16xf32>
    %137 = arith.index_cast %arg1 : i32 to index
    %c0_41 = arith.constant 0 : index
    %c0_42 = arith.constant 0 : index
    %138 = vector.load %arg12[%137, %c0_41, %c0_42] : memref<2x1x16xf32, #tpu.memory_space<vmem>>, vector<1x1x16xf32>
    %139 = vector.shape_cast %138 : vector<1x1x16xf32> to vector<1x16xf32>
    %140 = vector.shape_cast %139 : vector<1x16xf32> to vector<1x1x16xf32>
    %141 = vector.broadcast %140 : vector<1x1x16xf32> to vector<2x8x16xf32>
    %142 = arith.addf %136, %141 : vector<2x8x16xf32>
    %c0_43 = arith.constant 0 : index
    %c0_44 = arith.constant 0 : index
    %c0_45 = arith.constant 0 : index
    %143 = vector.load %arg13[%c0_43, %c0_44, %c0_45] : memref<2x8x16xf32, #tpu.memory_space<vmem>>, vector<2x8x16xf32>
    tpu.vector_store %arg13[%c0_43, %c0_44, %c0_45], %142 {strides = array<i32>} : memref<2x8x16xf32, #tpu.memory_space<vmem>>, vector<2x8x16xf32>,
    return
  }
  func.func @transform_0(%arg0: i32, %arg1: i32) -> (i32, i32, i32) {
    %c0_i32 = arith.constant 0 : i32
    %c0_i32_0 = arith.constant 0 : i32
    %c0_i32_1 = arith.constant 0 : i32
    return %arg0, %c0_i32, %c0_i32_0 : i32, i32, i32
  }
  func.func @transform_1(%arg0: i32, %arg1: i32) -> (i32, i32, i32) {
    %c0_i32 = arith.constant 0 : i32
    %c0_i32_0 = arith.constant 0 : i32
    %c0_i32_1 = arith.constant 0 : i32
    %c0_i32_2 = arith.constant 0 : i32
    return %c0_i32, %c0_i32_0, %c0_i32_1 : i32, i32, i32
  }
  func.func @transform_2(%arg0: i32, %arg1: i32) -> (i32, i32, i32) {
    %c0_i32 = arith.constant 0 : i32
    %c0_i32_0 = arith.constant 0 : i32
    %c0_i32_1 = arith.constant 0 : i32
    %c0_i32_2 = arith.constant 0 : i32
    return %c0_i32, %c0_i32_0, %c0_i32_1 : i32, i32, i32
  }
  func.func @transform_3(%arg0: i32, %arg1: i32) -> (i32, i32, i32) {
    %c0_i32 = arith.constant 0 : i32
    %c0_i32_0 = arith.constant 0 : i32
    %c0_i32_1 = arith.constant 0 : i32
    %c0_i32_2 = arith.constant 0 : i32
    return %c0_i32, %c0_i32_0, %c0_i32_1 : i32, i32, i32
  }
  func.func @transform_4(%arg0: i32, %arg1: i32) -> (i32, i32, i32) {
    %c0_i32 = arith.constant 0 : i32
    %c0_i32_0 = arith.constant 0 : i32
    %c0_i32_1 = arith.constant 0 : i32
    %c0_i32_2 = arith.constant 0 : i32
    return %c0_i32, %c0_i32_0, %c0_i32_1 : i32, i32, i32
  }
  func.func @transform_5(%arg0: i32, %arg1: i32) -> (i32, i32, i32) {
    %c0_i32 = arith.constant 0 : i32
    %c0_i32_0 = arith.constant 0 : i32
    %c0_i32_1 = arith.constant 0 : i32
    %c0_i32_2 = arith.constant 0 : i32
    return %c0_i32, %c0_i32_0, %c0_i32_1 : i32, i32, i32
  }
  func.func @transform_6(%arg0: i32, %arg1: i32) -> (i32, i32, i32) {
    %c0_i32 = arith.constant 0 : i32
    %c0_i32_0 = arith.constant 0 : i32
    %c0_i32_1 = arith.constant 0 : i32
    %c0_i32_2 = arith.constant 0 : i32
    return %c0_i32, %c0_i32_0, %c0_i32_1 : i32, i32, i32
  }
  func.func @transform_7(%arg0: i32, %arg1: i32) -> (i32, i32, i32) {
    %c0_i32 = arith.constant 0 : i32
    %c0_i32_0 = arith.constant 0 : i32
    %c0_i32_1 = arith.constant 0 : i32
    %c0_i32_2 = arith.constant 0 : i32
    return %c0_i32, %c0_i32_0, %c0_i32_1 : i32, i32, i32
  }
  func.func @transform_8(%arg0: i32, %arg1: i32) -> (i32, i32, i32) {
    %c0_i32 = arith.constant 0 : i32
    %c0_i32_0 = arith.constant 0 : i32
    %c0_i32_1 = arith.constant 0 : i32
    %c0_i32_2 = arith.constant 0 : i32
    return %c0_i32, %c0_i32_0, %c0_i32_1 : i32, i32, i32
  }
  func.func @transform_9(%arg0: i32, %arg1: i32) -> (i32, i32, i32) {
    %c0_i32 = arith.constant 0 : i32
    %c0_i32_0 = arith.constant 0 : i32
    %c0_i32_1 = arith.constant 0 : i32
    %c0_i32_2 = arith.constant 0 : i32
    return %c0_i32, %c0_i32_0, %c0_i32_1 : i32, i32, i32
  }
  func.func @transform_10(%arg0: i32, %arg1: i32) -> (i32, i32, i32) {
    %c0_i32 = arith.constant 0 : i32
    %c0_i32_0 = arith.constant 0 : i32
    %c0_i32_1 = arith.constant 0 : i32
    %c0_i32_2 = arith.constant 0 : i32
    return %c0_i32, %c0_i32_0, %c0_i32_1 : i32, i32, i32
  }
  func.func @transform_11(%arg0: i32, %arg1: i32) -> (i32, i32, i32) {
    %c0_i32 = arith.constant 0 : i32
    %c0_i32_0 = arith.constant 0 : i32
    %c0_i32_1 = arith.constant 0 : i32
    return %arg0, %c0_i32, %c0_i32_0 : i32, i32, i32
  }
}

module attributes {stable_mosaic.version = 11 : i64} {
  func.func @_revin_denorm_kernel(%arg0: i32, %arg1: memref<1x8x8xf32, #tpu.memory_space<vmem>>, %arg2: memref<1x8x1xf32, #tpu.memory_space<vmem>>, %arg3: memref<1x8x1xf32, #tpu.memory_space<vmem>>, %arg4: memref<8x1xf32, #tpu.memory_space<vmem>>, %arg5: memref<8x1xf32, #tpu.memory_space<vmem>>, %arg6: memref<1x8x8xf32, #tpu.memory_space<vmem>>) attributes {dimension_semantics = [#tpu.dimension_semantics<parallel>], iteration_bounds = array<i64: 2>, scalar_prefetch = 0 : i64, scratch_operands = 0 : i64, tpu.core_type = #tpu.core_type<tc>, window_params = [{transform_indices = @transform_0, window_bounds = array<i64: 1, 8, 8>}, {transform_indices = @transform_1, window_bounds = array<i64: 1, 8, 1>}, {transform_indices = @transform_2, window_bounds = array<i64: 1, 8, 1>}, {pipeline_mode = #tpu.pipeline_mode<synchronous>, transform_indices = @transform_3, window_bounds = array<i64: 8, 1>}, {pipeline_mode = #tpu.pipeline_mode<synchronous>, transform_indices = @transform_4, window_bounds = array<i64: 8, 1>}, {transform_indices = @transform_5, window_bounds = array<i64: 1, 8, 8>}]} {
    %c0 = arith.constant 0 : index
    %c0_0 = arith.constant 0 : index
    %c0_1 = arith.constant 0 : index
    %0 = vector.load %arg1[%c0, %c0_0, %c0_1] : memref<1x8x8xf32, #tpu.memory_space<vmem>>, vector<1x8x8xf32>
    %1 = vector.shape_cast %0 : vector<1x8x8xf32> to vector<8x8xf32>
    %c0_2 = arith.constant 0 : index
    %c0_3 = arith.constant 0 : index
    %2 = vector.load %arg5[%c0_2, %c0_3] : memref<8x1xf32, #tpu.memory_space<vmem>>, vector<8x1xf32>
    %3 = vector.broadcast %2 : vector<8x1xf32> to vector<8x8xf32>
    %4 = arith.subf %1, %3 : vector<8x8xf32>
    %c0_4 = arith.constant 0 : index
    %c0_5 = arith.constant 0 : index
    %5 = vector.load %arg4[%c0_4, %c0_5] : memref<8x1xf32, #tpu.memory_space<vmem>>, vector<8x1xf32>
    %cst = arith.constant 1.000000e-10 : f32
    %6 = vector.broadcast %cst : f32 to vector<8x1xf32>
    %7 = arith.addf %5, %6 : vector<8x1xf32>
    %8 = vector.broadcast %7 : vector<8x1xf32> to vector<8x8xf32>
    %9 = arith.divf %4, %8 : vector<8x8xf32>
    %c0_6 = arith.constant 0 : index
    %c0_7 = arith.constant 0 : index
    %c0_8 = arith.constant 0 : index
    %10 = vector.load %arg3[%c0_6, %c0_7, %c0_8] : memref<1x8x1xf32, #tpu.memory_space<vmem>>, vector<1x8x1xf32>
    %11 = vector.shape_cast %10 : vector<1x8x1xf32> to vector<8x1xf32>
    %12 = vector.broadcast %11 : vector<8x1xf32> to vector<8x8xf32>
    %13 = arith.mulf %9, %12 : vector<8x8xf32>
    %c0_9 = arith.constant 0 : index
    %c0_10 = arith.constant 0 : index
    %c0_11 = arith.constant 0 : index
    %14 = vector.load %arg2[%c0_9, %c0_10, %c0_11] : memref<1x8x1xf32, #tpu.memory_space<vmem>>, vector<1x8x1xf32>
    %15 = vector.shape_cast %14 : vector<1x8x1xf32> to vector<8x1xf32>
    %16 = vector.broadcast %15 : vector<8x1xf32> to vector<8x8xf32>
    %17 = arith.addf %13, %16 : vector<8x8xf32>
    %18 = tpu.transpose %17, [1, 0] : vector<8x8xf32> -> vector<8x8xf32>
    %c0_12 = arith.constant 0 : index
    %c0_13 = arith.constant 0 : index
    %c0_14 = arith.constant 0 : index
    %19 = vector.load %arg6[%c0_12, %c0_13, %c0_14] : memref<1x8x8xf32, #tpu.memory_space<vmem>>, vector<1x8x8xf32>
    %20 = vector.shape_cast %19 : vector<1x8x8xf32> to vector<8x8xf32>
    %21 = vector.shape_cast %18 : vector<8x8xf32> to vector<1x8x8xf32>
    tpu.vector_store %arg6[%c0_12, %c0_13, %c0_14], %21 {strides = array<i32>} : memref<1x8x8xf32, #tpu.memory_space<vmem>>, vector<1x8x8xf32>,
    return
  }
  func.func @transform_0(%arg0: i32) -> (i32, i32, i32) {
    %c0_i32 = arith.constant 0 : i32
    %c0_i32_0 = arith.constant 0 : i32
    %c0_i32_1 = arith.constant 0 : i32
    return %arg0, %c0_i32, %c0_i32_0 : i32, i32, i32
  }
  func.func @transform_1(%arg0: i32) -> (i32, i32, i32) {
    %c0_i32 = arith.constant 0 : i32
    %c0_i32_0 = arith.constant 0 : i32
    %c0_i32_1 = arith.constant 0 : i32
    return %arg0, %c0_i32, %c0_i32_0 : i32, i32, i32
  }
  func.func @transform_2(%arg0: i32) -> (i32, i32, i32) {
    %c0_i32 = arith.constant 0 : i32
    %c0_i32_0 = arith.constant 0 : i32
    %c0_i32_1 = arith.constant 0 : i32
    return %arg0, %c0_i32, %c0_i32_0 : i32, i32, i32
  }
  func.func @transform_3(%arg0: i32) -> (i32, i32) {
    %c0_i32 = arith.constant 0 : i32
    %c0_i32_0 = arith.constant 0 : i32
    %c0_i32_1 = arith.constant 0 : i32
    return %c0_i32, %c0_i32_0 : i32, i32
  }
  func.func @transform_4(%arg0: i32) -> (i32, i32) {
    %c0_i32 = arith.constant 0 : i32
    %c0_i32_0 = arith.constant 0 : i32
    %c0_i32_1 = arith.constant 0 : i32
    return %c0_i32, %c0_i32_0 : i32, i32
  }
  func.func @transform_5(%arg0: i32) -> (i32, i32, i32) {
    %c0_i32 = arith.constant 0 : i32
    %c0_i32_0 = arith.constant 0 : i32
    %c0_i32_1 = arith.constant 0 : i32
    return %arg0, %c0_i32, %c0_i32_0 : i32, i32, i32
  }
}

module attributes {stable_mosaic.version = 11 : i64} {
  func.func @_moe_kernel(%arg0: i32, %arg1: i32, %arg2: memref<4xi32, #tpu.memory_space<smem>>, %arg3: memref<4xi32, #tpu.memory_space<smem>>, %arg4: memref<16x16xf32, #tpu.memory_space<vmem>>, %arg5: memref<8x16x1xf32, #tpu.memory_space<vmem>>, %arg6: memref<1x16x2048xbf16, #tpu.memory_space<vmem>>, %arg7: memref<1x1x2048xf32, #tpu.memory_space<vmem>>, %arg8: memref<1x2048x8xbf16, #tpu.memory_space<vmem>>, %arg9: memref<1x1x8xf32, #tpu.memory_space<vmem>>, %arg10: memref<16x8xf32, #tpu.memory_space<vmem>>) attributes {dimension_semantics = [#tpu.dimension_semantics<parallel>, #tpu.dimension_semantics<arbitrary>], iteration_bounds = array<i64: 1, 4>, scalar_prefetch = 2 : i64, scratch_operands = 0 : i64, tpu.core_type = #tpu.core_type<tc>, window_params = [{transform_indices = @transform_0, window_bounds = array<i64: 16, 16>}, {transform_indices = @transform_1, window_bounds = array<i64: 8, 16, 1>}, {transform_indices = @transform_2, window_bounds = array<i64: 1, 16, 2048>}, {transform_indices = @transform_3, window_bounds = array<i64: 1, 1, 2048>}, {transform_indices = @transform_4, window_bounds = array<i64: 1, 2048, 8>}, {transform_indices = @transform_5, window_bounds = array<i64: 1, 1, 8>}, {transform_indices = @transform_6, window_bounds = array<i64: 16, 8>}]} {
    %c0_i32 = arith.constant 0 : i32
    %0 = arith.cmpi eq, %arg1, %c0_i32 : i32
    %1 = arith.extui %0 : i1 to i32
    %c0_i32_0 = arith.constant 0 : i32
    %2 = arith.cmpi ne, %1, %c0_i32_0 : i32
    scf.if %2 {
      %cst = arith.constant 0.000000e+00 : f32
      %8 = vector.broadcast %cst : f32 to vector<16x8xf32>
      %c0 = arith.constant 0 : index
      %c0_2 = arith.constant 0 : index
      %9 = vector.load %arg10[%c0, %c0_2] : memref<16x8xf32, #tpu.memory_space<vmem>>, vector<16x8xf32>
      tpu.vector_store %arg10[%c0, %c0_2], %8 {strides = array<i32>} : memref<16x8xf32, #tpu.memory_space<vmem>>, vector<16x8xf32>,
    } else {
    }
    %3 = arith.index_cast %arg1 : i32 to index
    %4 = memref.load %arg3[%3] : memref<4xi32, #tpu.memory_space<smem>>
    %c1_i32 = arith.constant 1 : i32
    %5 = arith.cmpi eq, %4, %c1_i32 : i32
    %6 = arith.extui %5 : i1 to i32
    %c0_i32_1 = arith.constant 0 : i32
    %7 = arith.cmpi ne, %6, %c0_i32_1 : i32
    scf.if %7 {
      %c0 = arith.constant 0 : index
      %c0_2 = arith.constant 0 : index
      %8 = vector.load %arg4[%c0, %c0_2] : memref<16x16xf32, #tpu.memory_space<vmem>>, vector<16x16xf32>
      %9 = arith.truncf %8 : vector<16x16xf32> to vector<16x16xbf16>
      %c0_3 = arith.constant 0 : index
      %c0_4 = arith.constant 0 : index
      %c0_5 = arith.constant 0 : index
      %10 = vector.load %arg6[%c0_3, %c0_4, %c0_5] : memref<1x16x2048xbf16, #tpu.memory_space<vmem>>, vector<1x16x2048xbf16>
      %11 = vector.shape_cast %10 : vector<1x16x2048xbf16> to vector<16x2048xbf16>
      %cst = arith.constant dense<0.000000e+00> : vector<16x2048xf32>
      %12 = tpu.matmul %9, %11, %cst {dimension_numbers = #tpu.dot_dimension_numbers<[1], [0], [0], [1], [0, 0, 1, 1], [], []>} : vector<16x16xbf16>, vector<16x2048xbf16>, vector<16x2048xf32> -> vector<16x2048xf32>
      %c0_6 = arith.constant 0 : index
      %c0_7 = arith.constant 0 : index
      %c0_8 = arith.constant 0 : index
      %13 = vector.load %arg7[%c0_6, %c0_7, %c0_8] : memref<1x1x2048xf32, #tpu.memory_space<vmem>>, vector<1x1x2048xf32>
      %14 = vector.shape_cast %13 : vector<1x1x2048xf32> to vector<1x2048xf32>
      %15 = vector.broadcast %14 : vector<1x2048xf32> to vector<16x2048xf32>
      %16 = arith.addf %12, %15 : vector<16x2048xf32>
      %17 = arith.mulf %16, %16 : vector<16x2048xf32>
      %18 = arith.mulf %16, %17 : vector<16x2048xf32>
      %cst_9 = arith.constant 4.471500e-02 : f32
      %19 = vector.broadcast %cst_9 : f32 to vector<16x2048xf32>
      %20 = arith.mulf %19, %18 : vector<16x2048xf32>
      %21 = arith.addf %16, %20 : vector<16x2048xf32>
      %cst_10 = arith.constant 0.797884583 : f32
      %22 = vector.broadcast %cst_10 : f32 to vector<16x2048xf32>
      %23 = arith.mulf %22, %21 : vector<16x2048xf32>
      %24 = math.tanh %23 : vector<16x2048xf32>
      %cst_11 = arith.constant 1.000000e+00 : f32
      %25 = vector.broadcast %cst_11 : f32 to vector<16x2048xf32>
      %26 = arith.addf %25, %24 : vector<16x2048xf32>
      %cst_12 = arith.constant 5.000000e-01 : f32
      %27 = vector.broadcast %cst_12 : f32 to vector<16x2048xf32>
      %28 = arith.mulf %27, %26 : vector<16x2048xf32>
      %29 = arith.mulf %16, %28 : vector<16x2048xf32>
      %30 = arith.truncf %29 : vector<16x2048xf32> to vector<16x2048xbf16>
      %c0_13 = arith.constant 0 : index
      %c0_14 = arith.constant 0 : index
      %c0_15 = arith.constant 0 : index
      %31 = vector.load %arg8[%c0_13, %c0_14, %c0_15] : memref<1x2048x8xbf16, #tpu.memory_space<vmem>>, vector<1x2048x8xbf16>
      %32 = vector.shape_cast %31 : vector<1x2048x8xbf16> to vector<2048x8xbf16>
      %cst_16 = arith.constant dense<0.000000e+00> : vector<16x8xf32>
      %33 = tpu.matmul %30, %32, %cst_16 {dimension_numbers = #tpu.dot_dimension_numbers<[1], [0], [0], [1], [0, 0, 1, 1], [], []>} : vector<16x2048xbf16>, vector<2048x8xbf16>, vector<16x8xf32> -> vector<16x8xf32>
      %c0_17 = arith.constant 0 : index
      %c0_18 = arith.constant 0 : index
      %c0_19 = arith.constant 0 : index
      %34 = vector.load %arg9[%c0_17, %c0_18, %c0_19] : memref<1x1x8xf32, #tpu.memory_space<vmem>>, vector<1x1x8xf32>
      %35 = vector.shape_cast %34 : vector<1x1x8xf32> to vector<1x8xf32>
      %36 = vector.broadcast %35 : vector<1x8xf32> to vector<16x8xf32>
      %37 = arith.addf %33, %36 : vector<16x8xf32>
      %38 = arith.index_cast %arg1 : i32 to index
      %39 = memref.load %arg2[%38] : memref<4xi32, #tpu.memory_space<smem>>
      %40 = arith.index_cast %39 : i32 to index
      %c0_20 = arith.constant 0 : index
      %c0_21 = arith.constant 0 : index
      %41 = vector.load %arg5[%40, %c0_20, %c0_21] : memref<8x16x1xf32, #tpu.memory_space<vmem>>, vector<1x16x1xf32>
      %42 = vector.shape_cast %41 : vector<1x16x1xf32> to vector<16x1xf32>
      %c0_22 = arith.constant 0 : index
      %c0_23 = arith.constant 0 : index
      %43 = vector.load %arg10[%c0_22, %c0_23] : memref<16x8xf32, #tpu.memory_space<vmem>>, vector<16x8xf32>
      %44 = vector.broadcast %42 : vector<16x1xf32> to vector<16x8xf32>
      %45 = arith.mulf %44, %37 : vector<16x8xf32>
      %46 = arith.addf %43, %45 : vector<16x8xf32>
      %c0_24 = arith.constant 0 : index
      %c0_25 = arith.constant 0 : index
      %47 = vector.load %arg10[%c0_24, %c0_25] : memref<16x8xf32, #tpu.memory_space<vmem>>, vector<16x8xf32>
      tpu.vector_store %arg10[%c0_24, %c0_25], %46 {strides = array<i32>} : memref<16x8xf32, #tpu.memory_space<vmem>>, vector<16x8xf32>,
    } else {
    }
    return
  }
  func.func @transform_0(%arg0: i32, %arg1: i32, %arg2: memref<4xi32, #tpu.memory_space<smem>>, %arg3: memref<4xi32, #tpu.memory_space<smem>>) -> (i32, i32) {
    %c0_i32 = arith.constant 0 : i32
    %c0_i32_0 = arith.constant 0 : i32
    return %arg0, %c0_i32 : i32, i32
  }
  func.func @transform_1(%arg0: i32, %arg1: i32, %arg2: memref<4xi32, #tpu.memory_space<smem>>, %arg3: memref<4xi32, #tpu.memory_space<smem>>) -> (i32, i32, i32) {
    %c0_i32 = arith.constant 0 : i32
    %c0_i32_0 = arith.constant 0 : i32
    %c0_i32_1 = arith.constant 0 : i32
    return %c0_i32, %arg0, %c0_i32_0 : i32, i32, i32
  }
  func.func @transform_2(%arg0: i32, %arg1: i32, %arg2: memref<4xi32, #tpu.memory_space<smem>>, %arg3: memref<4xi32, #tpu.memory_space<smem>>) -> (i32, i32, i32) {
    %0 = arith.index_cast %arg1 : i32 to index
    %1 = memref.load %arg2[%0] : memref<4xi32, #tpu.memory_space<smem>>
    %c0_i32 = arith.constant 0 : i32
    %c0_i32_0 = arith.constant 0 : i32
    %c0_i32_1 = arith.constant 0 : i32
    return %1, %c0_i32, %c0_i32_0 : i32, i32, i32
  }
  func.func @transform_3(%arg0: i32, %arg1: i32, %arg2: memref<4xi32, #tpu.memory_space<smem>>, %arg3: memref<4xi32, #tpu.memory_space<smem>>) -> (i32, i32, i32) {
    %0 = arith.index_cast %arg1 : i32 to index
    %1 = memref.load %arg2[%0] : memref<4xi32, #tpu.memory_space<smem>>
    %c0_i32 = arith.constant 0 : i32
    %c0_i32_0 = arith.constant 0 : i32
    %c0_i32_1 = arith.constant 0 : i32
    return %1, %c0_i32, %c0_i32_0 : i32, i32, i32
  }
  func.func @transform_4(%arg0: i32, %arg1: i32, %arg2: memref<4xi32, #tpu.memory_space<smem>>, %arg3: memref<4xi32, #tpu.memory_space<smem>>) -> (i32, i32, i32) {
    %0 = arith.index_cast %arg1 : i32 to index
    %1 = memref.load %arg2[%0] : memref<4xi32, #tpu.memory_space<smem>>
    %c0_i32 = arith.constant 0 : i32
    %c0_i32_0 = arith.constant 0 : i32
    %c0_i32_1 = arith.constant 0 : i32
    return %1, %c0_i32, %c0_i32_0 : i32, i32, i32
  }
  func.func @transform_5(%arg0: i32, %arg1: i32, %arg2: memref<4xi32, #tpu.memory_space<smem>>, %arg3: memref<4xi32, #tpu.memory_space<smem>>) -> (i32, i32, i32) {
    %0 = arith.index_cast %arg1 : i32 to index
    %1 = memref.load %arg2[%0] : memref<4xi32, #tpu.memory_space<smem>>
    %c0_i32 = arith.constant 0 : i32
    %c0_i32_0 = arith.constant 0 : i32
    %c0_i32_1 = arith.constant 0 : i32
    return %1, %c0_i32, %c0_i32_0 : i32, i32, i32
  }
  func.func @transform_6(%arg0: i32, %arg1: i32, %arg2: memref<4xi32, #tpu.memory_space<smem>>, %arg3: memref<4xi32, #tpu.memory_space<smem>>) -> (i32, i32) {
    %c0_i32 = arith.constant 0 : i32
    %c0_i32_0 = arith.constant 0 : i32
    return %arg0, %c0_i32 : i32, i32
  }
}

</mosaic_0001>

<bundles_post_ra>
// kernel: amd_forward.5
= control target key start
LH: loop header
LB: loop body
LE: loop exit
PB: predicated region body
PF: predicated region fallthrough
CT: control target
= control target key end

     0   :  { %s529_s18 = smov 0   ;;  %s568_s0 = inlined_call_operand.vmem [shape: f32[2,16,8], index: 0, kind: input, shape index: {}]   ;;  %s569_s1 = inlined_call_operand.vmem [shape: f32[8,1], index: 1, kind: input, shape index: {}]   ;;  %s570_s2 = inlined_call_operand.vmem [shape: f32[8,1], index: 2, kind: input, shape index: {}]   ;;  %s571_s3 = inlined_call_operand.vmem [shape: f32[2,8,16], index: 3, kind: output, shape index: {0}]   ;;  %s572_s4 = inlined_call_operand.vmem [shape: f32[2,8,1], index: 4, kind: output, shape index: {1}]   ;;  %s573_s5 = inlined_call_operand.vmem [shape: f32[2,8,1], index: 5, kind: output, shape index: {2}]  }
   0x1 LB: > { %s457_s19 = sadd.s32 4294967295, %s495_s18   ;;  %p461_p0 = scmp.ge.s32.totalorder %s495_s18, 1  ;;  %s495_s18 = sphi %s529_s18, %s16_s18  }
   0x2   : > { %p192_p1 = scmp.lt.s32.totalorder %s495_s18, 3 }
   0x4   : > { %p193_p2 = pnand %p461_p0, %p192_p1 }
   0x5   : > { %p227_p3 = scmp.lt.s32.totalorder (!%p193_p2), %s457_s19, 1 }
   0x6   : > { %196 = sbr.rel (%p193_p2) target bundleno = 469 (0x1d5), region = 32 }
   0xb   : > { %s575_s19 = smov (!%p227_p3, %s457_s19), 1  ;;  %vm278_vm0 = vcmask 130048   ;;  %v497_v4 = vmov 16.0   ;;  %v324_v5 = vld [vmem:[%s569_s1] sm:$0xff]  ;;  %v498_v6 = vmov 0   ;;  %vm339_vm2 = vcmask 7168  }
   0xc   : > { %s469_s20 = sshll.u32 %s575_s19, 4  ;;  %483 = vrcp.f32 %v497_v4  ;;  %481 = vset.pattern.permute.xlu2 %v498_v6  ;;  %v331_v9 = vld [vmem:[%s570_s2] sm:$0xff]  ;;  %s547_s28 = sshll.u32 %s575_s19, 3 }
   0xd   : > { %s231_s23 = scalar_lea.vmem %s568_s0, %s469_s20  ;;  %327 = vperm.xlu2 %481, %v324_v5   ;;  %s239_s6 = scalar_lea.vmem %s572_s4, %s547_s28 }
   0xe   : > { %v244_v0 = vld [vmem:[%s231_s23] sm:$0xff]  ;;  %v245_v1 = vld [vmem:[%s231_s23 + $0x8] sm:$0xff]  ;;  %s243_s9 = scalar_lea.vmem %s573_s5, %s547_s28  ;;  %s235_s12 = scalar_lea.vmem %s571_s3, %s547_s28 }
   0xf   : > { %246 = vxpose.xlu0.b32.start [1/2] (short) (narrow) %v244_v0, 8 }
  0x12   : > { %v484_v7 = vpop.eup %483 }
  0x13   : > { %v283_v8 = vmul.f32 16.0, %v484_v7  ;;  %vm287_vm1 = vweird.f32 %v484_v7 }
  0x15   : > { %v284_v10 = vsub.f32 1.0, %v283_v8  ;;  %334 = vperm.xlu2 %481, %v331_v9  }
  0x17   : > { %247 = vxpose.xlu0.b32.end [2/2] (short) (narrow) %v245_v1, 8  ;;  %v285_v11 = vmul.f32 %v484_v7, %v284_v10 }
  0x19   : > { %v286_v12 = vadd.f32 %v484_v7, %v285_v11 }
  0x1b   : > { %v288_v13 = vsel %vm287_vm1, %v484_v7, %v286_v12 }
  0x67   : > { %v328_v35 = vpop.permute.xlu2 %327 }
  0x6f   : > { %v335_v45 = vpop.permute.xlu2 %334 }
  0x7e   : > { %482 = vset.pattern.permute.xlu0 %v498_v6 }
  0xb3   : > { %v262_v2 = vpop.trf.xlu0 }
  0xb4   : > { %v279_v3 = vsel %vm278_vm0, %v262_v2, 0.0 }
  0xb5   : > { %280 = vadd.xlane.f32.xlu1 %v279_v3 }
 0x128   : > { %v281_v14 = vpop.xlane.xlu1 %280 }
 0x129   : > { %v289_v15 = vmul.f32 %v288_v13, %v281_v14 }
 0x12b   : > { %v290_v16 = vsub.f32 %v262_v2, %v289_v15  ;;  %340 = vst.msk [vmem:[%s239_s6] sm:$0xff] %vm339_vm2, %v289_v15 }
 0x12d   : > { %v291_v17 = vmul.f32 %v290_v16, %v290_v16 }
 0x12f   : > { %v292_v18 = vsel %vm278_vm0, %v291_v17, 0.0 }
 0x130   : > { %293 = vadd.xlane.f32.xlu1 %v292_v18 }
 0x1a3   : > { %v294_v19 = vpop.xlane.xlu1 %293 }
 0x1a4   : > { %v295_v20 = vmul.f32 %v294_v19, %v288_v13 }
 0x1a6   : > { %v296_v21 = vadd.f32 1e-05, %v295_v20 }
 0x1a8   : > { %485 = vrsqrt.f32 %v296_v21  ;;  %vm304_vm3 = vcmp.eq.f32.partialorder %v296_v21, inf  ;;  %v307_v29 = vand.u32 2147483648, %v296_v21  ;;  %vm306_vm4 = vcmp.eq.f32.partialorder %v296_v21, 0.0 }
 0x1ae   : > { %v486_v22 = vpop.eup %485 }
 0x1af   : > { %v298_v23 = vmul.f32 %v486_v22, %v296_v21 }
 0x1b1   : > { %v299_v24 = vmul.f32 %v486_v22, %v298_v23 }
 0x1b3   : > { %v300_v25 = vmul.f32 0.5, %v299_v24 }
 0x1b5   : > { %v301_v26 = vsub.f32 1.5, %v300_v25 }
 0x1b7   : > { %v302_v27 = vmul.f32 %v486_v22, %v301_v26 }
 0x1b9   : > { %v303_v28 = vmul.f32 %v302_v27, %v296_v21 }
 0x1bb   : > { %v305_v30 = vsel %vm304_vm3, %v296_v21, %v303_v28 }
 0x1bc   : > { %v308_v31 = vsel %vm306_vm4, %v307_v29, %v305_v30 }
 0x1bd   : > { %487 = vrcp.f32 %v308_v31  ;;  %341 = vst.msk [vmem:[%s243_s9] sm:$0xff] %vm339_vm2, %v308_v31  ;;  %v320_v36 = vand.u32 2147483648, %v308_v31  ;;  %v318_v38 = vand.u32 2147483647, %v308_v31  ;;  %vm314_vm6 = vweird.f32 %v308_v31 }
 0x1bf   : > { %v321_v40 = vor.u32 1.1754944e-38, %v320_v36  ;;  %vm319_vm8 = vcmp.eq.f32.partialorder %v318_v38, 8.507059e+37 }
 0x1c3   : > { %v488_v32 = vpop.eup %487 }
 0x1c4   : > { %v310_v33 = vmul.f32 %v488_v32, %v308_v31  ;;  %vm315_vm5 = vweird.f32 %v488_v32 }
 0x1c5   : > { %vm316_vm7 = vmor %vm314_vm6, %vm315_vm5 }
 0x1c6   : > { %v311_v34 = vsub.f32 1.0, %v310_v33 }
 0x1c8   : > { %v312_v37 = vmul.f32 %v488_v32, %v311_v34 }
 0x1ca   : > { %v313_v39 = vadd.f32 %v488_v32, %v312_v37 }
 0x1cc   : > { %v317_v41 = vsel %vm316_vm7, %v488_v32, %v313_v39 }
 0x1cd   : > { %v322_v42 = vsel %vm319_vm8, %v321_v40, %v317_v41 }
 0x1ce   : > { %v323_v43 = vmul.f32 %v322_v42, %v290_v16 }
 0x1d0   : > { %v330_v44 = vmul.f32 %v328_v35, %v323_v43 }
 0x1d2   : > { %v337_v46 = vadd.f32 %v335_v45, %v330_v44 }
 0x1d4   : > { %338 = vst.msk [vmem:[%s235_s12] sm:$0xff] %vm278_vm0, %v337_v46 }
 0x1d5 PF: > { %s16_s18 = sadd.s32 1, %s495_s18  }
 0x1d6   : > { %p13_p4 = scmp.ge.s32.totalorder %s16_s18, 4  }
 0x1d8   :  { %15 = sbr.rel (!%p13_p4) target bundleno = 1 (0x1), region = 86 }

// kernel: amd_forward.6
= control target key start
LH: loop header
LB: loop body
LE: loop exit
PB: predicated region body
PF: predicated region fallthrough
CT: control target
= control target key end

     0   :  { %10 = vsyncpa [#allocation3], 0  ;;  %s287_s0 = inlined_call_operand.vmem [shape: f32[16,16], index: 0, kind: input, shape index: {}]   ;;  %s288_s1 = inlined_call_operand.vmem [shape: bf16[16,16], index: 1, kind: input, shape index: {}]   ;;  %s289_s2 = inlined_call_operand.vmem [shape: f32[1,16], index: 2, kind: input, shape index: {}]   ;;  %s290_s3 = inlined_call_operand.hbm [shape: f32[1,16], index: 3, kind: input, shape index: {}]   ;;  %s291_s4 = inlined_call_operand.hbm [shape: f32[1,16], index: 4, kind: input, shape index: {}]   ;;  %s292_s5 = inlined_call_operand.vmem [shape: f32[16,16], index: 5, kind: output, shape index: {}]  }
   0x1   :  { %s23_s20 = sshll.u32 %s290_s3, 4  ;;  %s24_s20 = int_to_ptr.hbm [resolvable:$true] %s23_s20 }
   0x2   :  { %11 = vsyncpa [#allocation5], 0  ;;  %s223_s21 = smov [#allocation2]   ;;  %s34_s25 = sshll.u32 %s291_s4, 4  ;;  %s35_s25 = int_to_ptr.hbm [resolvable:$true] %s34_s25 }
   0x3   :  { %s25_s22 = sshll.u32 %s223_s21, 4  ;;  %s224_s26 = smov [#allocation4]   ;;  %s26_s22 = int_to_ptr.vmem [resolvable:$true] %s25_s22 }
   0x4   :  { %28 = dma.hbm_to_vmem [thread:$0]  %s24_s20, 16, %s26_s22, [#allocation3]  }
   0x5   :  { %s36_s27 = sshll.u32 %s224_s26, 4  ;;  %s37_s27 = int_to_ptr.vmem [resolvable:$true] %s36_s27 }
   0x6   :  { %39 = dma.hbm_to_vmem [thread:$0]  %s35_s25, 16, %s37_s27, [#allocation5]  }
   0x7   :  { %219 = dma.done.wait [#allocation3], 16  }
   0x8   :  { %220 = vsyncadd [#allocation3], 4294967280 }
   0x9   :  { %221 = dma.done.wait [#allocation5], 16  }
   0xa   :  { %222 = vsyncadd [#allocation5], 4294967280  ;;  %v158_v0 = vld [vmem:[%s288_s1] sm:$0xff]  ;;  %v50_v2 = vld [vmem:[%s287_s0 + $0x8] sm:$0xff]  ;;  %vm64_vm0 = vcmask 130048   ;;  %v225_v11 = vmov 16.0  }
   0xb   :  { %v49_v1 = vld [vmem:[%s287_s0] sm:$0xff]  ;;  %75 = vmatpush.bf16.msra.mxu0 %v158_v0  ;;  %165 = vrcp.f32 %v225_v11 }
   0xc   :  { %v51_v3 = vpack.c.bf16 %v50_v2, %v49_v1  ;;  %v162_v4 = vld [vmem:[%s289_s2] ss:$0 sm:$0xff]  ;;  %v164_v45 = vld [vmem:[#allocation4] ss:$0 sm:$0xff] }
   0xd   :  { %v163_v42 = vld [vmem:[#allocation2] ss:$0 sm:$0xff] }
   0xe   :  { %157 = vmatmul.msk.bf16.vlgmr.msra.gmra.mxu0 %vm64_vm0, %v51_v3 }
  0x11   :  { %v166_v12 = vpop.eup %165 }
  0x12   :  { %v89_v13 = vmul.f32 16.0, %v166_v12  ;;  %vm93_vm1 = vweird.f32 %v166_v12 }
  0x14   :  { %v90_v14 = vsub.f32 1.0, %v89_v13 }
  0x16   :  { %v91_v15 = vmul.f32 %v166_v12, %v90_v14 }
  0x18   :  { %v92_v16 = vadd.f32 %v166_v12, %v91_v15 }
  0x1a   :  { %v94_v17 = vsel %vm93_vm1, %v166_v12, %v92_v16 }
  0x8b   :  { %v77_v5 = vpop.f32.mrf.mxu0 }
  0x8c   :  { %v78_v6 = vadd.f32 %v162_v4, %v77_v5 }
  0x8e   :  { %v82_v7 = vsel %vm64_vm0, %v78_v6, 0.0 }
  0x8f   :  { %83 = vadd.xlane.f32.xlu0 %v82_v7 }
  0x93   :  { %v79_v8 = vpop.f32.mrf.mxu0 }
  0x94   :  { %v80_v9 = vadd.f32 %v162_v4, %v79_v8 }
  0x96   :  { %v85_v10 = vsel %vm64_vm0, %v80_v9, 0.0 }
  0x97   :  { %86 = vadd.xlane.f32.xlu0 %v85_v10 }
 0x102   :  { %v84_v18 = vpop.xlane.xlu0 %83 }
 0x103   :  { %v95_v19 = vmul.f32 %v94_v17, %v84_v18 }
 0x105   :  { %v97_v20 = vsub.f32 %v78_v6, %v95_v19 }
 0x107   :  { %v99_v21 = vmul.f32 %v97_v20, %v97_v20 }
 0x109   :  { %v101_v22 = vsel %vm64_vm0, %v99_v21, 0.0 }
 0x10a   :  { %102 = vadd.xlane.f32.xlu1 %v101_v22  ;;  %v87_v23 = vpop.xlane.xlu0 %86 }
 0x10b   :  { %v96_v24 = vmul.f32 %v94_v17, %v87_v23 }
 0x10d   :  { %v98_v25 = vsub.f32 %v80_v9, %v96_v24 }
 0x10f   :  { %v100_v26 = vmul.f32 %v98_v25, %v98_v25 }
 0x111   :  { %v104_v27 = vsel %vm64_vm0, %v100_v26, 0.0 }
 0x112   :  { %105 = vadd.xlane.f32.xlu1 %v104_v27 }
 0x17d   :  { %v103_v28 = vpop.xlane.xlu1 %102 }
 0x17e   :  { %v107_v29 = vmul.f32 %v103_v28, %v94_v17 }
 0x180   :  { %v109_v30 = vadd.f32 1e-05, %v107_v29 }
 0x182   :  { %167 = vrsqrt.f32 %v109_v30  ;;  %vm117_vm3 = vweird.f32 %v109_v30 }
 0x185   :  { %v106_v31 = vpop.xlane.xlu1 %105 }
 0x186   :  { %v108_v32 = vmul.f32 %v106_v31, %v94_v17 }
 0x188   :  { %v168_v33 = vpop.eup %167  ;;  %v110_v34 = vadd.f32 1e-05, %v108_v32 }
 0x189   :  { %v112_v35 = vmul.f32 %v168_v33, %v109_v30  ;;  %vm118_vm2 = vweird.f32 %v168_v33 }
 0x18a   :  { %169 = vrsqrt.f32 %v110_v34  ;;  %vm119_vm4 = vmor %vm117_vm3, %vm118_vm2  ;;  %vm127_vm6 = vweird.f32 %v110_v34 }
 0x18b   :  { %v113_v36 = vmul.f32 %v168_v33, %v112_v35 }
 0x18d   :  { %v114_v37 = vmul.f32 0.5, %v113_v36 }
 0x18f   :  { %v115_v38 = vsub.f32 1.5, %v114_v37 }
 0x190   :  { %v170_v39 = vpop.eup %169 }
 0x191   :  { %v116_v40 = vmul.f32 %v168_v33, %v115_v38  ;;  %v122_v41 = vmul.f32 %v170_v39, %v110_v34  ;;  %vm128_vm5 = vweird.f32 %v170_v39 }
 0x192   :  { %vm129_vm7 = vmor %vm127_vm6, %vm128_vm5 }
 0x193   :  { %v120_v43 = vsel %vm119_vm4, %v168_v33, %v116_v40  ;;  %v123_v44 = vmul.f32 %v170_v39, %v122_v41 }
 0x194   :  { %v131_v46 = vmul.f32 %v120_v43, %v97_v20 }
 0x195   :  { %v124_v47 = vmul.f32 0.5, %v123_v44 }
 0x196   :  { %v137_v48 = vmul.f32 %v163_v42, %v131_v46 }
 0x197   :  { %v125_v49 = vsub.f32 1.5, %v124_v47 }
 0x198   :  { %v143_v50 = vadd.f32 %v164_v45, %v137_v48 }
 0x199   :  { %v126_v51 = vmul.f32 %v170_v39, %v125_v49 }
 0x19a   :  { %145 = vst.msk [vmem:[%s292_s5] sm:$0xff] %vm64_vm0, %v143_v50 }
 0x19b   :  { %v130_v52 = vsel %vm129_vm7, %v170_v39, %v126_v51 }
 0x19c   :  { %v132_v53 = vmul.f32 %v130_v52, %v98_v25 }
 0x19e   :  { %v138_v54 = vmul.f32 %v163_v42, %v132_v53 }
 0x1a0   :  { %v144_v55 = vadd.f32 %v164_v45, %v138_v54 }
 0x1a2   :  { %146 = vst.msk [vmem:[%s292_s5 + $0x8] sm:$0xff] %vm64_vm0, %v144_v55 }
 0x1a3   :  { %151 = vsyncpa [#allocation3], 1 }
 0x1a4   :  { %152 = vsyncpa [#allocation5], 1 }

// kernel: amd_forward.7
= control target key start
LH: loop header
LB: loop body
LE: loop exit
PB: predicated region body
PF: predicated region fallthrough
CT: control target
= control target key end

     0   :  { %s1576_s0 = inlined_call_operand.vmem [shape: f32[2,8,16], index: 0, kind: input, shape index: {}]   ;;  %s1577_s1 = inlined_call_operand.hbm [shape: bf16[2,16,16], index: 1, kind: input, shape index: {}]   ;;  %s1578_s2 = inlined_call_operand.hbm [shape: f32[2,1,16], index: 2, kind: input, shape index: {}]   ;;  %s1579_s3 = inlined_call_operand.hbm [shape: bf16[2,16,16], index: 3, kind: input, shape index: {}]   ;;  %s1580_s4 = inlined_call_operand.hbm [shape: f32[2,1,16], index: 4, kind: input, shape index: {}]   ;;  %s1581_s5 = inlined_call_operand.vmem [shape: f32[2,8,2], index: 5, kind: input, shape index: {}]   ;;  %s1582_s6 = inlined_call_operand.vmem [shape: f32[2,2,1], index: 6, kind: input, shape index: {}]   ;;  %s1583_s7 = inlined_call_operand.vmem [shape: f32[2,8,2], index: 7, kind: input, shape index: {}]   ;;  %s1584_s8 = inlined_call_operand.vmem [shape: f32[2,8,1], index: 8, kind: input, shape index: {}]   ;;  %s1585_s9 = inlined_call_operand.hbm [shape: f32[2,1,16], index: 9, kind: input, shape index: {}]   ;;  %s1586_s10 = inlined_call_operand.hbm [shape: f32[2,1,16], index: 10, kind: input, shape index: {}]   ;;  %s1587_s11 = inlined_call_operand.vmem [shape: f32[2,8,16], index: 11, kind: output, shape index: {}]  }
   0x1   :  { %1592 = sst [smem:[#allocation16_spill]] %s1577_s1 }
   0x2   :  { %1593 = sst [smem:[#allocation17_spill]] %s1578_s2 }
   0x3   :  { %1594 = sst [smem:[#allocation18_spill]] %s1579_s3 }
   0x4   :  { %1595 = sst [smem:[#allocation19_spill]] %s1580_s4 }
   0x5   :  { %16 = vsyncpa [#allocation3], 0 }
   0x6   :  { %17 = vsyncpa [#allocation5], 0 }
   0x7   :  { %18 = vsyncpa [#allocation8], 0 }
   0x8   :  { %19 = vsyncpa [#allocation11], 0  ;;  %s1384_s17 = smov 0   ;;  %s1386_s18 = smov 0  }
   0x9   :  { %s1388_s19 = smov 0  }
   0xa LB: > { %s1596_s2 = sld [smem:[#allocation17_spill]]  ;;  %s933_s23 = sadd.s32 4294967295, %s1309_s19   ;;  %s1309_s19 = sphi %s1388_s19, %s25_s19   ;;  %s1305_s18 = sphi %s1386_s18, %s1606_s18   ;;  %s1301_s17 = sphi %s1384_s17, %s1605_s17  }
   0xb   : > { %p934_p0 = scmp.ge.s32.totalorder %s1309_s19, 1  ;;  %p304_p1 = scmp.lt.s32.totalorder %s1309_s19, 3 }
   0xc   : > { %p1405_p2 = scmp.eq.s32.totalorder %s933_s23, 0  ;;  %s1311_s26 = smov [#allocation4]  }
   0xd   : > { %p1409_p3 = pnand %p934_p0, %p304_p1  ;;  %s340_s27 = sshll.u32 %s1311_s26, 4  ;;  %s341_s27 = int_to_ptr.vmem [resolvable:$true] %s340_s27 }
   0xe   : > { %s1599_s4 = sld [smem:[#allocation19_spill]]  ;;  %s1312_s13 = smov [#allocation7]  }
   0xf   : > { %p996_p4 = pneg %p1409_p3  ;;  %s368_s14 = sshll.u32 %s1312_s13, 4  ;;  %s369_s14 = int_to_ptr.vmem [resolvable:$true] %s368_s14 }
  0x10   : > { %s338_s22 = sshll.u32 %s1596_s2, 4  ;;  %s1588_s15 = smov 16   ;;  %s339_s22 = int_to_ptr.hbm [resolvable:$true] %s338_s22 }
  0x11   : > { %p1420_p5 = pnand %p1405_p2, %p996_p4  ;;  %s1590_s16 = smov 1  }
  0x12   : > { %s1601_s1 = sld [smem:[#allocation16_spill]]  ;;  %s34_s26 = sadd.s32 1, %s1305_s18 }
  0x13   : > { %1002 = dma.hbm_to_vmem [thread:$0]  (!%p1420_p5), %s339_s22, 32, %s341_s27, [#allocation5], %s1588_s15, %s1588_s15, %s1590_s16  }
  0x14   : > { %s366_s30 = sshll.u32 %s1599_s4, 4  ;;  %p35_p6 = scmp.ge.s32.totalorder %s34_s26, 2  ;;  %s367_s30 = int_to_ptr.hbm [resolvable:$true] %s366_s30 }
  0x15   : > { %1008 = dma.hbm_to_vmem [thread:$0]  (!%p1420_p5), %s367_s30, 32, %s369_s14, [#allocation8], %s1588_s15, %s1588_s15, %s1590_s16  }
  0x16   : > { %s1315_s28 = smov [#allocation2]   ;;  %s1608_s26 = smov (%p35_p6, %s34_s26), 0 }
  0x17   : > { %s326_s29 = sshll.u32 %s1315_s28, 4  ;;  %s1316_s22 = smov 64   ;;  %s327_s29 = int_to_ptr.vmem [resolvable:$true] %s326_s29 }
  0x18   : > { %s324_s23 = sshll.u32 %s1601_s1, 4  ;;  %s1317_s27 = smov 4   ;;  %s325_s23 = int_to_ptr.hbm [resolvable:$true] %s324_s23 }
  0x19   : > { %999 = dma.hbm_to_vmem [thread:$0]  (!%p1420_p5), %s325_s23, 256, %s327_s29, [#allocation3], %s1316_s22, %s1316_s22, %s1317_s27  }
  0x1a   : > { %s1602_s3 = sld [smem:[#allocation18_spill]]  ;;  %s1318_s20 = smov [#allocation6]  }
  0x1b   : > { %s354_s21 = sshll.u32 %s1318_s20, 4  ;;  %s392_s28 = sshll.u32 %s1585_s9, 4  ;;  %s355_s21 = int_to_ptr.vmem [resolvable:$true] %s354_s21  ;;  %s393_s28 = int_to_ptr.hbm [resolvable:$true] %s392_s28 }
  0x1c   : > { %s1319_s1 = smov [#allocation9]   ;;  %s406_s29 = sshll.u32 %s1586_s10, 4  ;;  %s407_s29 = int_to_ptr.hbm [resolvable:$true] %s406_s29 }
  0x1d   : > { %s394_s2 = sshll.u32 %s1319_s1, 4  ;;  %s1603_s13 = smov 1   ;;  %s395_s2 = int_to_ptr.vmem [resolvable:$true] %s394_s2 }
  0x1e   : > { %s1604_s30 = smov 16   ;;  %s1320_s20 = smov [#allocation10]  }
  0x1f   : > { %1011 = dma.hbm_to_vmem [thread:$0]  (!%p1420_p5), %s393_s28, 32, %s395_s2, [#allocation8], %s1604_s30, %s1604_s30, %s1603_s13  }
  0x20   : > { %s352_s14 = sshll.u32 %s1602_s3, 4  ;;  %s408_s3 = sshll.u32 %s1320_s20, 4  ;;  %s353_s14 = int_to_ptr.hbm [resolvable:$true] %s352_s14  ;;  %s409_s3 = int_to_ptr.vmem [resolvable:$true] %s408_s3 }
  0x21   : > { %1005 = dma.hbm_to_vmem [thread:$0]  (!%p1420_p5), %s353_s14, 256, %s355_s21, [#allocation5], %s1316_s22, %s1316_s22, %s1317_s27  }
  0x22   : > { %1014 = dma.hbm_to_vmem [thread:$0]  (!%p1420_p5), %s407_s29, 32, %s409_s3, [#allocation11], %s1604_s30, %s1604_s30, %s1603_s13  }
  0x23   : > { %424 = sbr.rel (%p1409_p3) target bundleno = 684 (0x2ac), region = 64 }
  0x28   : > { %1284 = dma.done.wait (%p1405_p2), [#allocation3], 256  }
  0x29   : > { %1286 = vsyncadd (%p1405_p2), [#allocation3], 4294967040 }
  0x2a   : > { %1288 = dma.done.wait (%p1405_p2), [#allocation5], 288  }
  0x2b   : > { %1290 = vsyncadd (%p1405_p2), [#allocation5], 4294967008 }
  0x2c   : > { %1292 = dma.done.wait (%p1405_p2), [#allocation8], 64  }
  0x2d   : > { %1294 = vsyncadd (%p1405_p2), [#allocation8], 4294967232 }
  0x2e   : > { %1296 = dma.done.wait (%p1405_p2), [#allocation11], 32  }
  0x2f   : > { %1298 = vsyncadd (%p1405_p2), [#allocation11], 4294967264  ;;  %p949_p7 = scmp.ne.s32.totalorder %s1301_s17, 0 }
  0x31   : > { %506 = sbr.rel (%p949_p7) target bundleno = 57 (0x39), region = 92 }
  0x36   : > { %v507_v0 = vld [vmem:[%s1576_s0] sm:$0xff]  ;;  %vm509_vm0 = vcmask 130048   ;;  %v508_v1 = vld [vmem:[%s1576_s0 + $0x8] sm:$0xff] }
  0x37   : > { %510 = vst.msk [vmem:[%s1587_s11] sm:$0xff] %vm509_vm0, %v507_v0 }
  0x38   : > { %511 = vst.msk [vmem:[%s1587_s11 + $0x8] sm:$0xff] %vm509_vm0, %v508_v1 }
  0x39 PF: > { %s1495_s24 = sshll.u32 %s1301_s17, 3  ;;  %s520_s28 = scalar_lea.vmem [#allocation4], %s1301_s17  ;;  %vm531_vm1 = vcmask 130048   ;;  %v1321_v14 = vmov 0   ;;  %v1322_v24 = vmov 1  }
  0x3a   : > { %s517_s23 = scalar_lea.vmem [#allocation2], %s1495_s24  ;;  %s569_s29 = scalar_lea.vmem [#allocation6], %s1495_s24  ;;  %v1069_v7 = vld [vmem:[%s520_s28] ss:$0 sm:$0xff]  ;;  %1064 = vset.pattern.permute.xlu0 %v1321_v14  ;;  %1066 = vset.pattern.permute.xlu1 %v1321_v14 }
  0x3b   : > { %v969_v4 = vld [vmem:[%s517_s23] sm:$0xff]  ;;  %s572_s13 = scalar_lea.vmem [#allocation7], %s1301_s17  ;;  %s950_s30 = sshll.u32 %s1301_s17, 1  ;;  %1067 = vset.pattern.permute.xlu2 %v1321_v14 }
  0x3c   : > { %542 = vmatpush.bf16.msra.mxu0 %v969_v4  ;;  %v971_v6 = vld [vmem:[%s569_s29] sm:$0xff]  ;;  %s603_s2 = scalar_lea.vmem %s1581_s5, %s1495_s24  ;;  %s605_s25 = scalar_lea.vmem %s1582_s6, %s950_s30 }
  0x3d   : > { %593 = vmatpush.bf16.msra.mxu1 %v971_v6  ;;  %s609_s16 = scalar_lea.vmem %s1584_s8, %s1495_s24  ;;  %v604_v11 = vld [vmem:[%s603_s2] sm:$0xff]  ;;  %s607_s14 = scalar_lea.vmem %s1583_s7, %s1495_s24 }
  0x3e   : > { %v1500_v2 = vld [vmem:[%s1587_s11] sm:$0xff]  ;;  %613 = vperm.xlu0 %1064, %v604_v11   ;;  %s776_s24 = scalar_lea.vmem [#allocation9], %s1301_s17  ;;  %s783_s21 = scalar_lea.vmem [#allocation10], %s1301_s17 }
  0x3f   : > { %v1505_v3 = vld [vmem:[%s1587_s11 + $0x8] sm:$0xff]  ;;  %v606_v12 = vld [vmem:[%s605_s25] sm:$0x3] }
  0x40   : > { %v514_v5 = vpack.c.bf16 %v1505_v3, %v1500_v2  ;;  %v610_v15 = vld [vmem:[%s609_s16] sm:$0xff]  ;;  %634 = vperm.xlu1 %1066, %v606_v12  }
  0x41   : > { %668 = vperm.xlu2 %1067, %v610_v15   ;;  %v608_v22 = vld [vmem:[%s607_s14] sm:$0xff] }
  0x42   : > { %956 = vmatmul.msk.bf16.vlgmr.msra.gmra.mxu0 %vm531_vm1, %v514_v5  ;;  %v1070_v38 = vld [vmem:[%s572_s13] ss:$0 sm:$0xff] }
  0x46   : > { %1065 = vset.pattern.permute.xlu0 %v1322_v24 }
  0x47   : > { %674 = vperm.xlu0 %1065, %v604_v11  }
  0x48   : > { %659 = vperm.xlu1 %1066, %v608_v22  }
  0x49   : > { %1068 = vset.pattern.permute.xlu2 %v1322_v24 }
  0x4a   : > { %714 = vperm.xlu2 %1068, %v608_v22  }
  0xb0   : > { %v614_v37 = vpop.permute.xlu0 %613 }
  0xb9   : > { %v675_v41 = vpop.permute.xlu0 %674 }
  0xbf   : > { %v544_v8 = vpop.f32.mrf.mxu0 }
  0xc0   : > { %v545_v9 = vadd.f32 %v1069_v7, %v544_v8 }
  0xc2   : > { %v549_v10 = vmul.f32 %v545_v9, %v545_v9 }
  0xc4   : > { %v551_v13 = vmul.f32 %v549_v10, %v545_v9 }
  0xc6   : > { %v553_v16 = vmul.f32 0.044715, %v551_v13 }
  0xc7   : > { %v546_v17 = vpop.f32.mrf.mxu0 }
  0xc8   : > { %v555_v18 = vadd.f32 %v553_v16, %v545_v9  ;;  %v547_v19 = vadd.f32 %v1069_v7, %v546_v17 }
  0xca   : > { %v557_v20 = vmul.f32 0.7978846, %v555_v18  ;;  %v550_v21 = vmul.f32 %v547_v19, %v547_v19 }
  0xcc   : > { %v552_v23 = vmul.f32 %v550_v21, %v547_v19  ;;  %1073 = vtanh.f32 %v557_v20 }
  0xce   : > { %v554_v25 = vmul.f32 0.044715, %v552_v23 }
  0xd0   : > { %v556_v26 = vadd.f32 %v554_v25, %v547_v19 }
  0xd2   : > { %v558_v27 = vmul.f32 0.7978846, %v556_v26  ;;  %v1074_v28 = vpop.eup %1073 }
  0xd3   : > { %v561_v29 = vadd.f32 1.0, %v1074_v28 }
  0xd4   : > { %1075 = vtanh.f32 %v558_v27 }
  0xd5   : > { %v563_v32 = vmul.f32 0.5, %v561_v29 }
  0xd7   : > { %v565_v34 = vmul.f32 %v563_v32, %v545_v9 }
  0xda   : > { %v1076_v30 = vpop.eup %1075 }
  0xdb   : > { %v562_v31 = vadd.f32 1.0, %v1076_v30 }
  0xdd   : > { %v564_v33 = vmul.f32 0.5, %v562_v31 }
  0xdf   : > { %v566_v35 = vmul.f32 %v564_v33, %v547_v19 }
  0xe1   : > { %v567_v36 = vpack.c.bf16 %v566_v35, %v565_v34 }
  0xe3   : > { %962 = vmatmul.msk.bf16.vlgmr.msra.gmra.mxu1 %vm531_vm1, %v567_v36  ;;  %v669_v36 = vpop.permute.xlu2 %668 }
 0x160   : > { %v595_v39 = vpop.f32.mrf.mxu1 }
 0x161   : > { %v596_v40 = vadd.f32 %v1070_v38, %v595_v39 }
 0x163   : > { %v1534_v42 = vadd.f32 %v596_v40, %v1500_v2  ;;  %v635_v2 = vpop.permute.xlu1 %634 }
 0x165   : > { %v616_v43 = vmul.f32 %v614_v37, %v1534_v42  ;;  %v677_v44 = vmul.f32 %v675_v41, %v1534_v42 }
 0x167   : > { %v618_v45 = vsel %vm531_vm1, %v616_v43, 0.0  ;;  %v679_v46 = vsel %vm531_vm1, %v677_v44, 0.0 }
 0x168   : > { %v619_v47 = vrot.slane %v618_v45, 4  ;;  %v680_v48 = vrot.slane %v679_v46, 4  ;;  %v597_v49 = vpop.f32.mrf.mxu1 }
 0x169   : > { %v598_v50 = vadd.f32 %v1070_v38, %v597_v49 }
 0x16a   : > { %v620_v51 = vadd.f32 %v619_v47, %v618_v45  ;;  %v681_v52 = vadd.f32 %v680_v48, %v679_v46 }
 0x16b   : > { %v1541_v53 = vadd.f32 %v598_v50, %v1505_v3 }
 0x16c   : > { %v682_v54 = vrot.slane %v681_v52, 2  ;;  %v621_v55 = vrot.slane %v620_v51, 2 }
 0x16d   : > { %v617_v56 = vmul.f32 %v614_v37, %v1541_v53  ;;  %v678_v57 = vmul.f32 %v675_v41, %v1541_v53 }
 0x16e   : > { %v683_v58 = vadd.f32 %v682_v54, %v681_v52  ;;  %v622_v59 = vadd.f32 %v621_v55, %v620_v51  ;;  %v660_v51 = vpop.permute.xlu1 %659  ;;  %v715_v52 = vpop.permute.xlu2 %714 }
 0x16f   : > { %v625_v60 = vsel %vm531_vm1, %v617_v56, 0.0  ;;  %v686_v61 = vsel %vm531_vm1, %v678_v57, 0.0 }
 0x170   : > { %v684_v62 = vrot.slane %v683_v58, 1  ;;  %v626_v63 = vrot.slane %v625_v60, 4  ;;  %v687_v0 = vrot.slane %v686_v61, 4  ;;  %v623_v1 = vrot.slane %v622_v59, 1 }
 0x172   : > { %v627_v4 = vadd.f32 %v626_v63, %v625_v60  ;;  %v688_v3 = vadd.f32 %v687_v0, %v686_v61  ;;  %v624_v5 = vadd.f32 %v623_v1, %v622_v59  ;;  %v685_v6 = vadd.f32 %v684_v62, %v683_v58 }
 0x174   : > { %v628_v7 = vrot.slane %v627_v4, 2  ;;  %v637_v8 = vadd.f32 %v635_v2, %v624_v5  ;;  %v689_v9 = vrot.slane %v688_v3, 2  ;;  %v693_v10 = vadd.f32 %v685_v6, %v635_v2 }
 0x176   : > { %v629_v11 = vadd.f32 %v628_v7, %v627_v4  ;;  %v639_v12 = vmul.f32 %v637_v8, %v637_v8  ;;  %v690_v13 = vadd.f32 %v689_v9, %v688_v3  ;;  %v695_v14 = vmul.f32 %v693_v10, %v693_v10 }
 0x178   : > { %v630_v15 = vrot.slane %v629_v11, 1  ;;  %v691_v16 = vrot.slane %v690_v13, 1  ;;  %v641_v17 = vmul.f32 %v639_v12, %v637_v8  ;;  %v697_v18 = vmul.f32 %v695_v14, %v693_v10 }
 0x179   : > { %v1323_v12 = vmov 16.0  }
 0x17a   : > { %v631_v19 = vadd.f32 %v630_v15, %v629_v11  ;;  %v692_v20 = vadd.f32 %v691_v16, %v690_v13  ;;  %v643_v21 = vmul.f32 0.044715, %v641_v17  ;;  %v699_v22 = vmul.f32 0.044715, %v697_v18 }
 0x17c   : > { %v638_v23 = vadd.f32 %v635_v2, %v631_v19  ;;  %v694_v24 = vadd.f32 %v692_v20, %v635_v2  ;;  %v645_v25 = vadd.f32 %v643_v21, %v637_v8  ;;  %v701_v26 = vadd.f32 %v699_v22, %v693_v10 }
 0x17e   : > { %v640_v27 = vmul.f32 %v638_v23, %v638_v23  ;;  %v696_v28 = vmul.f32 %v694_v24, %v694_v24  ;;  %v647_v29 = vmul.f32 0.7978846, %v645_v25  ;;  %v703_v30 = vmul.f32 0.7978846, %v701_v26 }
 0x180   : > { %v642_v31 = vmul.f32 %v640_v27, %v638_v23  ;;  %1077 = vtanh.f32 %v647_v29  ;;  %v698_v32 = vmul.f32 %v696_v28, %v694_v24 }
 0x181   : > { %1079 = vtanh.f32 %v703_v30 }
 0x182   : > { %v644_v33 = vmul.f32 0.044715, %v642_v31  ;;  %v700_v34 = vmul.f32 0.044715, %v698_v32 }
 0x184   : > { %v646_v35 = vadd.f32 %v644_v33, %v638_v23  ;;  %v702_v37 = vadd.f32 %v700_v34, %v694_v24 }
 0x186   : > { %v1078_v38 = vpop.eup %1077  ;;  %v648_v39 = vmul.f32 0.7978846, %v646_v35  ;;  %v704_v40 = vmul.f32 0.7978846, %v702_v37 }
 0x187   : > { %v1080_v41 = vpop.eup %1079  ;;  %v651_v43 = vadd.f32 1.0, %v1078_v38 }
 0x188   : > { %1081 = vtanh.f32 %v648_v39  ;;  %v707_v44 = vadd.f32 1.0, %v1080_v41  ;;  %v1071_v41 = vld [vmem:[%s776_s24] ss:$0 sm:$0xff] }
 0x189   : > { %v653_v45 = vmul.f32 0.5, %v651_v43  ;;  %1083 = vtanh.f32 %v704_v40 }
 0x18a   : > { %v709_v46 = vmul.f32 0.5, %v707_v44  ;;  %1085 = vrcp.f32 %v1323_v12 }
 0x18b   : > { %v655_v47 = vmul.f32 %v653_v45, %v637_v8  ;;  %v1072_v45 = vld [vmem:[%s783_s21] ss:$0 sm:$0xff] }
 0x18c   : > { %v711_v48 = vmul.f32 %v709_v46, %v693_v10 }
 0x18d   : > { %v662_v49 = vperm.slane %v655_v47, 0 }
 0x18e   : > { %v1082_v50 = vpop.eup %1081  ;;  %v717_v54 = vperm.slane %v711_v48, 1 }
 0x18f   : > { %v1084_v55 = vpop.eup %1083  ;;  %v652_v56 = vadd.f32 1.0, %v1082_v50  ;;  %v664_v57 = vmul.f32 %v662_v49, %v660_v51 }
 0x190   : > { %v708_v58 = vadd.f32 1.0, %v1084_v55  ;;  %v719_v61 = vmul.f32 %v717_v54, %v715_v52  ;;  %v1086_v13 = vpop.eup %1085 }
 0x191   : > { %v654_v59 = vmul.f32 0.5, %v652_v56  ;;  %v671_v60 = vadd.f32 %v669_v36, %v664_v57  ;;  %v732_v14 = vmul.f32 16.0, %v1086_v13  ;;  %vm736_vm2 = vweird.f32 %v1086_v13 }
 0x192   : > { %v710_v62 = vmul.f32 0.5, %v708_v58 }
 0x193   : > { %v656_v63 = vmul.f32 %v654_v59, %v638_v23  ;;  %v721_v0 = vadd.f32 %v719_v61, %v671_v60 }
 0x194   : > { %v712_v1 = vmul.f32 %v710_v62, %v694_v24 }
 0x195   : > { %v663_v2 = vperm.slane %v656_v63, 0  ;;  %v723_v4 = vadd.f32 %v721_v0, %v1534_v42  ;;  %v733_v42 = vsub.f32 1.0, %v732_v14 }
 0x196   : > { %v718_v3 = vperm.slane %v712_v1, 1 }
 0x197   : > { %v665_v5 = vmul.f32 %v663_v2, %v660_v51  ;;  %v725_v6 = vsel %vm531_vm1, %v723_v4, 0.0  ;;  %v734_v15 = vmul.f32 %v1086_v13, %v733_v42 }
 0x198   : > { %726 = vadd.xlane.f32.xlu1 %v725_v6  ;;  %v720_v8 = vmul.f32 %v718_v3, %v715_v52 }
 0x199   : > { %v672_v7 = vadd.f32 %v669_v36, %v665_v5  ;;  %v735_v16 = vadd.f32 %v1086_v13, %v734_v15 }
 0x19b   : > { %v722_v9 = vadd.f32 %v720_v8, %v672_v7  ;;  %v737_v17 = vsel %vm736_vm2, %v1086_v13, %v735_v16 }
 0x19d   : > { %v724_v10 = vadd.f32 %v722_v9, %v1541_v53 }
 0x19f   : > { %v728_v11 = vsel %vm531_vm1, %v724_v10, 0.0 }
 0x1a0   : > { %729 = vadd.xlane.f32.xlu2 %v728_v11 }
 0x20b   : > { %v727_v18 = vpop.xlane.xlu1 %726 }
 0x20c   : > { %v738_v19 = vmul.f32 %v737_v17, %v727_v18 }
 0x20e   : > { %v740_v20 = vsub.f32 %v723_v4, %v738_v19 }
 0x210   : > { %v742_v21 = vmul.f32 %v740_v20, %v740_v20 }
 0x212   : > { %v744_v22 = vsel %vm531_vm1, %v742_v21, 0.0 }
 0x213   : > { %v730_v23 = vpop.xlane.xlu2 %729  ;;  %745 = vadd.xlane.f32.xlu0 %v744_v22 }
 0x214   : > { %v739_v53 = vmul.f32 %v737_v17, %v730_v23 }
 0x216   : > { %v741_v24 = vsub.f32 %v724_v10, %v739_v53 }
 0x218   : > { %v743_v25 = vmul.f32 %v741_v24, %v741_v24 }
 0x21a   : > { %v747_v26 = vsel %vm531_vm1, %v743_v25, 0.0 }
 0x21b   : > { %748 = vadd.xlane.f32.xlu2 %v747_v26 }
 0x286   : > { %v746_v27 = vpop.xlane.xlu0 %745 }
 0x287   : > { %v750_v28 = vmul.f32 %v746_v27, %v737_v17 }
 0x289   : > { %v752_v29 = vadd.f32 1e-05, %v750_v28 }
 0x28b   : > { %1087 = vrsqrt.f32 %v752_v29  ;;  %vm760_vm4 = vweird.f32 %v752_v29 }
 0x28e   : > { %v749_v30 = vpop.xlane.xlu2 %748 }
 0x28f   : > { %v751_v31 = vmul.f32 %v749_v30, %v737_v17 }
 0x291   : > { %v1088_v32 = vpop.eup %1087  ;;  %v753_v33 = vadd.f32 1e-05, %v751_v31 }
 0x292   : > { %v755_v34 = vmul.f32 %v1088_v32, %v752_v29  ;;  %vm761_vm3 = vweird.f32 %v1088_v32 }
 0x293   : > { %1089 = vrsqrt.f32 %v753_v33  ;;  %vm762_vm5 = vmor %vm760_vm4, %vm761_vm3  ;;  %vm770_vm7 = vweird.f32 %v753_v33 }
 0x294   : > { %v756_v35 = vmul.f32 %v1088_v32, %v755_v34 }
 0x296   : > { %v757_v36 = vmul.f32 0.5, %v756_v35 }
 0x298   : > { %v758_v37 = vsub.f32 1.5, %v757_v36 }
 0x299   : > { %v1090_v38 = vpop.eup %1089 }
 0x29a   : > { %v759_v39 = vmul.f32 %v1088_v32, %v758_v37  ;;  %v765_v40 = vmul.f32 %v1090_v38, %v753_v33  ;;  %vm771_vm6 = vweird.f32 %v1090_v38 }
 0x29b   : > { %vm772_vm8 = vmor %vm770_vm7, %vm771_vm6 }
 0x29c   : > { %v763_v43 = vsel %vm762_vm5, %v1088_v32, %v759_v39  ;;  %v766_v44 = vmul.f32 %v1090_v38, %v765_v40 }
 0x29d   : > { %v774_v46 = vmul.f32 %v763_v43, %v740_v20 }
 0x29e   : > { %v767_v47 = vmul.f32 0.5, %v766_v44 }
 0x29f   : > { %v781_v48 = vmul.f32 %v1071_v41, %v774_v46 }
 0x2a0   : > { %v768_v49 = vsub.f32 1.5, %v767_v47 }
 0x2a1   : > { %v788_v50 = vadd.f32 %v1072_v45, %v781_v48 }
 0x2a2   : > { %v769_v51 = vmul.f32 %v1090_v38, %v768_v49 }
 0x2a3   : > { %790 = vst.msk [vmem:[%s1587_s11] sm:$0xff] %vm531_vm1, %v788_v50 }
 0x2a4   : > { %v773_v52 = vsel %vm772_vm8, %v1090_v38, %v769_v51 }
 0x2a5   : > { %v775_v54 = vmul.f32 %v773_v52, %v741_v24 }
 0x2a7   : > { %v782_v55 = vmul.f32 %v1071_v41, %v775_v54 }
 0x2a9   : > { %v789_v56 = vadd.f32 %v1072_v45, %v782_v55 }
 0x2ab   : > { %791 = vst.msk [vmem:[%s1587_s11 + $0x8] sm:$0xff] %vm531_vm1, %v789_v56 }
 0x2ac PF: > { %s25_s19 = sadd.s32 1, %s1309_s19   ;;  %s1605_s17 = smov %s1305_s18 }
 0x2ad   : > { %p22_p8 = scmp.ge.s32.totalorder %s25_s19, 4   ;;  %s1606_s18 = smov %s1608_s26 }
 0x2af   :  { %24 = sbr.rel (!%p22_p8) target bundleno = 10 (0xa), region = 133 }
 0x2b4   :  { %814 = vsyncpa [#allocation3], 1 }
 0x2b5   :  { %816 = vsyncpa [#allocation3 + $0x1], 1 }
 0x2b6   :  { %817 = vsyncpa [#allocation5], 1 }
 0x2b7   :  { %818 = vsyncpa [#allocation8], 1 }
 0x2b8   :  { %819 = vsyncpa [#allocation11], 1 }

// kernel: amd_forward.9
= control target key start
LH: loop header
LB: loop body
LE: loop exit
PB: predicated region body
PF: predicated region fallthrough
CT: control target
= control target key end

     0   :  { %10 = vsyncpa [#allocation3], 0  ;;  %s680_s0 = inlined_call_operand.vmem [shape: f32[2,8,8], index: 0, kind: input, shape index: {}]   ;;  %s681_s1 = inlined_call_operand.vmem [shape: f32[2,8,1], index: 1, kind: input, shape index: {}]   ;;  %s682_s2 = inlined_call_operand.vmem [shape: f32[2,8,1], index: 2, kind: input, shape index: {}]   ;;  %s683_s3 = inlined_call_operand.vmem [shape: f32[8,1], index: 3, kind: input, shape index: {}]   ;;  %s684_s4 = inlined_call_operand.vmem [shape: f32[8,1], index: 4, kind: input, shape index: {}]   ;;  %s685_s5 = inlined_call_operand.hbm [shape: f32[2,8,8], index: 5, kind: output, shape index: {}]  }
   0x1   :  { %12 = vsyncpa [#allocation3 + $0x1], 0  ;;  %s583_s18 = smov 0   ;;  %s585_s19 = smov 0  }
   0x2   :  { %s587_s20 = smov 0   ;;  %s589_s21 = smov 0  }
   0x3 LB: > { %s604_s22 = sadd.s32 4294967295, %s550_s21   ;;  %s431_s23 = sadd.s32 4294967294, %s550_s21   ;;  %s550_s21 = sphi %s589_s21, %s691_s21   ;;  %s546_s20 = sphi %s587_s20, %s690_s20   ;;  %s542_s19 = sphi %s585_s19, %s689_s19   ;;  %s538_s18 = sphi %s583_s18, %s688_s18  }
   0x4   : > { %s608_s24 = sadd.s32 1, %s550_s21   ;;  %s145_s25 = sadd.s32 1, %s546_s20 }
   0x5   : > { %s142_s26 = ssub.s32 %s550_s21, %s608_s24  ;;  %p155_p0 = scmp.ne.s32.totalorder %s546_s20, %s542_s19 }
   0x6   : > { %p143_p1 = scmp.eq.s32.totalorder %s142_s26, 0  ;;  %p156_p2 = scmp.eq.s32.totalorder %s604_s22, 1 }
   0x7   : > { %p161_p3 = scmp.ne.s32.totalorder %s542_s19, %s538_s18  ;;  %p162_p4 = scmp.eq.s32.totalorder %s431_s23, 1 }
   0x8   : > { %s619_s27 = scalar_select %p143_p1, %s546_s20, %s145_s25  }
   0x9   : > { %p621_p5 = por %p156_p2, %p155_p0  ;;  %p625_p6 = por %p162_p4, %p161_p3 }
   0xa   : > { %p434_p7 = scmp.ge.s32.totalorder %s550_s21, 1  ;;  %p207_p8 = scmp.lt.s32.totalorder %s550_s21, 3 }
   0xc   : > { %p208_p9 = pnand %p434_p7, %p207_p8 }
   0xd   : > { %p242_p10 = scmp.lt.s32.totalorder (!%p208_p9), %s604_s22, 1  ;;  %s239_s26 = sand.u32 (!%p208_p9), 1, %s542_s19  }
   0xe   : > { %211 = sbr.rel (%p208_p9) target bundleno = 317 (0x13d), region = 40  ;;  %s435_s30 = sshll.u32 (!%p208_p9), %s239_s26, 3 }
   0xf   : > { %s440_s6 = sshll.u32 (!%p208_p9), %s604_s22, 3  ;;  %s241_s10 = scalar_lea.vmem (!%p208_p9), [#allocation2], %s435_s30 }
  0x10   : > { %s343_s9 = scalar_lea.hbm (!%p208_p9), %s685_s5, %s440_s6  ;;  %s333_s13 = scalar_lea.sflag (!%p208_p9), [#allocation3], %s239_s26 }
  0x11   : > { %s347_s12 = sshll.u32 (!%p208_p9), %s343_s9, 4  ;;  %s508_s17 = scalar_lea.hbm (!%p208_p9), %s685_s5, 16  ;;  %s348_s12 = int_to_ptr.hbm [resolvable:$true] %s347_s12 }
  0x12   : > { %s502_s14 = sshra.s32 (!%p208_p9), %s348_s12, 4  ;;  %s503_s14 = int_to_ptr.hbm [resolvable:$true] %s502_s14 }
  0x13   : > { %v262_v0 = vld [vmem:[%s683_s3] sm:$0xff]  ;;  %v552_v1 = vmov 0   ;;  %s243_s7 = scalar_select %p242_p10, %s604_s22, 1  ;;  %vm330_vm4 = vcmask 64512  }
  0x14   : > { %484 = vset.pattern.permute.xlu0 %v552_v1  ;;  %v263_v2 = vadd.f32 1e-10, %v262_v0  ;;  %485 = vset.pattern.permute.xlu1 %v552_v1  ;;  %v255_v4 = vld [vmem:[%s684_s4] sm:$0xff]  ;;  %s504_s15 = scalar_lea.hbm %s503_s14, 8  ;;  %p509_p0 = scmp.lt.s32.totalorder %s503_s14, %s685_s5 }
  0x15   : > { %s436_s8 = sshll.u32 %s243_s7, 3  ;;  %p505_p11 = scmp.ne.s32.totalorder %s503_s14, %s504_s15 }
  0x16   : > { %266 = vperm.xlu0 %484, %v263_v2   ;;  %s253_s11 = scalar_lea.vmem %s682_s2, %s436_s8  ;;  %s249_s16 = scalar_lea.vmem %s681_s1, %s436_s8 }
  0x17   : > { %v284_v3 = vld [vmem:[%s253_s11] sm:$0xff]  ;;  %s245_s25 = scalar_lea.vmem %s680_s0, %s436_s8  ;;  %s345_s11 = sshll.u32 %s241_s10, 4  ;;  %s346_s11 = int_to_ptr.vmem [resolvable:$true] %s345_s11 }
  0x18   : > { %287 = vperm.xlu1 %485, %v284_v3   ;;  %v291_v5 = vld [vmem:[%s249_s16] sm:$0xff]  ;;  %p506_p12 = pnand %p505_p11, %p621_p5  ;;  %p510_p1 = scmp.lt.s32.totalorder %s508_s17, %s504_s15 }
  0x19   : > { %v254_v15 = vld [vmem:[%s245_s25] sm:$0xff] }
  0x1a   : > { %p507_p13 = pneg %p506_p12  ;;  %p511_p2 = por %p510_p1, %p509_p0 }
  0x1c   : > { %p512_p3 = pnand %p511_p2, %p507_p13 }
  0x1e   : > { %258 = vperm.xlu0 %484, %v255_v4  }
  0x20   : > { %294 = vperm.xlu1 %485, %v291_v5  }
  0x88   : > { %v267_v6 = vpop.permute.xlu0 %266 }
  0x89   : > { %486 = vrcp.f32 %v267_v6  ;;  %v280_v11 = vand.u32 2147483648, %v267_v6  ;;  %v278_v13 = vand.u32 2147483647, %v267_v6  ;;  %vm274_vm1 = vweird.f32 %v267_v6 }
  0x8a   : > { %v288_v10 = vpop.permute.xlu1 %287 }
  0x8b   : > { %v281_v17 = vor.u32 1.1754944e-38, %v280_v11  ;;  %vm279_vm3 = vcmp.eq.f32.partialorder %v278_v13, 8.507059e+37 }
  0x8f   : > { %v487_v7 = vpop.eup %486 }
  0x90   : > { %v270_v8 = vmul.f32 %v487_v7, %v267_v6  ;;  %vm275_vm0 = vweird.f32 %v487_v7  ;;  %v259_v14 = vpop.permute.xlu0 %258 }
  0x91   : > { %vm276_vm2 = vmor %vm274_vm1, %vm275_vm0  ;;  %v261_v19 = vsub.f32 %v254_v15, %v259_v14 }
  0x92   : > { %v271_v9 = vsub.f32 1.0, %v270_v8  ;;  %v295_v23 = vpop.permute.xlu1 %294 }
  0x94   : > { %v272_v12 = vmul.f32 %v487_v7, %v271_v9 }
  0x96   : > { %v273_v16 = vadd.f32 %v487_v7, %v272_v12 }
  0x98   : > { %v277_v18 = vsel %vm276_vm2, %v487_v7, %v273_v16 }
  0x99   : > { %v282_v20 = vsel %vm279_vm3, %v281_v17, %v277_v18 }
  0x9a   : > { %v283_v21 = vmul.f32 %v282_v20, %v261_v19 }
  0x9c   : > { %v290_v22 = vmul.f32 %v288_v10, %v283_v21 }
  0x9e   : > { %v297_v24 = vadd.f32 %v295_v23, %v290_v22 }
  0xa0   : > { %298 = vxpose.xlu2.b32.start.end [1/1] (short) (narrow) %v297_v24, 8 }
 0x139   : > { %v314_v25 = vpop.trf.xlu2 }
 0x13a   : > { %331 = vst.msk [vmem:[%s241_s10] sm:$0xff] %vm330_vm4, %v314_v25 }
 0x13b   : > { %515 = shalt.err (!%p512_p3)
}
 0x13c   : > { %443 = dma.vmem_to_hbm [thread:$0]  (%p621_p5), %s346_s11, 128, %s348_s12, %s333_s13  }
 0x13d PF: > { %p449_p4 = scmp.ge.s32.totalorder %s550_s21, 2  ;;  %s359_s26 = sand.u32 1, %s538_s18  }
 0x13e   : > { %s360_s30 = scalar_lea.sflag [#allocation3], %s359_s26 }
 0x13f   : > { %p446_p7 = pnand %p449_p4, %p625_p6 }
 0x141   : > { %p447_p8 = pneg %p446_p7 }
 0x143   : > { %533 = dma.done.wait (%p447_p8), %s360_s30, 128  }
 0x144   : > { %535 = vsyncadd (%p447_p8), %s360_s30, 4294967168  ;;  %p15_p9 = scmp.ge.s32.totalorder %s608_s24, 4   ;;  %s688_s18 = smov %s542_s19 }
 0x145   : > { %s689_s19 = smov %s546_s20  ;;  %s690_s20 = smov %s619_s27 }
 0x146   : > { %s691_s21 = smov %s608_s24  ;;  %17 = sbr.rel (!%p15_p9) target bundleno = 3 (0x3), region = 81 }
 0x14b   :  { %366 = vsyncpa [#allocation3], 1 }
 0x14c   :  { %368 = vsyncpa [#allocation3 + $0x1], 1 }

// kernel: amd_forward.8
= control target key start
LH: loop header
LB: loop body
LE: loop exit
PB: predicated region body
PF: predicated region fallthrough
CT: control target
= control target key end

     0   :  { %s3386_s11 = smov [#allocation3]   ;;  %s3387_s12 = smov [#allocation4]   ;;  %s4042_s0 = inlined_call_operand.vmem [shape: s32[4], index: 0, kind: input, shape index: {}]   ;;  %s4043_s2 = inlined_call_operand.vmem [shape: f32[16,16], index: 2, kind: input, shape index: {}]   ;;  %s4044_s3 = inlined_call_operand.vmem [shape: f32[8,16,1], index: 3, kind: input, shape index: {}]   ;;  %s4045_s4 = inlined_call_operand.vmem [shape: bf16[8,16,2048], index: 4, kind: input, shape index: {}]   ;;  %s4046_s5 = inlined_call_operand.vmem [shape: f32[8,1,2048], index: 5, kind: input, shape index: {}]   ;;  %s4047_s6 = inlined_call_operand.vmem [shape: bf16[8,2048,8], index: 6, kind: input, shape index: {}]   ;;  %s4048_s7 = inlined_call_operand.vmem [shape: f32[8,1,8], index: 7, kind: input, shape index: {}]   ;;  %s4049_s8 = inlined_call_operand.vmem [shape: f32[16,8], index: 8, kind: output, shape index: {}]   ;;  %s4050_s1 = inlined_call_operand.vmem [shape: s32[4], index: 1, kind: input, shape index: {}]  }
   0x1   :  { %s14_s29 = sshll.u32 %s4042_s0, 4  ;;  %s19_s10 = sshll.u32 %s4050_s1, 4  ;;  %s15_s29 = int_to_ptr.vmem [resolvable:$true] %s14_s29  ;;  %s20_s10 = int_to_ptr.vmem [resolvable:$true] %s19_s10 }
   0x2   :  { %17 = dma.vmem_to_smem %s15_s29, 16, %s3386_s11, [#allocation2] }
   0x3   :  { %22 = dma.vmem_to_smem %s20_s10, 16, %s3387_s12, [#allocation2] }
   0x4   :  { %3372 = dma.done.wait [#allocation2], 32 }
   0x5   :  { %3373 = vsyncadd [#allocation2], 4294967264 }
   0x6   :  { %25 = sfence }
   0x7   :  { %s3441_s13 = smov 0   ;;  %s3443_s14 = smov 0  }
   0x8   :  { %s3445_s15 = smov 0  }
   0x9 LB: > { %s40_s0 = sadd.s32 1, %s3380_s14  ;;  %p2491_p0 = scmp.ge.s32.totalorder %s3384_s15, 1  ;;  %s3384_s15 = sphi %s3445_s15, %s31_s15   ;;  %s3380_s14 = sphi %s3443_s14, %s4052_s14   ;;  %s3376_s13 = sphi %s3441_s13, %s4051_s13  }
   0xa   : > { %p41_p1 = scmp.ge.s32.totalorder %s40_s0, 4  ;;  %p304_p2 = scmp.lt.s32.totalorder %s3384_s15, 5 }
   0xc   : > { %s4054_s0 = smov (%p41_p1, %s40_s0), 0  ;;  %p305_p3 = pnand %p2491_p0, %p304_p2 }
   0xd   : > { %s372_s1 = sld [smem:[#allocation3 + %s3376_s13]] (!%p305_p3)  ;;  %p2497_p8 = scmp.ne.s32.totalorder (!%p305_p3), %s3376_s13, 0 }
   0xe   : > { %308 = sbr.rel (%p305_p3) target bundleno = 446 (0x1be), region = 44  ;;  %s379_s16 = sld [smem:[#allocation3 + %s3376_s13]] (!%p305_p3) }
   0xf   : > { %s385_s17 = sld [smem:[#allocation3 + %s3376_s13]] (!%p305_p3) }
  0x10   : > { %s392_s18 = sld [smem:[#allocation3 + %s3376_s13]] (!%p305_p3) }
  0x13   : > { %p373_p4 = scmp.lt.s32.totalorder %s372_s1, 7 }
  0x14   : > { %p380_p5 = scmp.lt.s32.totalorder %s379_s16, 7 }
  0x15   : > { %s4056_s1 = smov (!%p373_p4, %s372_s1), 7  ;;  %p386_p6 = scmp.lt.s32.totalorder %s385_s17, 7 }
  0x16   : > { %s4058_s16 = smov (!%p380_p5, %s379_s16), 7  ;;  %s3096_s19 = sshll.u32 %s4056_s1, 7 }
  0x17   : > { %s3468_s22 = scalar_lea.vmem %s4045_s4, %s3096_s19  ;;  %s2494_s23 = sshll.u32 %s4058_s16, 4 }
  0x18   : > { %s3473_s26 = scalar_lea.vmem %s4046_s5, %s2494_s23  ;;  %p393_p7 = scmp.lt.s32.totalorder %s392_s18, 7 }
  0x19   : > { %s4060_s17 = smov (!%p386_p6, %s385_s17), 7  ;;  %407 = sbr.rel (%p2497_p8) target bundleno = 33 (0x21), region = 48 }
  0x1a   : > { %s4062_s18 = smov (!%p393_p7, %s392_s18), 7  ;;  %s3097_s27 = sshll.u32 %s4060_s17, 10 }
  0x1b   : > { %s3480_s30 = scalar_lea.vmem %s4047_s6, %s3097_s27  ;;  %s395_s11 = scalar_lea.vmem %s4048_s7, %s4062_s18 }
  0x1e   : > { %vm408_vm0 = vcmask 64512   ;;  %v3388_v0 = vmov 0.0  }
  0x1f   : > { %409 = vst.msk [vmem:[%s4049_s8] sm:$0xff] %vm408_vm0, %v3388_v0 }
  0x20   : > { %410 = vst.msk [vmem:[%s4049_s8 + $0x8] sm:$0xff] %vm408_vm0, %v3388_v0 }
  0x21 PF: > { %s411_s19 = sld [smem:[#allocation4 + %s3376_s13]] }
  0x27   : > { %p2498_p9 = scmp.ne.s32.totalorder %s411_s19, 1 }
  0x29   : > { %415 = sbr.rel (%p2498_p9) target bundleno = 446 (0x1be), region = 52 }
  0x2e   : > { %v2501_v1 = vld [vmem:[%s3468_s22] sm:$0xf]  ;;  %v3098_v3 = vld [vmem:[%s3468_s22 + $0x4] sm:$0xf]  ;;  %v2509_v6 = vld [vmem:[%s3468_s22 + $0x8] sm:$0xf] }
  0x2f   : > { %v3106_v2 = vld [vmem:[%s3468_s22 + $0x3c] sm:$0xf0]  ;;  %v2503_v5 = vld [vmem:[%s3468_s22 + $0x40] sm:$0xf0]  ;;  %v3107_v7 = vld [vmem:[%s3468_s22 + $0x44] sm:$0xf0] }
  0x30   : > { %v2502_v4 = vor.u32 %v3106_v2, %v2501_v1  ;;  %v2506_v8 = vor.u32 %v3098_v3, %v2503_v5  ;;  %v2510_v9 = vor.u32 %v3107_v7, %v2509_v6  ;;  %v3099_v10 = vld [vmem:[%s3468_s22 + $0xc] sm:$0xf]  ;;  %v416_v12 = vld [vmem:[%s4043_s2] sm:$0xff]  ;;  %vm551_vm1 = vcmask 130048   ;;  %v2525_v15 = vld [vmem:[%s3468_s22 + $0x18] sm:$0xf] }
  0x31   : > { %v2511_v11 = vld [vmem:[%s3468_s22 + $0x48] sm:$0xf0]  ;;  %v3109_v16 = vld [vmem:[%s3468_s22 + $0x54] sm:$0xf0]  ;;  %v2517_v19 = vld [vmem:[%s3468_s22 + $0x10] sm:$0xf] }
  0x32   : > { %562 = vmatpush.bf16.msra.mxu0 %v2502_v4  ;;  %v2514_v13 = vor.u32 %v3099_v10, %v2511_v11  ;;  %v417_v14 = vld [vmem:[%s4043_s2 + $0x8] sm:$0xff]  ;;  %576 = vmatpush.bf16.msra.mxu1 %v2506_v8  ;;  %v2526_v18 = vor.u32 %v3109_v16, %v2525_v15  ;;  %v3108_v20 = vld [vmem:[%s3468_s22 + $0x4c] sm:$0xf0]  ;;  %v3100_v21 = vld [vmem:[%s3468_s22 + $0x14] sm:$0xf]  ;;  %vm2356_vm2 = vcmask 64512  }
  0x33   : > { %590 = vmatpush.bf16.msra.mxu2 %v2510_v9  ;;  %v3510_v17 = vpack.c.bf16 %v417_v14, %v416_v12  ;;  %v2518_v22 = vor.u32 %v3108_v20, %v2517_v19  ;;  %v2519_v23 = vld [vmem:[%s3468_s22 + $0x50] sm:$0xf0]  ;;  %v3101_v24 = vld [vmem:[%s3468_s22 + $0x1c] sm:$0xf]  ;;  %v2541_v28 = vld [vmem:[%s3468_s22 + $0x28] sm:$0xf] }
  0x34   : > { %604 = vmatpush.bf16.msra.mxu3 %v2514_v13  ;;  %v2527_v25 = vld [vmem:[%s3468_s22 + $0x58] sm:$0xf0]  ;;  %v2522_v26 = vor.u32 %v3100_v21, %v2519_v23  ;;  %v3111_v29 = vld [vmem:[%s3468_s22 + $0x64] sm:$0xf0]  ;;  %v2533_v30 = vld [vmem:[%s3468_s22 + $0x20] sm:$0xf] }
  0x35   : > { %2563 = vmatmul.msk.bf16.vlgmr.msra.gmra.mxu0 %vm551_vm1, %v3510_v17  ;;  %v2530_v27 = vor.u32 %v3101_v24, %v2527_v25  ;;  %2564 = vmatmul.msk.bf16.vlgmr.msra.gmra.mxu1 %vm551_vm1, %v3510_v17  ;;  %v2542_v31 = vor.u32 %v3111_v29, %v2541_v28  ;;  %v3110_v32 = vld [vmem:[%s3468_s22 + $0x5c] sm:$0xf0]  ;;  %v3102_v33 = vld [vmem:[%s3468_s22 + $0x24] sm:$0xf]  ;;  %v3103_v37 = vld [vmem:[%s3468_s22 + $0x2c] sm:$0xf] }
  0x36   : > { %2565 = vmatmul.msk.bf16.vlgmr.msra.gmra.mxu2 %vm551_vm1, %v3510_v17  ;;  %v2535_v34 = vld [vmem:[%s3468_s22 + $0x60] sm:$0xf0]  ;;  %618 = vmatpush.bf16.msrb.mxu0 %v2518_v22  ;;  %v2534_v35 = vor.u32 %v3110_v32, %v2533_v30  ;;  %v2543_v38 = vld [vmem:[%s3468_s22 + $0x68] sm:$0xf0]  ;;  %v2557_v40 = vld [vmem:[%s3468_s22 + $0x38] sm:$0xf] }
  0x37   : > { %646 = vmatpush.bf16.msrb.mxu2 %v2526_v18  ;;  %2566 = vmatmul.msk.bf16.vlgmr.msra.gmra.mxu3 %vm551_vm1, %v3510_v17  ;;  %v2538_v36 = vor.u32 %v3102_v33, %v2535_v34  ;;  %v2546_v39 = vor.u32 %v3103_v37, %v2543_v38  ;;  %v3113_v41 = vld [vmem:[%s3468_s22 + $0x74] sm:$0xf0]  ;;  %v2549_v42 = vld [vmem:[%s3468_s22 + $0x30] sm:$0xf]  ;;  %v3104_v44 = vld [vmem:[%s3468_s22 + $0x34] sm:$0xf] }
  0x38   : > { %632 = vmatpush.bf16.msrb.mxu1 %v2522_v26  ;;  %660 = vmatpush.bf16.msrb.mxu3 %v2530_v27  ;;  %v3112_v43 = vld [vmem:[%s3468_s22 + $0x6c] sm:$0xf0]  ;;  %v2551_v45 = vld [vmem:[%s3468_s22 + $0x70] sm:$0xf0]  ;;  %v3105_v46 = vld [vmem:[%s3468_s22 + $0x3c] sm:$0xf]  ;;  %v2558_v48 = vor.u32 %v3113_v41, %v2557_v40 }
  0x39   : > { %v2559_v47 = vld [vmem:[%s3468_s22 + $0x78] sm:$0xf0]  ;;  %v2550_v49 = vor.u32 %v3112_v43, %v2549_v42  ;;  %v2554_v50 = vor.u32 %v3104_v44, %v2551_v45  ;;  %v3120_v56 = vld [vmem:[%s3480_s30 + $0x30] sm:$0xff]  ;;  %v3119_v60 = vld [vmem:[%s3480_s30 + $0x28] sm:$0xff]  ;;  %s3915_s22 = sld [smem:[#allocation3 + %s3376_s13]] }
  0x3a   : > { %674 = vmatpush.bf16.msra.mxu0 %v2534_v35  ;;  %v2562_v51 = vor.u32 %v3105_v46, %v2559_v47  ;;  %v3121_v52 = vld [vmem:[%s3480_s30 + $0x38] sm:$0xff]  ;;  %v3128_v57 = vld [vmem:[%s3480_s30 + $0x70] sm:$0xff]  ;;  %v3127_v61 = vld [vmem:[%s3480_s30 + $0x68] sm:$0xff] }
  0x3b   : > { %702 = vmatpush.bf16.msra.mxu2 %v2542_v31  ;;  %v3129_v53 = vld [vmem:[%s3480_s30 + $0x78] sm:$0xff]  ;;  %v3136_v58 = vld [vmem:[%s3480_s30 + $0xb0] sm:$0xff]  ;;  %v3135_v62 = vld [vmem:[%s3480_s30 + $0xa8] sm:$0xff] }
  0x3c   : > { %688 = vmatpush.bf16.msra.mxu1 %v2538_v36  ;;  %716 = vmatpush.bf16.msra.mxu3 %v2546_v39  ;;  %v3137_v54 = vld [vmem:[%s3480_s30 + $0xb8] sm:$0xff]  ;;  %v3144_v59 = vld [vmem:[%s3480_s30 + $0xf0] sm:$0xff]  ;;  %v3143_v63 = vld [vmem:[%s3480_s30 + $0xe8] sm:$0xff] }
  0x3d   : > { %v3145_v55 = vld [vmem:[%s3480_s30 + $0xf8] sm:$0xff]  ;;  %v3118_v0 = vld [vmem:[%s3480_s30 + $0x20] sm:$0xff]  ;;  %v3116_v6 = vld [vmem:[%s3480_s30 + $0x10] sm:$0xff] }
  0x3e   : > { %v3126_v1 = vld [vmem:[%s3480_s30 + $0x60] sm:$0xff]  ;;  %v3117_v4 = vld [vmem:[%s3480_s30 + $0x18] sm:$0xff]  ;;  %v3124_v7 = vld [vmem:[%s3480_s30 + $0x50] sm:$0xff] }
  0x3f   : > { %v3134_v2 = vld [vmem:[%s3480_s30 + $0xa0] sm:$0xff]  ;;  %v3125_v5 = vld [vmem:[%s3480_s30 + $0x58] sm:$0xff]  ;;  %v3115_v10 = vld [vmem:[%s3480_s30 + $0x8] sm:$0xff]  ;;  %s3091_s13 = sshll.u32 %s3915_s22, 4 }
  0x40   : > { %v3142_v3 = vld [vmem:[%s3480_s30 + $0xe0] sm:$0xff]  ;;  %v3133_v8 = vld [vmem:[%s3480_s30 + $0x98] sm:$0xff]  ;;  %v3123_v11 = vld [vmem:[%s3480_s30 + $0x48] sm:$0xff]  ;;  %s3972_s27 = scalar_lea.vmem %s4044_s3, %s3091_s13 }
  0x41   : > { %v3141_v9 = vld [vmem:[%s3480_s30 + $0xd8] sm:$0xff]  ;;  %v3132_v12 = vld [vmem:[%s3480_s30 + $0x90] sm:$0xff]  ;;  %v3114_v14 = vld [vmem:[%s3480_s30] sm:$0xff] }
  0x42   : > { %v3140_v13 = vld [vmem:[%s3480_s30 + $0xd0] sm:$0xff]  ;;  %v3122_v15 = vld [vmem:[%s3480_s30 + $0x40] sm:$0xff]  ;;  %v3153_v16 = vld [vmem:[%s3480_s30 + $0x138] sm:$0xff] }
  0x43   : > { %v3131_v18 = vld [vmem:[%s3480_s30 + $0x88] sm:$0xff]  ;;  %v3152_v20 = vld [vmem:[%s3480_s30 + $0x130] sm:$0xff]  ;;  %v3130_v22 = vld [vmem:[%s3480_s30 + $0x80] sm:$0xff] }
  0x44   : > { %v3139_v19 = vld [vmem:[%s3480_s30 + $0xc8] sm:$0xff]  ;;  %v3160_v21 = vld [vmem:[%s3480_s30 + $0x170] sm:$0xff]  ;;  %v3138_v23 = vld [vmem:[%s3480_s30 + $0xc0] sm:$0xff] }
  0x45   : > { %2567 = vmatmul.msk.bf16.vlgmr.msrb.gmra.mxu0 %vm551_vm1, %v3510_v17  ;;  %2568 = vmatmul.msk.bf16.vlgmr.msrb.gmra.mxu1 %vm551_vm1, %v3510_v17  ;;  %v3169_v24 = vld [vmem:[%s3480_s30 + $0x1b8] sm:$0xff]  ;;  %v3151_v26 = vld [vmem:[%s3480_s30 + $0x128] sm:$0xff]  ;;  %v3168_v28 = vld [vmem:[%s3480_s30 + $0x1b0] sm:$0xff] }
  0x46   : > { %2569 = vmatmul.msk.bf16.vlgmr.msrb.gmra.mxu2 %vm551_vm1, %v3510_v17  ;;  %730 = vmatpush.bf16.msrb.mxu0 %v2550_v49  ;;  %v3177_v25 = vld [vmem:[%s3480_s30 + $0x1f8] sm:$0xff]  ;;  %v3159_v27 = vld [vmem:[%s3480_s30 + $0x168] sm:$0xff]  ;;  %v3176_v29 = vld [vmem:[%s3480_s30 + $0x1f0] sm:$0xff] }
  0x47   : > { %2570 = vmatmul.msk.bf16.vlgmr.msrb.gmra.mxu3 %vm551_vm1, %v3510_v17  ;;  %758 = vmatpush.bf16.msrb.mxu2 %v2558_v48  ;;  %v3150_v30 = vld [vmem:[%s3480_s30 + $0x120] sm:$0xff]  ;;  %v3167_v32 = vld [vmem:[%s3480_s30 + $0x1a8] sm:$0xff]  ;;  %v3149_v34 = vld [vmem:[%s3480_s30 + $0x118] sm:$0xff] }
  0x48   : > { %744 = vmatpush.bf16.msrb.mxu1 %v2554_v50  ;;  %772 = vmatpush.bf16.msrb.mxu3 %v2562_v51  ;;  %v3158_v31 = vld [vmem:[%s3480_s30 + $0x160] sm:$0xff]  ;;  %v3175_v33 = vld [vmem:[%s3480_s30 + $0x1e8] sm:$0xff]  ;;  %v3157_v35 = vld [vmem:[%s3480_s30 + $0x158] sm:$0xff] }
  0x49   : > { %v3615_v36 = vld [vmem:[%s3473_s26] sm:$0xff]  ;;  %v3148_v44 = vld [vmem:[%s3480_s30 + $0x110] sm:$0xff]  ;;  %v3165_v48 = vld [vmem:[%s3480_s30 + $0x198] sm:$0xff] }
  0x4a   : > { %v439_v37 = vperm.slane %v3615_v36, 0  ;;  %v440_v38 = vperm.slane %v3615_v36, 1  ;;  %v3166_v39 = vld [vmem:[%s3480_s30 + $0x1a0] sm:$0xff]  ;;  %v3156_v45 = vld [vmem:[%s3480_s30 + $0x150] sm:$0xff]  ;;  %v3173_v49 = vld [vmem:[%s3480_s30 + $0x1d8] sm:$0xff]  ;;  %v441_v51 = vperm.slane %v3615_v36, 2 }
  0x4b   : > { %v3174_v40 = vld [vmem:[%s3480_s30 + $0x1e0] sm:$0xff] }
  0x55   : > { %2571 = vmatmul.msk.bf16.vlgmr.msra.gmra.mxu0 %vm551_vm1, %v3510_v17  ;;  %2572 = vmatmul.msk.bf16.vlgmr.msra.gmra.mxu1 %vm551_vm1, %v3510_v17 }
  0x56   : > { %2573 = vmatmul.msk.bf16.vlgmr.msra.gmra.mxu2 %vm551_vm1, %v3510_v17  ;;  %2111 = vmatpush.bf16.msra.mxu0 %v3121_v52 }
  0x57   : > { %2574 = vmatmul.msk.bf16.vlgmr.msra.gmra.mxu3 %vm551_vm1, %v3510_v17  ;;  %2125 = vmatpush.bf16.msra.mxu1 %v3129_v53  ;;  %v442_v53 = vperm.slane %v3615_v36, 3 }
  0x58   : > { %2139 = vmatpush.bf16.msra.mxu2 %v3137_v54  ;;  %2153 = vmatpush.bf16.msra.mxu3 %v3145_v55  ;;  %v3147_v54 = vld [vmem:[%s3480_s30 + $0x108] sm:$0xff] }
  0x59   : > { %v3155_v55 = vld [vmem:[%s3480_s30 + $0x148] sm:$0xff] }
  0x5a   : > { %2112 = vmatpush.bf16.msra.mxu0 %v3120_v56 }
  0x5b   : > { %2126 = vmatpush.bf16.msra.mxu1 %v3128_v57 }
  0x5c   : > { %2140 = vmatpush.bf16.msra.mxu2 %v3136_v58  ;;  %2154 = vmatpush.bf16.msra.mxu3 %v3144_v59  ;;  %v3164_v59 = vld [vmem:[%s3480_s30 + $0x190] sm:$0xff] }
  0x5e   : > { %2113 = vmatpush.bf16.msra.mxu0 %v3119_v60  ;;  %v3172_v60 = vld [vmem:[%s3480_s30 + $0x1d0] sm:$0xff] }
  0x5f   : > { %2127 = vmatpush.bf16.msra.mxu1 %v3127_v61 }
  0x60   : > { %2141 = vmatpush.bf16.msra.mxu2 %v3135_v62  ;;  %2155 = vmatpush.bf16.msra.mxu3 %v3143_v63 }
  0x62   : > { %2114 = vmatpush.bf16.msra.mxu0 %v3118_v0 }
  0x63   : > { %2128 = vmatpush.bf16.msra.mxu1 %v3126_v1 }
  0x64   : > { %2142 = vmatpush.bf16.msra.mxu2 %v3134_v2  ;;  %2156 = vmatpush.bf16.msra.mxu3 %v3142_v3 }
  0x65   : > { %2575 = vmatmul.msk.bf16.vlgmr.msrb.gmra.mxu0 %vm551_vm1, %v3510_v17  ;;  %2576 = vmatmul.msk.bf16.vlgmr.msrb.gmra.mxu1 %vm551_vm1, %v3510_v17 }
  0x66   : > { %2577 = vmatmul.msk.bf16.vlgmr.msrb.gmra.mxu2 %vm551_vm1, %v3510_v17  ;;  %2115 = vmatpush.bf16.msra.mxu0 %v3117_v4 }
  0x67   : > { %2578 = vmatmul.msk.bf16.vlgmr.msrb.gmra.mxu3 %vm551_vm1, %v3510_v17  ;;  %2129 = vmatpush.bf16.msra.mxu1 %v3125_v5  ;;  %v3161_v17 = vld [vmem:[%s3480_s30 + $0x178] sm:$0xff]  ;;  %v3146_v5 = vld [vmem:[%s3480_s30 + $0x100] sm:$0xff] }
  0x68   : > { %2143 = vmatpush.bf16.msra.mxu2 %v3133_v8  ;;  %2157 = vmatpush.bf16.msra.mxu3 %v3141_v9 }
  0x6a   : > { %2116 = vmatpush.bf16.msra.mxu0 %v3116_v6  ;;  %v3154_v6 = vld [vmem:[%s3480_s30 + $0x140] sm:$0xff] }
  0x6b   : > { %2130 = vmatpush.bf16.msra.mxu1 %v3124_v7 }
  0x6c   : > { %2144 = vmatpush.bf16.msra.mxu2 %v3132_v12  ;;  %2158 = vmatpush.bf16.msra.mxu3 %v3140_v13 }
  0x6e   : > { %2117 = vmatpush.bf16.msra.mxu0 %v3115_v10 }
  0x6f   : > { %2131 = vmatpush.bf16.msra.mxu1 %v3123_v11 }
  0x70   : > { %2145 = vmatpush.bf16.msra.mxu2 %v3131_v18  ;;  %2159 = vmatpush.bf16.msra.mxu3 %v3139_v19  ;;  %v443_v18 = vperm.slane %v3615_v36, 4 }
  0x72   : > { %2118 = vmatpush.bf16.msra.mxu0 %v3114_v14 }
  0x73   : > { %2132 = vmatpush.bf16.msra.mxu1 %v3122_v15 }
  0x74   : > { %2146 = vmatpush.bf16.msra.mxu2 %v3130_v22  ;;  %2160 = vmatpush.bf16.msra.mxu3 %v3138_v23 }
  0x76   : > { %2167 = vmatpush.bf16.msrb.mxu0 %v3153_v16 }
  0x77   : > { %2181 = vmatpush.bf16.msrb.mxu1 %v3161_v17 }
  0x78   : > { %2195 = vmatpush.bf16.msrb.mxu2 %v3169_v24  ;;  %2209 = vmatpush.bf16.msrb.mxu3 %v3177_v25  ;;  %v3163_v25 = vld [vmem:[%s3480_s30 + $0x188] sm:$0xff] }
  0x7a   : > { %2168 = vmatpush.bf16.msrb.mxu0 %v3152_v20 }
  0x7b   : > { %2182 = vmatpush.bf16.msrb.mxu1 %v3160_v21  ;;  %v444_v21 = vperm.slane %v3615_v36, 5 }
  0x7c   : > { %2196 = vmatpush.bf16.msrb.mxu2 %v3168_v28  ;;  %2210 = vmatpush.bf16.msrb.mxu3 %v3176_v29 }
  0x7e   : > { %2169 = vmatpush.bf16.msrb.mxu0 %v3151_v26  ;;  %v3171_v26 = vld [vmem:[%s3480_s30 + $0x1c8] sm:$0xff] }
  0x7f   : > { %2183 = vmatpush.bf16.msrb.mxu1 %v3159_v27 }
  0x80   : > { %2197 = vmatpush.bf16.msrb.mxu2 %v3167_v32  ;;  %2211 = vmatpush.bf16.msrb.mxu3 %v3175_v33 }
  0x82   : > { %2170 = vmatpush.bf16.msrb.mxu0 %v3150_v30 }
  0x83   : > { %2184 = vmatpush.bf16.msrb.mxu1 %v3158_v31 }
  0x84   : > { %2198 = vmatpush.bf16.msrb.mxu2 %v3166_v39  ;;  %2212 = vmatpush.bf16.msrb.mxu3 %v3174_v40 }
  0x86   : > { %2171 = vmatpush.bf16.msrb.mxu0 %v3149_v34 }
  0x87   : > { %2185 = vmatpush.bf16.msrb.mxu1 %v3157_v35 }
  0x88   : > { %2199 = vmatpush.bf16.msrb.mxu2 %v3165_v48  ;;  %2213 = vmatpush.bf16.msrb.mxu3 %v3173_v49  ;;  %v3170_v48 = vld [vmem:[%s3480_s30 + $0x1c0] sm:$0xff] }
  0x8a   : > { %2172 = vmatpush.bf16.msrb.mxu0 %v3148_v44 }
  0x8b   : > { %2186 = vmatpush.bf16.msrb.mxu1 %v3156_v45 }
  0x8c   : > { %2200 = vmatpush.bf16.msrb.mxu2 %v3164_v59  ;;  %2214 = vmatpush.bf16.msrb.mxu3 %v3172_v60 }
  0x8e   : > { %2173 = vmatpush.bf16.msrb.mxu0 %v3147_v54 }
  0x8f   : > { %2187 = vmatpush.bf16.msrb.mxu1 %v3155_v55 }
  0x90   : > { %2201 = vmatpush.bf16.msrb.mxu2 %v3163_v25  ;;  %2215 = vmatpush.bf16.msrb.mxu3 %v3171_v26 }
  0x92   : > { %2174 = vmatpush.bf16.msrb.mxu0 %v3146_v5 }
  0x93   : > { %2188 = vmatpush.bf16.msrb.mxu1 %v3154_v6 }
  0x94   : > { %2216 = vmatpush.bf16.msrb.mxu3 %v3170_v48 }
  0xb2   : > { %v564_v41 = vpop.f32.mrf.mxu0  ;;  %v578_v43 = vpop.f32.mrf.mxu1 }
  0xb3   : > { %v3621_v42 = vadd.f32 %v564_v41, %v439_v37  ;;  %v3625_v46 = vadd.f32 %v578_v43, %v440_v38 }
  0xb5   : > { %v779_v47 = vmul.f32 %v3621_v42, %v3621_v42  ;;  %v780_v50 = vmul.f32 %v3625_v46, %v3625_v46 }
  0xb7   : > { %v811_v52 = vmul.f32 %v779_v47, %v3621_v42  ;;  %v812_v56 = vmul.f32 %v780_v50, %v3625_v46  ;;  %v3162_v47 = vld [vmem:[%s3480_s30 + $0x180] sm:$0xff] }
  0xb8   : > { %2202 = vmatpush.bf16.msrb.mxu2 %v3162_v47 }
  0xb9   : > { %v843_v57 = vmul.f32 0.044715, %v811_v52  ;;  %v592_v58 = vpop.f32.mrf.mxu2  ;;  %v844_v61 = vmul.f32 0.044715, %v812_v56  ;;  %v446_v56 = vperm.slane %v3615_v36, 7 }
  0xba   : > { %v3641_v62 = vadd.f32 %v592_v58, %v441_v51  ;;  %v606_v63 = vpop.f32.mrf.mxu3  ;;  %v566_v0 = vpop.f32.mrf.mxu0 }
  0xbb   : > { %v875_v1 = vadd.f32 %v843_v57, %v3621_v42  ;;  %v3644_v2 = vadd.f32 %v606_v63, %v442_v53  ;;  %v3646_v3 = vadd.f32 %v566_v0, %v439_v37  ;;  %v580_v4 = vpop.f32.mrf.mxu1  ;;  %v876_v7 = vadd.f32 %v844_v61, %v3625_v46 }
  0xbc   : > { %v781_v8 = vmul.f32 %v3641_v62, %v3641_v62  ;;  %v3653_v9 = vadd.f32 %v580_v4, %v440_v38 }
  0xbd   : > { %v907_v10 = vmul.f32 0.7978846, %v875_v1  ;;  %v782_v11 = vmul.f32 %v3644_v2, %v3644_v2  ;;  %v795_v12 = vmul.f32 %v3646_v3, %v3646_v3  ;;  %v908_v13 = vmul.f32 0.7978846, %v876_v7 }
  0xbe   : > { %v813_v14 = vmul.f32 %v781_v8, %v3641_v62  ;;  %v796_v15 = vmul.f32 %v3653_v9, %v3653_v9 }
  0xbf   : > { %v814_v16 = vmul.f32 %v782_v11, %v3644_v2  ;;  %v827_v17 = vmul.f32 %v795_v12, %v3646_v3  ;;  %3272 = vtanh.f32 %v907_v10 }
  0xc0   : > { %v845_v19 = vmul.f32 0.044715, %v813_v14  ;;  %v828_v20 = vmul.f32 %v796_v15, %v3653_v9  ;;  %3274 = vtanh.f32 %v908_v13 }
  0xc1   : > { %v846_v22 = vmul.f32 0.044715, %v814_v16  ;;  %v859_v23 = vmul.f32 0.044715, %v827_v17  ;;  %v594_v24 = vpop.f32.mrf.mxu2 }
  0xc2   : > { %v877_v27 = vadd.f32 %v845_v19, %v3641_v62  ;;  %v860_v28 = vmul.f32 0.044715, %v828_v20  ;;  %v3670_v29 = vadd.f32 %v594_v24, %v441_v51  ;;  %v608_v30 = vpop.f32.mrf.mxu3  ;;  %v620_v31 = vpop.f32.mrf.mxu0 }
  0xc3   : > { %v878_v32 = vadd.f32 %v846_v22, %v3644_v2  ;;  %v891_v33 = vadd.f32 %v859_v23, %v3646_v3  ;;  %v3674_v34 = vadd.f32 %v608_v30, %v442_v53  ;;  %v3678_v35 = vadd.f32 %v620_v31, %v443_v18  ;;  %v634_v37 = vpop.f32.mrf.mxu1  ;;  %v3715_v22 = vld [vmem:[%s3473_s26 + $0x8] sm:$0xff] }
  0xc4   : > { %v909_v38 = vmul.f32 0.7978846, %v877_v27  ;;  %v892_v39 = vadd.f32 %v860_v28, %v3653_v9  ;;  %v797_v40 = vmul.f32 %v3670_v29, %v3670_v29  ;;  %v3685_v41 = vadd.f32 %v634_v37, %v444_v21 }
  0xc5   : > { %v923_v43 = vmul.f32 0.7978846, %v891_v33  ;;  %v798_v44 = vmul.f32 %v3674_v34, %v3674_v34  ;;  %v783_v45 = vmul.f32 %v3678_v35, %v3678_v35  ;;  %v3273_v49 = vpop.eup %3272  ;;  %v910_v50 = vmul.f32 0.7978846, %v878_v32 }
  0xc6   : > { %v924_v51 = vmul.f32 0.7978846, %v892_v39  ;;  %v829_v52 = vmul.f32 %v797_v40, %v3670_v29  ;;  %v445_v53 = vperm.slane %v3615_v36, 6  ;;  %3276 = vtanh.f32 %v909_v38  ;;  %v3275_v57 = vpop.eup %3274 }
  0xc7   : > { %v830_v54 = vmul.f32 %v798_v44, %v3674_v34  ;;  %v815_v55 = vmul.f32 %v783_v45, %v3678_v35  ;;  %3278 = vtanh.f32 %v923_v43  ;;  %v784_v59 = vmul.f32 %v3685_v41, %v3685_v41 }
  0xc8   : > { %v861_v58 = vmul.f32 0.044715, %v829_v52  ;;  %v971_v60 = vadd.f32 1.0, %v3273_v49  ;;  %3280 = vtanh.f32 %v924_v51  ;;  %v972_v17 = vadd.f32 1.0, %v3275_v57 }
  0xc9   : > { %v862_v61 = vmul.f32 0.044715, %v830_v54  ;;  %v847_v63 = vmul.f32 0.044715, %v815_v55  ;;  %v648_v0 = vpop.f32.mrf.mxu2  ;;  %3282 = vtanh.f32 %v910_v50  ;;  %v816_v4 = vmul.f32 %v784_v59, %v3685_v41 }
  0xca   : > { %v893_v1 = vadd.f32 %v861_v58, %v3670_v29  ;;  %v3704_v5 = vadd.f32 %v648_v0, %v445_v53  ;;  %v662_v6 = vpop.f32.mrf.mxu3  ;;  %v622_v10 = vpop.f32.mrf.mxu0  ;;  %v1003_v16 = vmul.f32 0.5, %v971_v60  ;;  %v447_v33 = vperm.slane %v3715_v22, 0 }
  0xcb   : > { %v894_v7 = vadd.f32 %v862_v61, %v3674_v34  ;;  %v3707_v8 = vadd.f32 %v662_v6, %v446_v56  ;;  %v879_v12 = vadd.f32 %v847_v63, %v3678_v35  ;;  %v848_v13 = vmul.f32 0.044715, %v816_v4  ;;  %v636_v27 = vpop.f32.mrf.mxu1 }
  0xcc   : > { %v925_v11 = vmul.f32 0.7978846, %v893_v1  ;;  %v785_v14 = vmul.f32 %v3704_v5, %v3704_v5  ;;  %v3277_v15 = vpop.eup %3276  ;;  %v3721_v26 = vadd.f32 %v622_v10, %v443_v18  ;;  %v448_v37 = vperm.slane %v3715_v22, 1 }
  0xcd   : > { %v926_v19 = vmul.f32 0.7978846, %v894_v7  ;;  %v786_v20 = vmul.f32 %v3707_v8, %v3707_v8  ;;  %v3279_v23 = vpop.eup %3278  ;;  %v880_v24 = vadd.f32 %v848_v13, %v3685_v41  ;;  %v911_v32 = vmul.f32 0.7978846, %v879_v12 }
  0xce   : > { %3284 = vtanh.f32 %v925_v11  ;;  %v817_v25 = vmul.f32 %v785_v14, %v3704_v5  ;;  %v3281_v28 = vpop.eup %3280  ;;  %v987_v38 = vadd.f32 1.0, %v3279_v23  ;;  %v3727_v44 = vmul.f32 %v1003_v16, %v3621_v42 }
  0xcf   : > { %v818_v30 = vmul.f32 %v786_v20, %v3707_v8  ;;  %v3283_v31 = vpop.eup %3282  ;;  %v988_v39 = vadd.f32 1.0, %v3281_v28  ;;  %3286 = vtanh.f32 %v926_v19  ;;  %v1004_v18 = vmul.f32 0.5, %v972_v17 }
  0xd0   : > { %v849_v40 = vmul.f32 0.044715, %v817_v25  ;;  %v912_v45 = vmul.f32 0.7978846, %v880_v24  ;;  %v799_v47 = vmul.f32 %v3721_v26, %v3721_v26  ;;  %v973_v49 = vadd.f32 1.0, %v3277_v15 }
  0xd1   : > { %v650_v43 = vpop.f32.mrf.mxu2  ;;  %v974_v50 = vadd.f32 1.0, %v3283_v31  ;;  %v850_v51 = vmul.f32 0.044715, %v818_v30  ;;  %v3733_v52 = vadd.f32 %v636_v27, %v444_v21  ;;  %3288 = vtanh.f32 %v911_v32 }
  0xd2   : > { %v664_v48 = vpop.f32.mrf.mxu3  ;;  %v831_v55 = vmul.f32 %v799_v47, %v3721_v26  ;;  %v3738_v42 = vadd.f32 %v650_v43, %v445_v53  ;;  %v1019_v58 = vmul.f32 0.5, %v987_v38  ;;  %v1020_v59 = vmul.f32 0.5, %v988_v39  ;;  %v676_v63 = vpop.f32.mrf.mxu0  ;;  %v3185_v38 = vld [vmem:[%s3480_s30 + $0x238] sm:$0xff] }
  0xd3   : > { %v3740_v57 = vadd.f32 %v664_v48, %v446_v56  ;;  %v881_v60 = vadd.f32 %v849_v40, %v3704_v5  ;;  %v800_v61 = vmul.f32 %v3733_v52, %v3733_v52  ;;  %3290 = vtanh.f32 %v912_v45  ;;  %v690_v13 = vpop.f32.mrf.mxu1 }
  0xd4   : > { %v3285_v54 = vpop.eup %3284  ;;  %v863_v21 = vmul.f32 0.044715, %v831_v55  ;;  %v801_v0 = vmul.f32 %v3738_v42, %v3738_v42  ;;  %v1036_v56 = vmul.f32 %v1004_v18, %v3625_v46  ;;  %v882_v4 = vadd.f32 %v850_v51, %v3707_v8 }
  0xd5   : > { %v802_v36 = vmul.f32 %v3740_v57, %v3740_v57  ;;  %v3287_v53 = vpop.eup %3286  ;;  %v989_v1 = vadd.f32 1.0, %v3285_v54  ;;  %v832_v6 = vmul.f32 %v800_v61, %v3733_v52  ;;  %v1005_v7 = vmul.f32 0.5, %v973_v49  ;;  %v3193_v49 = vld [vmem:[%s3480_s30 + $0x278] sm:$0xff] }
  0xd6   : > { %v3752_v10 = vmul.f32 0.5, %v974_v50  ;;  %v895_v11 = vadd.f32 %v863_v21, %v3721_v26  ;;  %v833_v12 = vmul.f32 %v801_v0, %v3738_v42  ;;  %v1051_v14 = vmul.f32 %v1019_v58, %v3646_v3 }
  0xd7   : > { %v1052_v15 = vmul.f32 %v1020_v59, %v3653_v9  ;;  %v913_v16 = vmul.f32 0.7978846, %v881_v60  ;;  %v864_v46 = vmul.f32 0.044715, %v832_v6  ;;  %v3289_v17 = vpop.eup %3288  ;;  %v990_v19 = vadd.f32 1.0, %v3287_v53 }
  0xd8   : > { %v927_v20 = vmul.f32 0.7978846, %v895_v11  ;;  %v865_v23 = vmul.f32 0.044715, %v833_v12  ;;  %v834_v24 = vmul.f32 %v802_v36, %v3740_v57  ;;  %v1021_v25 = vmul.f32 0.5, %v989_v1  ;;  %v3192_v11 = vld [vmem:[%s3480_s30 + $0x270] sm:$0xff] }
  0xd9   : > { %v914_v27 = vmul.f32 0.7978846, %v882_v4  ;;  %v896_v28 = vadd.f32 %v864_v46, %v3733_v52  ;;  %v3762_v30 = vadd.f32 %v676_v63, %v447_v33  ;;  %v3291_v3 = vpop.eup %3290  ;;  %v3767_v32 = vadd.f32 %v690_v13, %v448_v37  ;;  %v704_v50 = vpop.f32.mrf.mxu2  ;;  %v3184_v63 = vld [vmem:[%s3480_s30 + $0x230] sm:$0xff] }
  0xda   : > { %3292 = vtanh.f32 %v927_v20  ;;  %v897_v9 = vadd.f32 %v865_v23, %v3738_v42  ;;  %v866_v31 = vmul.f32 0.044715, %v834_v24  ;;  %v975_v39 = vadd.f32 1.0, %v3289_v17  ;;  %v718_v58 = vpop.f32.mrf.mxu3  ;;  %v678_v59 = vpop.f32.mrf.mxu0  ;;  %v3183_v17 = vld [vmem:[%s3480_s30 + $0x228] sm:$0xff] }
  0xdb   : > { %v928_v40 = vmul.f32 0.7978846, %v896_v28  ;;  %v787_v43 = vmul.f32 %v3762_v30, %v3762_v30  ;;  %v1067_v18 = vpack.c.bf16 %v1051_v14, %v3727_v44  ;;  %v1022_v45 = vmul.f32 0.5, %v990_v19 }
  0xdc   : > { %3294 = vtanh.f32 %v913_v16  ;;  %v898_v47 = vadd.f32 %v866_v31, %v3740_v57  ;;  %v788_v48 = vmul.f32 %v3767_v32, %v3767_v32  ;;  %v976_v51 = vadd.f32 1.0, %v3291_v3  ;;  %v3191_v31 = vld [vmem:[%s3480_s30 + $0x268] sm:$0xff] }
  0xdd   : > { %3296 = vtanh.f32 %v928_v40  ;;  %v819_v54 = vmul.f32 %v787_v43, %v3762_v30  ;;  %2119 = vmatmul.bf16.vlgmr.msra.gmra.mxu0 %v1067_v18  ;;  %v1068_v55 = vpack.c.bf16 %v1052_v15, %v1036_v56  ;;  %v1037_v44 = vmul.f32 %v1005_v7, %v3641_v62  ;;  %v692_v7 = vpop.f32.mrf.mxu1 }
  0xde   : > { %3298 = vtanh.f32 %v914_v27  ;;  %v929_v60 = vmul.f32 0.7978846, %v897_v9  ;;  %v820_v61 = vmul.f32 %v788_v48, %v3767_v32  ;;  %2223 = vmatpush.bf16.msra.mxu0 %v3185_v38  ;;  %v1053_v21 = vmul.f32 %v1021_v25, %v3670_v29 }
  0xdf   : > { %v851_v0 = vmul.f32 0.044715, %v819_v54  ;;  %2133 = vmatmul.bf16.vlgmr.msra.gmra.mxu1 %v1068_v55  ;;  %v449_v36 = vperm.slane %v3715_v22, 2  ;;  %v450_v53 = vperm.slane %v3715_v22, 3  ;;  %v1007_v1 = vmul.f32 0.5, %v975_v39  ;;  %v3182_v55 = vld [vmem:[%s3480_s30 + $0x220] sm:$0xff] }
  0xe0   : > { %v3293_v56 = vpop.eup %3292  ;;  %v930_v4 = vmul.f32 0.7978846, %v898_v47  ;;  %v852_v62 = vmul.f32 0.044715, %v820_v61  ;;  %2237 = vmatpush.bf16.msra.mxu1 %v3193_v49  ;;  %v3786_v6 = vadd.f32 %v678_v59, %v447_v33  ;;  %v1054_v29 = vmul.f32 %v1022_v45, %v3674_v34  ;;  %v3201_v34 = vld [vmem:[%s3480_s30 + $0x2b8] sm:$0xff] }
  0xe1   : > { %v1008_v12 = vmul.f32 0.5, %v976_v51  ;;  %v883_v13 = vadd.f32 %v851_v0, %v3762_v30  ;;  %v3793_v14 = vadd.f32 %v704_v50, %v449_v36  ;;  %3300 = vtanh.f32 %v929_v60  ;;  %v3209_v51 = vld [vmem:[%s3480_s30 + $0x2f8] sm:$0xff]  ;;  %v706_v54 = vpop.f32.mrf.mxu2  ;;  %v3190_v60 = vld [vmem:[%s3480_s30 + $0x260] sm:$0xff] }
  0xe2   : > { %v3295_v15 = vpop.eup %3294  ;;  %v884_v16 = vadd.f32 %v852_v62, %v3767_v32  ;;  %v3798_v46 = vadd.f32 %v718_v58, %v450_v53  ;;  %v803_v33 = vmul.f32 %v3786_v6, %v3786_v6  ;;  %2224 = vmatpush.bf16.msra.mxu0 %v3184_v63  ;;  %v991_v20 = vadd.f32 1.0, %v3293_v56 }
  0xe3   : > { %v3297_v19 = vpop.eup %3296  ;;  %v789_v23 = vmul.f32 %v3793_v14, %v3793_v14  ;;  %v3808_v24 = vadd.f32 %v692_v7, %v448_v37  ;;  %v1069_v25 = vpack.c.bf16 %v1053_v21, %v1037_v44  ;;  %3302 = vtanh.f32 %v930_v4  ;;  %v3208_v7 = vld [vmem:[%s3480_s30 + $0x2f0] sm:$0xff] }
  0xe4   : > { %v3299_v27 = vpop.eup %3298  ;;  %v915_v28 = vmul.f32 0.7978846, %v883_v13  ;;  %v790_v3 = vmul.f32 %v3798_v46, %v3798_v46  ;;  %v835_v9 = vmul.f32 %v803_v33, %v3786_v6  ;;  %2238 = vmatpush.bf16.msra.mxu1 %v3192_v11  ;;  %v1038_v38 = vmul.f32 %v3752_v10, %v3644_v2  ;;  %v3200_v2 = vld [vmem:[%s3480_s30 + $0x2b0] sm:$0xff]  ;;  %v3199_v11 = vld [vmem:[%s3480_s30 + $0x2a8] sm:$0xff]  ;;  %v732_v33 = vpop.f32.mrf.mxu0 }
  0xe5   : > { %v992_v39 = vadd.f32 1.0, %v3297_v19  ;;  %v916_v40 = vmul.f32 0.7978846, %v884_v16  ;;  %v821_v37 = vmul.f32 %v789_v23, %v3793_v14  ;;  %2147 = vmatmul.bf16.vlgmr.msra.gmra.mxu2 %v1069_v25  ;;  %v3818_v43 = vmul.f32 %v1007_v1, %v3678_v35  ;;  %v720_v35 = vpop.f32.mrf.mxu3  ;;  %v3189_v19 = vld [vmem:[%s3480_s30 + $0x258] sm:$0xff] }
  0xe6   : > { %v3821_v18 = vmul.f32 %v1008_v12, %v3685_v41  ;;  %v822_v45 = vmul.f32 %v790_v3, %v3798_v46  ;;  %v867_v47 = vmul.f32 0.044715, %v835_v9  ;;  %2251 = vmatpush.bf16.msra.mxu2 %v3201_v34  ;;  %2225 = vmatpush.bf16.msra.mxu0 %v3183_v17  ;;  %v977_v10 = vadd.f32 1.0, %v3295_v15 }
  0xe7   : > { %v1023_v48 = vmul.f32 0.5, %v991_v20  ;;  %v853_v49 = vmul.f32 0.044715, %v821_v37  ;;  %v804_v50 = vmul.f32 %v3808_v24, %v3808_v24  ;;  %v3301_v58 = vpop.eup %3300  ;;  %3304 = vtanh.f32 %v915_v28  ;;  %v746_v28 = vpop.f32.mrf.mxu1 }
  0xe8   : > { %v854_v41 = vmul.f32 0.044715, %v822_v45  ;;  %v899_v59 = vadd.f32 %v867_v47, %v3786_v6  ;;  %v1070_v44 = vpack.c.bf16 %v1054_v29, %v1038_v38  ;;  %2239 = vmatpush.bf16.msra.mxu1 %v3191_v31  ;;  %v1024_v61 = vmul.f32 0.5, %v992_v39  ;;  %v3181_v29 = vld [vmem:[%s3480_s30 + $0x218] sm:$0xff]  ;;  %v3198_v38 = vld [vmem:[%s3480_s30 + $0x2a0] sm:$0xff]  ;;  %v3207_v47 = vld [vmem:[%s3480_s30 + $0x2e8] sm:$0xff] }
  0xe9   : > { %3306 = vtanh.f32 %v916_v40  ;;  %v885_v63 = vadd.f32 %v853_v49, %v3793_v14  ;;  %v836_v21 = vmul.f32 %v804_v50, %v3808_v24  ;;  %v3303_v0 = vpop.eup %3302  ;;  %v3836_v4 = vadd.f32 %v706_v54, %v449_v36  ;;  %v760_v54 = vpop.f32.mrf.mxu2 }
  0xea   : > { %v886_v56 = vadd.f32 %v854_v41, %v3798_v46  ;;  %v931_v1 = vmul.f32 0.7978846, %v899_v59  ;;  %2161 = vmatmul.bf16.vlgmr.msra.gmra.mxu3 %v1070_v44  ;;  %v3840_v62 = vadd.f32 %v720_v35, %v450_v53  ;;  %2252 = vmatpush.bf16.msra.mxu2 %v3200_v2  ;;  %v978_v12 = vadd.f32 1.0, %v3299_v27  ;;  %v3188_v35 = vld [vmem:[%s3480_s30 + $0x250] sm:$0xff]  ;;  %v3197_v44 = vld [vmem:[%s3480_s30 + $0x298] sm:$0xff] }
  0xeb   : > { %v917_v13 = vmul.f32 0.7978846, %v885_v63  ;;  %v868_v15 = vmul.f32 0.044715, %v836_v21  ;;  %2265 = vmatpush.bf16.msra.mxu3 %v3209_v51  ;;  %v451_v16 = vperm.slane %v3715_v22, 4  ;;  %2226 = vmatpush.bf16.msra.mxu0 %v3182_v55  ;;  %v3846_v34 = vmul.f32 0.5, %v977_v10 }
  0xec   : > { %v1055_v36 = vmul.f32 %v1023_v48, %v3721_v26  ;;  %v918_v53 = vmul.f32 0.7978846, %v886_v56  ;;  %v805_v17 = vmul.f32 %v3836_v4, %v3836_v4  ;;  %2240 = vmatpush.bf16.msra.mxu1 %v3190_v60  ;;  %v993_v20 = vadd.f32 1.0, %v3301_v58  ;;  %v3179_v56 = vld [vmem:[%s3480_s30 + $0x208] sm:$0xff] }
  0xed   : > { %v994_v23 = vadd.f32 1.0, %v3303_v0  ;;  %v900_v25 = vadd.f32 %v868_v15, %v3808_v24  ;;  %v806_v27 = vmul.f32 %v3840_v62, %v3840_v62  ;;  %v3305_v3 = vpop.eup %3304  ;;  %v1056_v26 = vmul.f32 %v1024_v61, %v3733_v52  ;;  %v3180_v52 = vld [vmem:[%s3480_s30 + $0x210] sm:$0xff]  ;;  %v774_v59 = vpop.f32.mrf.mxu3  ;;  %v3206_v0 = vld [vmem:[%s3480_s30 + $0x2e0] sm:$0xff] }
  0xee   : > { %3308 = vtanh.f32 %v931_v1  ;;  %v837_v9 = vmul.f32 %v805_v17, %v3836_v4  ;;  %v3859_v31 = vadd.f32 %v732_v33, %v451_v16  ;;  %2253 = vmatpush.bf16.msra.mxu2 %v3199_v11  ;;  %v452_v45 = vperm.slane %v3715_v22, 5 }
  0xef   : > { %v3307_v39 = vpop.eup %3306  ;;  %3310 = vtanh.f32 %v917_v13  ;;  %v932_v40 = vmul.f32 0.7978846, %v900_v25  ;;  %v838_v37 = vmul.f32 %v806_v27, %v3840_v62  ;;  %2266 = vmatpush.bf16.msra.mxu3 %v3208_v7  ;;  %2227 = vmatpush.bf16.msra.mxu0 %v3181_v29  ;;  %v1071_v48 = vpack.c.bf16 %v1055_v36, %v3818_v43  ;;  %v3187_v36 = vld [vmem:[%s3480_s30 + $0x248] sm:$0xff] }
  0xf0   : > { %3312 = vtanh.f32 %v918_v53  ;;  %v869_v2 = vmul.f32 0.044715, %v837_v9  ;;  %v791_v10 = vmul.f32 %v3859_v31, %v3859_v31  ;;  %2241 = vmatpush.bf16.msra.mxu1 %v3189_v19  ;;  %v979_v49 = vadd.f32 1.0, %v3305_v3  ;;  %v3205_v9 = vld [vmem:[%s3480_s30 + $0x2d8] sm:$0xff] }
  0xf1   : > { %3314 = vtanh.f32 %v932_v40  ;;  %v870_v50 = vmul.f32 0.044715, %v838_v37  ;;  %v3871_v51 = vadd.f32 %v746_v28, %v452_v45  ;;  %v980_v55 = vadd.f32 1.0, %v3307_v39  ;;  %2175 = vmatmul.bf16.vlgmr.msrb.gmra.mxu0 %v1071_v48  ;;  %v3217_v40 = vld [vmem:[%s3480_s30 + $0x338] sm:$0xff] }
  0xf2   : > { %v901_v58 = vadd.f32 %v869_v2, %v3836_v4  ;;  %v1072_v41 = vpack.c.bf16 %v1056_v26, %v3821_v18  ;;  %v453_v43 = vperm.slane %v3715_v22, 6  ;;  %2254 = vmatpush.bf16.msra.mxu2 %v3198_v38  ;;  %v1010_v60 = vmul.f32 0.5, %v978_v12  ;;  %v748_v26 = vpop.f32.mrf.mxu1  ;;  %v3178_v38 = vld [vmem:[%s3480_s30 + $0x200] sm:$0xff] }
  0xf3   : > { %v1025_v61 = vmul.f32 0.5, %v993_v20  ;;  %v902_v63 = vadd.f32 %v870_v50, %v3840_v62  ;;  %v823_v21 = vmul.f32 %v791_v10, %v3859_v31  ;;  %2267 = vmatpush.bf16.msra.mxu3 %v3207_v47  ;;  %2228 = vmatpush.bf16.msra.mxu0 %v3180_v52  ;;  %v1026_v7 = vmul.f32 0.5, %v994_v23  ;;  %v734_v20 = vpop.f32.mrf.mxu0  ;;  %v3196_v23 = vld [vmem:[%s3480_s30 + $0x290] sm:$0xff] }
  0xf4   : > { %v3309_v1 = vpop.eup %3308  ;;  %v933_v11 = vmul.f32 0.7978846, %v901_v58  ;;  %v792_v18 = vmul.f32 %v3871_v51, %v3871_v51  ;;  %2189 = vmatmul.bf16.vlgmr.msrb.gmra.mxu1 %v1072_v41  ;;  %v3886_v29 = vadd.f32 %v760_v54, %v453_v43  ;;  %v1011_v13 = vmul.f32 0.5, %v979_v49  ;;  %v3225_v49 = vld [vmem:[%s3480_s30 + $0x378] sm:$0xff]  ;;  %v3195_v58 = vld [vmem:[%s3480_s30 + $0x288] sm:$0xff] }
  0xf5   : > { %v3311_v12 = vpop.eup %3310  ;;  %v934_v15 = vmul.f32 0.7978846, %v902_v63  ;;  %v454_v33 = vperm.slane %v3715_v22, 7  ;;  %2242 = vmatpush.bf16.msra.mxu1 %v3188_v35  ;;  %v1041_v17 = vmul.f32 %v3846_v34, %v3704_v5  ;;  %v1012_v19 = vmul.f32 0.5, %v980_v55  ;;  %v762_v55 = vpop.f32.mrf.mxu2  ;;  %v3216_v63 = vld [vmem:[%s3480_s30 + $0x330] sm:$0xff] }
  0xf6   : > { %v3313_v53 = vpop.eup %3312  ;;  %3316 = vtanh.f32 %v933_v11  ;;  %2255 = vmatpush.bf16.msra.mxu2 %v3197_v44  ;;  %v1057_v27 = vmul.f32 %v1025_v61, %v3738_v42  ;;  %v995_v28 = vadd.f32 1.0, %v3309_v1  ;;  %v855_v3 = vmul.f32 0.044715, %v823_v21  ;;  %v776_v61 = vpop.f32.mrf.mxu3 }
  0xf7   : > { %v3315_v25 = vpop.eup %3314  ;;  %3318 = vtanh.f32 %v934_v15  ;;  %2268 = vmatpush.bf16.msra.mxu3 %v3206_v0  ;;  %2229 = vmatpush.bf16.msra.mxu0 %v3179_v56  ;;  %v1042_v5 = vmul.f32 %v1010_v60, %v3707_v8  ;;  %v1058_v34 = vmul.f32 %v1026_v7, %v3740_v57  ;;  %v824_v39 = vmul.f32 %v792_v18, %v3871_v51  ;;  %v3186_v57 = vld [vmem:[%s3480_s30 + $0x240] sm:$0xff]  ;;  %v3224_v15 = vld [vmem:[%s3480_s30 + $0x370] sm:$0xff] }
  0xf8   : > { %v793_v42 = vmul.f32 %v3886_v29, %v3886_v29  ;;  %v3903_v37 = vmul.f32 %v1011_v13, %v3762_v30  ;;  %v996_v47 = vadd.f32 1.0, %v3315_v25  ;;  %v3907_v52 = vadd.f32 %v774_v59, %v454_v33 }
  0xf9   : > { %v3911_v8 = vadd.f32 %v734_v20, %v451_v16  ;;  %2243 = vmatpush.bf16.msra.mxu1 %v3187_v36  ;;  %v3918_v2 = vmul.f32 %v1012_v19, %v3767_v32  ;;  %v981_v30 = vadd.f32 1.0, %v3311_v12  ;;  %v982_v10 = vadd.f32 1.0, %v3313_v53  ;;  %v3204_v32 = vld [vmem:[%s3480_s30 + $0x2d0] sm:$0xff]  ;;  %v3203_v20 = vld [vmem:[%s3480_s30 + $0x2c8] sm:$0xff] }
  0xfa   : > { %v3922_v48 = vadd.f32 %v748_v26, %v452_v45  ;;  %2256 = vmatpush.bf16.msra.mxu2 %v3196_v23  ;;  %v1027_v50 = vmul.f32 0.5, %v995_v28  ;;  %v887_v16 = vadd.f32 %v855_v3, %v3859_v31  ;;  %v1073_v35 = vpack.c.bf16 %v1057_v27, %v1041_v17  ;;  %v3194_v23 = vld [vmem:[%s3480_s30 + $0x280] sm:$0xff]  ;;  %v3215_v3 = vld [vmem:[%s3480_s30 + $0x328] sm:$0xff] }
  0xfb   : > { %v807_v54 = vmul.f32 %v3911_v8, %v3911_v8  ;;  %2269 = vmatpush.bf16.msra.mxu3 %v3205_v9  ;;  %2230 = vmatpush.bf16.msra.mxu0 %v3178_v38  ;;  %v856_v59 = vmul.f32 0.044715, %v824_v39  ;;  %v825_v45 = vmul.f32 %v793_v42, %v3886_v29  ;;  %v1074_v60 = vpack.c.bf16 %v1058_v34, %v1042_v5  ;;  %v3223_v42 = vld [vmem:[%s3480_s30 + $0x368] sm:$0xff] }
  0xfc   : > { %v3317_v41 = vpop.eup %3316  ;;  %v808_v44 = vmul.f32 %v3922_v48, %v3922_v48  ;;  %v1028_v0 = vmul.f32 0.5, %v996_v47  ;;  %v794_v1 = vmul.f32 %v3907_v52, %v3907_v52  ;;  %2203 = vmatmul.bf16.vlgmr.msrb.gmra.mxu2 %v1073_v35  ;;  %v1013_v11 = vmul.f32 0.5, %v981_v30  ;;  %v3241_v30 = vld [vmem:[%s3480_s30 + $0x3f8] sm:$0xff] }
  0xfd   : > { %v3319_v21 = vpop.eup %3318  ;;  %v997_v56 = vadd.f32 1.0, %v3317_v41  ;;  %v839_v7 = vmul.f32 %v807_v54, %v3911_v8  ;;  %2244 = vmatpush.bf16.msra.mxu1 %v3186_v57  ;;  %2217 = vmatmul.bf16.vlgmr.msrb.gmra.mxu3 %v1074_v60  ;;  %v3940_v13 = vadd.f32 %v762_v55, %v453_v43  ;;  %v1059_v36 = vmul.f32 %v1027_v50, %v3786_v6  ;;  %v3233_v6 = vld [vmem:[%s3480_s30 + $0x3b8] sm:$0xff]  ;;  %v3202_v57 = vld [vmem:[%s3480_s30 + $0x2c0] sm:$0xff] }
  0xfe   : > { %v998_v18 = vadd.f32 1.0, %v3319_v21  ;;  %v840_v12 = vmul.f32 %v808_v44, %v3922_v48  ;;  %v919_v53 = vmul.f32 0.7978846, %v887_v16  ;;  %v3946_v19 = vadd.f32 %v776_v61, %v454_v33  ;;  %2257 = vmatpush.bf16.msra.mxu2 %v3195_v58  ;;  %v3214_v58 = vld [vmem:[%s3480_s30 + $0x320] sm:$0xff]  ;;  %v3231_v21 = vld [vmem:[%s3480_s30 + $0x3a8] sm:$0xff] }
  0xff   : > { %2279 = vmatpush.bf16.msrb.mxu0 %v3217_v40  ;;  %v871_v17 = vmul.f32 0.044715, %v839_v7  ;;  %2270 = vmatpush.bf16.msra.mxu3 %v3204_v32  ;;  %v888_v43 = vadd.f32 %v856_v59, %v3871_v51  ;;  %v857_v25 = vmul.f32 0.044715, %v825_v45  ;;  %v809_v28 = vmul.f32 %v3940_v13, %v3940_v13  ;;  %v3222_v44 = vld [vmem:[%s3480_s30 + $0x360] sm:$0xff] }
 0x100   : > { %v872_v27 = vmul.f32 0.044715, %v840_v12  ;;  %v1060_v22 = vmul.f32 %v1028_v0, %v3808_v24  ;;  %v1029_v33 = vmul.f32 0.5, %v997_v56  ;;  %v826_v26 = vmul.f32 %v794_v1, %v3907_v52  ;;  %v2338_v60 = vld [vmem:[%s3972_s27] sm:$0xff] }
 0x101   : > { %2293 = vmatpush.bf16.msrb.mxu1 %v3225_v49  ;;  %v903_v9 = vadd.f32 %v871_v17, %v3911_v8  ;;  %v1030_v38 = vmul.f32 0.5, %v998_v18  ;;  %v841_v34 = vmul.f32 %v809_v28, %v3940_v13  ;;  %v810_v39 = vmul.f32 %v3946_v19, %v3946_v19  ;;  %v3232_v49 = vld [vmem:[%s3480_s30 + $0x3b0] sm:$0xff]  ;;  %v3221_v18 = vld [vmem:[%s3480_s30 + $0x358] sm:$0xff] }
 0x102   : > { %v904_v5 = vadd.f32 %v872_v27, %v3922_v48  ;;  %v1014_v24 = vmul.f32 0.5, %v982_v10  ;;  %3320 = vtanh.f32 %v919_v53  ;;  %v1075_v47 = vpack.c.bf16 %v1059_v36, %v3903_v37  ;;  %2258 = vmatpush.bf16.msra.mxu2 %v3194_v23  ;;  %v3239_v36 = vld [vmem:[%s3480_s30 + $0x3e8] sm:$0xff]  ;;  %v3230_v53 = vld [vmem:[%s3480_s30 + $0x3a0] sm:$0xff] }
 0x103   : > { %2280 = vmatpush.bf16.msrb.mxu0 %v3216_v63  ;;  %v935_v40 = vmul.f32 0.7978846, %v903_v9  ;;  %2271 = vmatpush.bf16.msra.mxu3 %v3203_v20  ;;  %v920_v50 = vmul.f32 0.7978846, %v888_v43  ;;  %v873_v54 = vmul.f32 0.044715, %v841_v34  ;;  %v842_v35 = vmul.f32 %v810_v39, %v3946_v19 }
 0x104   : > { %v936_v16 = vmul.f32 0.7978846, %v904_v5  ;;  %v1061_v37 = vmul.f32 %v1029_v33, %v3836_v4  ;;  %v889_v10 = vadd.f32 %v857_v25, %v3886_v29  ;;  %v858_v55 = vmul.f32 0.044715, %v826_v26  ;;  %2231 = vmatmul.bf16.vlgmr.msra.gmra.mxu0 %v1075_v47  ;;  %v3240_v63 = vld [vmem:[%s3480_s30 + $0x3f0] sm:$0xff]  ;;  %v3211_v9 = vld [vmem:[%s3480_s30 + $0x308] sm:$0xff] }
 0x105   : > { %2294 = vmatpush.bf16.msrb.mxu1 %v3224_v15  ;;  %v1076_v32 = vpack.c.bf16 %v1060_v22, %v3918_v2  ;;  %v1062_v41 = vmul.f32 %v1030_v38, %v3840_v62  ;;  %3322 = vtanh.f32 %v935_v40  ;;  %v905_v59 = vadd.f32 %v873_v54, %v3940_v13  ;;  %v3212_v20 = vld [vmem:[%s3480_s30 + $0x310] sm:$0xff]  ;;  %v3229_v22 = vld [vmem:[%s3480_s30 + $0x398] sm:$0xff]  ;;  %v3219_v5 = vld [vmem:[%s3480_s30 + $0x348] sm:$0xff] }
 0x106   : > { %2307 = vmatpush.bf16.msrb.mxu2 %v3233_v6  ;;  %v874_v45 = vmul.f32 0.044715, %v842_v35  ;;  %v1045_v4 = vmul.f32 %v1013_v11, %v3793_v14  ;;  %3324 = vtanh.f32 %v936_v16  ;;  %v1046_v2 = vmul.f32 %v1014_v24, %v3798_v46  ;;  %v3213_v14 = vld [vmem:[%s3480_s30 + $0x318] sm:$0xff]  ;;  %v3220_v25 = vld [vmem:[%s3480_s30 + $0x350] sm:$0xff]  ;;  %v2339_v6 = vld [vmem:[%s3972_s27 + $0x8] sm:$0xff] }
 0x107   : > { %2281 = vmatpush.bf16.msrb.mxu0 %v3215_v3  ;;  %2245 = vmatmul.bf16.vlgmr.msra.gmra.mxu1 %v1076_v32  ;;  %3326 = vtanh.f32 %v920_v50  ;;  %v937_v61 = vmul.f32 0.7978846, %v905_v59  ;;  %v3389_v1 = vmov 0   ;;  %v921_v7 = vmul.f32 0.7978846, %v889_v10  ;;  %v3238_v3 = vld [vmem:[%s3480_s30 + $0x3e0] sm:$0xff] }
 0x108   : > { %2272 = vmatpush.bf16.msra.mxu3 %v3202_v57  ;;  %v906_v62 = vadd.f32 %v874_v45, %v3946_v19  ;;  %v3321_v0 = vpop.eup %3320  ;;  %v1077_v56 = vpack.c.bf16 %v1061_v37, %v1045_v4  ;;  %3270 = vset.pattern.permute.xlu0 %v3389_v1  ;;  %v890_v46 = vadd.f32 %v858_v55, %v3907_v52  ;;  %v3237_v24 = vld [vmem:[%s3480_s30 + $0x3d8] sm:$0xff]  ;;  %v3228_v40 = vld [vmem:[%s3480_s30 + $0x390] sm:$0xff]  ;;  %v3218_v16 = vld [vmem:[%s3480_s30 + $0x340] sm:$0xff] }
 0x109   : > { %2295 = vmatpush.bf16.msrb.mxu1 %v3223_v42  ;;  %v1078_v11 = vpack.c.bf16 %v1062_v41, %v1046_v2  ;;  %2344 = vperm.xlu0 %3270, %v2338_v60   ;;  %3328 = vtanh.f32 %v937_v61  ;;  %v983_v33 = vadd.f32 1.0, %v3321_v0  ;;  %v3236_v55 = vld [vmem:[%s3480_s30 + $0x3d0] sm:$0xff]  ;;  %v3227_v32 = vld [vmem:[%s3480_s30 + $0x388] sm:$0xff]  ;;  %v3226_v2 = vld [vmem:[%s3480_s30 + $0x380] sm:$0xff] }
 0x10a   : > { %2308 = vmatpush.bf16.msrb.mxu2 %v3232_v49  ;;  %v938_v15 = vmul.f32 0.7978846, %v906_v62  ;;  %3330 = vtanh.f32 %v921_v7  ;;  %v922_v43 = vmul.f32 0.7978846, %v890_v46  ;;  %v3210_v49 = vld [vmem:[%s3480_s30 + $0x300] sm:$0xff]  ;;  %v3235_v60 = vld [vmem:[%s3480_s30 + $0x3c8] sm:$0xff] }
 0x10b   : > { %2282 = vmatpush.bf16.msrb.mxu0 %v3214_v58  ;;  %v3323_v12 = vpop.eup %3322  ;;  %v1015_v47 = vmul.f32 0.5, %v983_v33 }
 0x10c   : > { %2321 = vmatpush.bf16.msrb.mxu3 %v3241_v30  ;;  %v3325_v17 = vpop.eup %3324  ;;  %2259 = vmatmul.bf16.vlgmr.msra.gmra.mxu2 %v1077_v56  ;;  %v999_v27 = vadd.f32 1.0, %v3323_v12  ;;  %3332 = vtanh.f32 %v938_v15 }
 0x10d   : > { %2296 = vmatpush.bf16.msrb.mxu1 %v3222_v44  ;;  %v3327_v23 = vpop.eup %3326  ;;  %2273 = vmatmul.bf16.vlgmr.msra.gmra.mxu3 %v1078_v11  ;;  %v1000_v28 = vadd.f32 1.0, %v3325_v17  ;;  %3334 = vtanh.f32 %v922_v43  ;;  %v1047_v58 = vmul.f32 %v1015_v47, %v3859_v31 }
 0x10e   : > { %2309 = vmatpush.bf16.msrb.mxu2 %v3231_v21  ;;  %v984_v26 = vadd.f32 1.0, %v3327_v23  ;;  %v1031_v34 = vmul.f32 0.5, %v999_v27 }
 0x10f   : > { %2283 = vmatpush.bf16.msrb.mxu0 %v3213_v14  ;;  %v3329_v38 = vpop.eup %3328  ;;  %v1032_v39 = vmul.f32 0.5, %v1000_v28 }
 0x110   : > { %2322 = vmatpush.bf16.msrb.mxu3 %v3240_v63  ;;  %v3331_v42 = vpop.eup %3330  ;;  %v1016_v57 = vmul.f32 0.5, %v984_v26  ;;  %v1001_v30 = vadd.f32 1.0, %v3329_v38  ;;  %v1063_v35 = vmul.f32 %v1031_v34, %v3911_v8  ;;  %v3234_v63 = vld [vmem:[%s3480_s30 + $0x3c0] sm:$0xff] }
 0x111   : > { %2297 = vmatpush.bf16.msrb.mxu1 %v3221_v18  ;;  %2349 = vperm.xlu0 %3270, %v2339_v6   ;;  %v985_v54 = vadd.f32 1.0, %v3331_v42  ;;  %v1064_v37 = vmul.f32 %v1032_v39, %v3922_v48  ;;  %v3271_v18 = vld [vmem:[%s395_s11] ss:$0 sm:$0xff] }
 0x112   : > { %2310 = vmatpush.bf16.msrb.mxu2 %v3230_v53  ;;  %v3333_v50 = vpop.eup %3332  ;;  %v1048_v41 = vmul.f32 %v1016_v57, %v3871_v51  ;;  %v1033_v59 = vmul.f32 0.5, %v1001_v30  ;;  %v1079_v4 = vpack.c.bf16 %v1063_v35, %v1047_v58 }
 0x113   : > { %2284 = vmatpush.bf16.msrb.mxu0 %v3212_v20  ;;  %v3335_v10 = vpop.eup %3334  ;;  %v1002_v45 = vadd.f32 1.0, %v3333_v50  ;;  %v1017_v44 = vmul.f32 0.5, %v985_v54 }
 0x114   : > { %2323 = vmatpush.bf16.msrb.mxu3 %v3239_v36  ;;  %v986_v8 = vadd.f32 1.0, %v3335_v10  ;;  %v1080_v48 = vpack.c.bf16 %v1064_v37, %v1048_v41  ;;  %v1065_v61 = vmul.f32 %v1033_v59, %v3940_v13 }
 0x115   : > { %2298 = vmatpush.bf16.msrb.mxu1 %v3220_v25  ;;  %v1034_v62 = vmul.f32 0.5, %v1002_v45  ;;  %v1049_v31 = vmul.f32 %v1017_v44, %v3886_v29 }
 0x116   : > { %2311 = vmatpush.bf16.msrb.mxu2 %v3229_v22  ;;  %v1018_v51 = vmul.f32 0.5, %v986_v8 }
 0x117   : > { %2285 = vmatpush.bf16.msrb.mxu0 %v3211_v9  ;;  %v1066_v21 = vmul.f32 %v1034_v62, %v3946_v19  ;;  %v1081_v0 = vpack.c.bf16 %v1065_v61, %v1049_v31 }
 0x118   : > { %2324 = vmatpush.bf16.msrb.mxu3 %v3238_v3  ;;  %v1050_v56 = vmul.f32 %v1018_v51, %v3907_v52 }
 0x119   : > { %2299 = vmatpush.bf16.msrb.mxu1 %v3219_v5 }
 0x11a   : > { %2312 = vmatpush.bf16.msrb.mxu2 %v3228_v40  ;;  %v1082_v14 = vpack.c.bf16 %v1066_v21, %v1050_v56 }
 0x11b   : > { %2286 = vmatpush.bf16.msrb.mxu0 %v3210_v49 }
 0x11c   : > { %2325 = vmatpush.bf16.msrb.mxu3 %v3237_v24 }
 0x11d   : > { %2300 = vmatpush.bf16.msrb.mxu1 %v3218_v16 }
 0x11e   : > { %2313 = vmatpush.bf16.msrb.mxu2 %v3227_v32  ;;  %2287 = vmatmul.bf16.vlgmr.msrb.gmra.mxu0 %v1079_v4 }
 0x120   : > { %2326 = vmatpush.bf16.msrb.mxu3 %v3236_v55  ;;  %2301 = vmatmul.bf16.vlgmr.msrb.gmra.mxu1 %v1080_v48 }
 0x122   : > { %2314 = vmatpush.bf16.msrb.mxu2 %v3226_v2 }
 0x124   : > { %2327 = vmatpush.bf16.msrb.mxu3 %v3235_v60 }
 0x125   : > { %2315 = vmatmul.bf16.vlgmr.msrb.gmra.mxu2 %v1081_v0  ;;  %v2340_v0 = vld [vmem:[%s4049_s8] sm:$0xff] }
 0x128   : > { %2328 = vmatpush.bf16.msrb.mxu3 %v3234_v63 }
 0x12b   : > { %2329 = vmatmul.bf16.vlgmr.msrb.gmra.mxu3 %v1082_v14 }
 0x15a   : > { %v2120_v13 = vpop.f32.mrf.mxu0 }
 0x15b   : > { %v2121_v15 = vadd.f32 %v3271_v18, %v2120_v13 }
 0x15c   : > { %v2134_v1 = vpop.f32.mrf.mxu1 }
 0x15d   : > { %v2135_v53 = vadd.f32 %v2134_v1, %v2121_v15 }
 0x162   : > { %v2122_v7 = vpop.f32.mrf.mxu0 }
 0x163   : > { %v2123_v43 = vadd.f32 %v3271_v18, %v2122_v7  ;;  %v2341_v18 = vld [vmem:[%s4049_s8 + $0x8] sm:$0xff] }
 0x164   : > { %v2136_v29 = vpop.f32.mrf.mxu1 }
 0x165   : > { %v2137_v28 = vadd.f32 %v2136_v29, %v2123_v43 }
 0x168   : > { %v2148_v46 = vpop.f32.mrf.mxu2 }
 0x169   : > { %v2149_v17 = vadd.f32 %v2148_v46, %v2135_v53 }
 0x16d   : > { %v2162_v11 = vpop.f32.mrf.mxu3 }
 0x16e   : > { %v2176_v12 = vpop.f32.mrf.mxu0  ;;  %v2163_v25 = vadd.f32 %v2162_v11, %v2149_v17 }
 0x170   : > { %v2150_v19 = vpop.f32.mrf.mxu2  ;;  %v2177_v3 = vadd.f32 %v2176_v12, %v2163_v25 }
 0x171   : > { %v2190_v52 = vpop.f32.mrf.mxu1  ;;  %v2151_v22 = vadd.f32 %v2150_v19, %v2137_v28 }
 0x172   : > { %v2191_v9 = vadd.f32 %v2190_v52, %v2177_v3 }
 0x175   : > { %v2164_v36 = vpop.f32.mrf.mxu3 }
 0x176   : > { %v2178_v20 = vpop.f32.mrf.mxu0  ;;  %v2165_v38 = vadd.f32 %v2164_v36, %v2151_v22 }
 0x178   : > { %v2179_v39 = vadd.f32 %v2178_v20, %v2165_v38 }
 0x179   : > { %v2192_v6 = vpop.f32.mrf.mxu1 }
 0x17a   : > { %v2193_v40 = vadd.f32 %v2192_v6, %v2179_v39 }
 0x17b   : > { %v2345_v31 = vpop.permute.xlu0 %2344 }
 0x17f   : > { %v2204_v23 = vpop.f32.mrf.mxu2 }
 0x180   : > { %v2218_v27 = vpop.f32.mrf.mxu3  ;;  %v2205_v5 = vadd.f32 %v2204_v23, %v2191_v9 }
 0x181   : > { %v2232_v33 = vpop.f32.mrf.mxu0 }
 0x182   : > { %v2219_v24 = vadd.f32 %v2218_v27, %v2205_v5 }
 0x183   : > { %v2350_v29 = vpop.permute.xlu0 %2349 }
 0x184   : > { %v2246_v42 = vpop.f32.mrf.mxu1  ;;  %v2233_v30 = vadd.f32 %v2232_v33, %v2219_v24 }
 0x186   : > { %v2247_v16 = vadd.f32 %v2246_v42, %v2233_v30 }
 0x187   : > { %v2206_v26 = vpop.f32.mrf.mxu2 }
 0x188   : > { %v2220_v34 = vpop.f32.mrf.mxu3  ;;  %v2207_v49 = vadd.f32 %v2206_v26, %v2193_v40 }
 0x189   : > { %v2234_v47 = vpop.f32.mrf.mxu0 }
 0x18a   : > { %v2221_v54 = vadd.f32 %v2220_v34, %v2207_v49 }
 0x18c   : > { %v2248_v35 = vpop.f32.mrf.mxu1  ;;  %v2235_v55 = vadd.f32 %v2234_v47, %v2221_v54 }
 0x18e   : > { %v2249_v41 = vadd.f32 %v2248_v35, %v2235_v55 }
 0x18f   : > { %v2260_v57 = vpop.f32.mrf.mxu2 }
 0x190   : > { %v2274_v50 = vpop.f32.mrf.mxu3  ;;  %v2261_v37 = vadd.f32 %v2260_v57, %v2247_v16 }
 0x192   : > { %v2275_v58 = vadd.f32 %v2274_v50, %v2261_v37 }
 0x197   : > { %v2262_v32 = vpop.f32.mrf.mxu2 }
 0x198   : > { %v2276_v45 = vpop.f32.mrf.mxu3  ;;  %v2263_v8 = vadd.f32 %v2262_v32, %v2249_v41 }
 0x19a   : > { %v2277_v2 = vadd.f32 %v2276_v45, %v2263_v8 }
 0x19b   : > { %v2288_v10 = vpop.f32.mrf.mxu0 }
 0x19c   : > { %v2289_v59 = vadd.f32 %v2288_v10, %v2275_v58 }
 0x19d   : > { %v2302_v44 = vpop.f32.mrf.mxu1 }
 0x19e   : > { %v2303_v4 = vadd.f32 %v2302_v44, %v2289_v59 }
 0x1a3   : > { %v2290_v48 = vpop.f32.mrf.mxu0 }
 0x1a4   : > { %v2291_v62 = vadd.f32 %v2290_v48, %v2277_v2 }
 0x1a5   : > { %v2304_v21 = vpop.f32.mrf.mxu1 }
 0x1a6   : > { %v2305_v56 = vadd.f32 %v2304_v21, %v2291_v62 }
 0x1a8   : > { %v2316_v60 = vpop.f32.mrf.mxu2 }
 0x1a9   : > { %v2317_v61 = vadd.f32 %v2316_v60, %v2303_v4 }
 0x1ae   : > { %v2330_v51 = vpop.f32.mrf.mxu3 }
 0x1af   : > { %v2331_v63 = vadd.f32 %v2330_v51, %v2317_v61 }
 0x1b0   : > { %v2318_v13 = vpop.f32.mrf.mxu2 }
 0x1b1   : > { %v2352_v14 = vmul.f32 %v2345_v31, %v2331_v63  ;;  %v2319_v7 = vadd.f32 %v2318_v13, %v2305_v56 }
 0x1b3   : > { %v2354_v1 = vadd.f32 %v2352_v14, %v2340_v0 }
 0x1b5   : > { %2357 = vst.msk [vmem:[%s4049_s8] sm:$0xff] %vm2356_vm2, %v2354_v1 }
 0x1b6   : > { %v2332_v46 = vpop.f32.mrf.mxu3 }
 0x1b7   : > { %v2333_v11 = vadd.f32 %v2332_v46, %v2319_v7 }
 0x1b9   : > { %v2353_v12 = vmul.f32 %v2350_v29, %v2333_v11 }
 0x1bb   : > { %v2355_v19 = vadd.f32 %v2353_v12, %v2341_v18 }
 0x1bd   : > { %2358 = vst.msk [vmem:[%s4049_s8 + $0x8] sm:$0xff] %vm2356_vm2, %v2355_v19 }
 0x1be PF: > { %s31_s15 = sadd.s32 1, %s3384_s15   ;;  %s4051_s13 = smov %s3380_s14 }
 0x1bf   : > { %p28_p10 = scmp.ge.s32.totalorder %s31_s15, 6   ;;  %s4052_s14 = smov %s4054_s0 }
 0x1c1   :  { %30 = sbr.rel (!%p28_p10) target bundleno = 9 (0x9), region = 98 }

</bundles_post_ra>
